<compile_context>
chip_gen: v6e
topology: v6e:2x2x1
jax: 0.10.0
libtpu: 0.0.40
codegen_flags: <defaults>
</compile_context>

<pallas_src>
import functools
import math

import jax
import jax.numpy as jnp
from jax.experimental import pallas as pl
from jax.experimental.pallas import tpu as pltpu


def glcnmr_kernel(num_classes, col_chunk, use_bf16_pairwise,
                  counts_ref,                                   # scalar prefetch (SMEM)
                  xrow_ref, xT_ref, a_ref, mask_ref, xw_ref, blin_ref,   # inputs
                  out_ref,                                      # output
                  s_ref, rsum_ref):                             # VMEM scratch
    i = pl.program_id(0)
    xr = xrow_ref[...]                       # (TM, H) row tile of x_
    tm, hidden = xr.shape
    n = xT_ref.shape[1]
    num_chunks = n // col_chunk

    # optional bf16 pairwise math (v6e/v7x); accumulate in f32 either way
    xr_p = xr.astype(jnp.bfloat16) if use_bf16_pairwise else xr

    rsum_ref[...] = jnp.zeros_like(rsum_ref)

    # ---- pairwise |x_i - x_j| . a  ->  exp(masked sigmoid), chunked on lanes ----
    for c in range(num_chunks):
        c0 = c * col_chunk
        cnt = counts_ref[i * num_chunks + c]     # edges in this (row-tile, chunk)

        @pl.when(cnt > 0)
        def _occupied():
            xT_c = xT_ref[:, c0:c0 + col_chunk]                  # (H, chunk)
            xj = xT_c.astype(jnp.bfloat16) if use_bf16_pairwise else xT_c
            acc = jnp.zeros((tm, col_chunk), jnp.float32)
            for k in range(hidden):                              # static -> unrolled
                a_k = a_ref[k]                                   # scalar from SMEM
                d = jnp.abs(xr_p[:, k:k + 1] - xj[k:k + 1, :])   # (TM,1)-(1,chunk)
                acc = acc + d.astype(jnp.float32) * a_k
            # sigmoid on edges only; non-edges keep raw 0 -> exp(0) = 1
            sig = pl.reciprocal(1.0 + jnp.exp(-acc), approx=True)
            e = jnp.where(mask_ref[:, c0:c0 + col_chunk] != 0, jnp.exp(sig), 1.0)
            s_ref[:, c0:c0 + col_chunk] = e
            rsum_ref[...] = rsum_ref[...] + jnp.sum(e, axis=1, keepdims=True)

        @pl.when(cnt == 0)
        def _empty():
            # no edges: every raw entry is 0 -> exp(0) = 1 for the whole chunk
            s_ref[:, c0:c0 + col_chunk] = jnp.ones((tm, col_chunk), jnp.float32)
            rsum_ref[...] = rsum_ref[...] + jnp.float32(col_chunk)

    # ---- fused head:  softmax_row(S_raw) @ x_ @ W == (E @ XW) * (1/rowsum) ----
    zun = jnp.dot(s_ref[...], xw_ref[...], preferred_element_type=jnp.float32)  # (TM,CP)
    rinv = 1.0 / rsum_ref[...]                 # exact division (O(TM) work)
    z = jnp.maximum(zun * rinv + blin_ref[...], 0.0)

    # class softmax over the first `num_classes` lanes of the padded output
    col = jax.lax.broadcasted_iota(jnp.int32, z.shape, 1)
    valid = col < num_classes
    zm = jnp.where(valid, z, -1e30)
    m2 = jnp.max(zm, axis=1, keepdims=True)
    e2 = jnp.where(valid, jnp.exp(zm - m2), 0.0)
    out_ref[...] = e2 / jnp.sum(e2, axis=1, keepdims=True)


def _round_up(x, m):
    return ((x + m - 1) // m) * m


def _pick_tile_rows(N, H, CP, budget_bytes=24 << 20):
    """Largest multiple-of-32 row tile dividing N that fits a v7x-safe budget."""
    resident = 2 * (H * N * 4 + N * CP * 4 + CP * 4)     # x_T, XW, bias (2x buffered)
    for tm in (512, 256, 128, 64, 32):
        if tm <= N and N % tm == 0:
            per_step = (tm * N * 4          # exp(S) scratch (single buffer)
                        + 2 * tm * N        # int8 mask tile (double buffered)
                        + 2 * tm * CP * 4   # output tile
                        + 2 * tm * H * 4    # x_ row tile
                        + (256 << 10))      # live temporaries slack
            if resident + per_step <= budget_bytes:
                return tm
    return 32 if (N >= 32 and N % 32 == 0) else N


def glcnmr_forward(x, edge_index, params, tile_rows=None, col_chunk=None,
                   use_bf16_pairwise=False):
    N, Din = x.shape
    Q = params["Q"]            # (Din, H)
    bias = params["bias"]      # (1, H)
    a = params["a"]            # (1, H)
    W = params["W"]            # (H, C)  pre-transposed nn.Linear weight
    b_lin = params["b_lin"]    # (1, C)
    H = Q.shape[1]
    C = W.shape[1]

    # ---- hoisted once per call (XLA), not once per row tile ----
    x_ = (x @ Q + bias).astype(jnp.float32)            # (N, H)
    x_T = x_.T                                         # (H, N): j on the lane axis
    CP = _round_up(C, 128)                             # lane-dense padded head
    Wp = jnp.zeros((H, CP), jnp.float32).at[:, :C].set(W)
    XW = x_ @ Wp                                       # (N, CP): fused head weights
    bp = jnp.zeros((1, CP), jnp.float32).at[:, :C].set(b_lin)

    # dense int8 edge mask (COO scatter equivalent; distinct edges)
    mask = jnp.zeros((N, N), jnp.int8).at[edge_index[0], edge_index[1]].set(1)

    # ---- tiling ----
    if tile_rows is None:
        tile_rows = _pick_tile_rows(N, H, CP)
    TM = tile_rows
    assert N % TM == 0, "tile_rows must divide N"

    if col_chunk is None:
        col_chunk = N
        for cand in (512, 256, 128):
            if cand <= N and N % cand == 0:
                col_chunk = cand
                break
        # keep the per-chunk accumulator roughly vreg-resident
        while (col_chunk > 128 and TM * col_chunk * 4 > (128 << 10)
               and N % (col_chunk // 2) == 0):
            col_chunk //= 2
    assert N % col_chunk == 0, "col_chunk must divide N"

    n_row, n_col = N // TM, N // col_chunk

    # per-(row tile, column chunk) edge occupancy -> SMEM via scalar prefetch
    counts = (mask.astype(jnp.int32)
                  .reshape(n_row, TM, n_col, col_chunk)
                  .sum(axis=(1, 3))
                  .reshape(-1))                         # (n_row * n_col,) int32

    kernel = functools.partial(glcnmr_kernel, C, col_chunk, use_bf16_pairwise)

    out_padded = pl.pallas_call(
        kernel,
        out_shape=jax.ShapeDtypeStruct((N, CP), jnp.float32),
        grid_spec=pltpu.PrefetchScalarGridSpec(
            num_scalar_prefetch=1,
            grid=(n_row,),
            in_specs=[
                pl.BlockSpec((TM, H), lambda i, cnts: (i, 0)),       # x_ row tile
                pl.BlockSpec((H, N), lambda i, cnts: (0, 0)),        # x_^T (resident)
                pl.BlockSpec(memory_space=pltpu.MemorySpace.SMEM),   # a -> SMEM scalars
                pl.BlockSpec((TM, N), lambda i, cnts: (i, 0)),       # int8 edge-mask tile
                pl.BlockSpec((N, CP), lambda i, cnts: (0, 0)),       # XW (resident)
                pl.BlockSpec((1, CP), lambda i, cnts: (0, 0)),       # padded head bias
            ],
            out_specs=pl.BlockSpec((TM, CP), lambda i, cnts: (i, 0)),
            scratch_shapes=[
                pltpu.VMEM((TM, N), jnp.float32),    # exp(S_raw) row slab
                pltpu.VMEM((TM, 1), jnp.float32),    # softmax row sums
            ],
        ),
        compiler_params=pltpu.CompilerParams(
            dimension_semantics=("parallel",),
            vmem_limit_bytes=64 * 1024 * 1024,
        ),
    )(counts, x_, x_T, a.reshape(-1), mask, XW, bp)

    return out_padded[:, :C]


def glcnmr_reference(x, edge_index, params):
    """Pure-JAX reference mirroring the PyTorch module (eval mode)."""
    Q, bias, a = params["Q"], params["bias"], params["a"]
    W, b_lin = params["W"], params["b_lin"]
    N = x.shape[0]
    x_ = x @ Q + bias
    diff = jnp.abs(x_[edge_index[0]] - x_[edge_index[1]])          # (E,H)
    vals = jax.nn.sigmoid(diff @ a.reshape(-1))                     # (E,)
    S = jnp.zeros((N, N), jnp.float32).at[edge_index[0], edge_index[1]].set(vals)
    S = jax.nn.softmax(S, axis=1)
    deg = jnp.sum(S, axis=1)                                        # dense degrees == 1
    dinv = jnp.where(deg > 0, 1.0 / jnp.sqrt(deg), 0.0)
    lap = dinv[:, None] * S * dinv[None, :]                         # == (-L + I)
    h = lap @ x_
    z = jax.nn.relu(h @ W + b_lin)
    return jax.nn.softmax(z, axis=1)


def init_params(key, input_dim, hidden_dim, output_dim):
    """Deterministic init mimicking the PyTorch module's __init__ shapes."""
    k1, k2, k3, k4, k5 = jax.random.split(key, 5)

    # SparseGraphLearn: kaiming_uniform(a=sqrt(10)) on Q (in, hid) and a (hid, 1)
    gain = math.sqrt(2.0 / (1.0 + 10.0))
    bq = gain * math.sqrt(3.0 / hidden_dim)          # fan_in = Q.size(1)
    Q = jax.random.uniform(k1, (input_dim, hidden_dim), jnp.float32, -bq, bq)
    ba = gain * math.sqrt(3.0 / 1.0)                 # fan_in = a.size(1) = 1
    a = jax.random.uniform(k2, (1, hidden_dim), jnp.float32, -ba, ba)
    bb = 1.0 / math.sqrt(hidden_dim)
    bias = jax.random.uniform(k3, (1, hidden_dim), jnp.float32, -bb, bb)

    # nn.Linear(hidden, output): weight (out, hid) -> stored transposed (hid, out)
    bw = 1.0 / math.sqrt(hidden_dim)
    W = jax.random.uniform(k4, (hidden_dim, output_dim), jnp.float32, -bw, bw)
    b_lin = jax.random.uniform(k5, (1, output_dim), jnp.float32, -bw, bw)

    return {"Q": Q, "a": a, "bias": bias, "W": W, "b_lin": b_lin}


if __name__ == "__main__":
    N, INPUT_DIM, HIDDEN_DIM, OUTPUT_DIM = 128, 16, 32, 8

    key = jax.random.PRNGKey(0)
    kx, kp = jax.random.split(key)

    x = jax.random.normal(kx, (N, INPUT_DIM), jnp.float32)

    # deterministic edge list: bidirectional ring + self loops (no duplicates)
    idx = jnp.arange(N, dtype=jnp.int32)
    src = jnp.concatenate([idx, idx, idx])
    dst = jnp.concatenate([(idx + 1) % N, (idx - 1) % N, idx])
    edge_index = jnp.stack([src, dst], axis=0)       # (2, 3N)

    params = init_params(kp, INPUT_DIM, HIDDEN_DIM, OUTPUT_DIM)

    out = glcnmr_forward(x, edge_index, params, tile_rows=64)   # grid=(2,)
    out = jax.block_until_ready(out)

    # sanity: shape, finiteness, softmax-normalized rows, matches JAX reference
    assert out.shape == (N, OUTPUT_DIM)
    assert bool(jnp.all(jnp.isfinite(out)))
    assert bool(jnp.allclose(jnp.sum(out, axis=1), 1.0, atol=1e-5))
    ref = glcnmr_reference(x, edge_index, params)
    assert bool(jnp.allclose(out, ref, atol=1e-2))   # approx-recip (sigmoid) tolerance

    print("KERNEL_OK")
</pallas_src>

<mosaic_0001>
module attributes {stable_mosaic.version = 11 : i64} {
  func.func @glcnmr_kernel(%arg0: i32, %arg1: memref<2xi32, #tpu.memory_space<smem>>, %arg2: memref<64x32xf32, #tpu.memory_space<vmem>>, %arg3: memref<32x128xf32, #tpu.memory_space<vmem>>, %arg4: memref<32xf32, #tpu.memory_space<smem>>, %arg5: memref<64x128xi8, #tpu.memory_space<vmem>>, %arg6: memref<128x128xf32, #tpu.memory_space<vmem>>, %arg7: memref<1x128xf32, #tpu.memory_space<vmem>>, %arg8: memref<64x128xf32, #tpu.memory_space<vmem>>, %arg9: memref<64x128xf32, #tpu.memory_space<vmem>>, %arg10: memref<64x1xf32, #tpu.memory_space<vmem>>) attributes {dimension_semantics = [#tpu.dimension_semantics<parallel>], iteration_bounds = array<i64: 2>, scalar_prefetch = 1 : i64, scratch_operands = 2 : i64, tpu.core_type = #tpu.core_type<tc>, window_params = [{transform_indices = @transform_0, window_bounds = array<i64: 64, 32>}, {pipeline_mode = #tpu.pipeline_mode<synchronous>, transform_indices = @transform_1, window_bounds = array<i64: 32, 128>}, {transform_indices = @transform_2, window_bounds = array<i64: 32>}, {transform_indices = @transform_3, window_bounds = array<i64: 64, 128>}, {pipeline_mode = #tpu.pipeline_mode<synchronous>, transform_indices = @transform_4, window_bounds = array<i64: 128, 128>}, {pipeline_mode = #tpu.pipeline_mode<synchronous>, transform_indices = @transform_5, window_bounds = array<i64: 1, 128>}, {transform_indices = @transform_6, window_bounds = array<i64: 64, 128>}]} {
    %c0 = arith.constant 0 : index
    %c0_0 = arith.constant 0 : index
    %0 = vector.load %arg2[%c0, %c0_0] : memref<64x32xf32, #tpu.memory_space<vmem>>, vector<64x32xf32>
    %cst = arith.constant 0.000000e+00 : f32
    %1 = vector.broadcast %cst : f32 to vector<64x1xf32>
    %c0_1 = arith.constant 0 : index
    %c0_2 = arith.constant 0 : index
    %2 = vector.load %arg10[%c0_1, %c0_2] : memref<64x1xf32, #tpu.memory_space<vmem>>, vector<64x1xf32>
    tpu.vector_store %arg10[%c0_1, %c0_2], %1 {strides = array<i32>} : memref<64x1xf32, #tpu.memory_space<vmem>>, vector<64x1xf32>,
    %c1_i32 = arith.constant 1 : i32
    %3 = arith.muli %arg0, %c1_i32 : i32
    %c0_i32 = arith.constant 0 : i32
    %4 = arith.addi %3, %c0_i32 : i32
    %5 = arith.index_cast %4 : i32 to index
    %6 = memref.load %arg1[%5] : memref<2xi32, #tpu.memory_space<smem>>
    %c0_i32_3 = arith.constant 0 : i32
    %7 = arith.cmpi sgt, %6, %c0_i32_3 : i32
    %8 = arith.extui %7 : i1 to i32
    %c0_i32_4 = arith.constant 0 : i32
    %9 = arith.cmpi ne, %8, %c0_i32_4 : i32
    scf.if %9 {
      %c0_24 = arith.constant 0 : index
      %c0_25 = arith.constant 0 : index
      %43 = vector.load %arg3[%c0_24, %c0_25] : memref<32x128xf32, #tpu.memory_space<vmem>>, vector<32x128xf32>
      %cst_26 = arith.constant 0.000000e+00 : f32
      %44 = vector.broadcast %cst_26 : f32 to vector<64x128xf32>
      %c0_27 = arith.constant 0 : index
      %45 = memref.load %arg4[%c0_27] : memref<32xf32, #tpu.memory_space<smem>>
      %46 = vector.extract_strided_slice %0 {offsets = [0, 0], sizes = [64, 1], strides = [1, 1]} : vector<64x32xf32> to vector<64x1xf32>
      %47 = vector.extract_strided_slice %43 {offsets = [0, 0], sizes = [1, 128], strides = [1, 1]} : vector<32x128xf32> to vector<1x128xf32>
      %48 = vector.broadcast %46 : vector<64x1xf32> to vector<64x128xf32>
      %49 = vector.broadcast %47 : vector<1x128xf32> to vector<64x128xf32>
      %50 = arith.subf %48, %49 : vector<64x128xf32>
      %51 = math.absf %50 : vector<64x128xf32>
      %52 = vector.broadcast %45 : f32 to vector<64x128xf32>
      %53 = arith.mulf %51, %52 : vector<64x128xf32>
      %54 = arith.addf %44, %53 : vector<64x128xf32>
      %c1 = arith.constant 1 : index
      %55 = memref.load %arg4[%c1] : memref<32xf32, #tpu.memory_space<smem>>
      %56 = vector.extract_strided_slice %0 {offsets = [0, 1], sizes = [64, 1], strides = [1, 1]} : vector<64x32xf32> to vector<64x1xf32>
      %57 = vector.extract_strided_slice %43 {offsets = [1, 0], sizes = [1, 128], strides = [1, 1]} : vector<32x128xf32> to vector<1x128xf32>
      %58 = vector.broadcast %56 : vector<64x1xf32> to vector<64x128xf32>
      %59 = vector.broadcast %57 : vector<1x128xf32> to vector<64x128xf32>
      %60 = arith.subf %58, %59 : vector<64x128xf32>
      %61 = math.absf %60 : vector<64x128xf32>
      %62 = vector.broadcast %55 : f32 to vector<64x128xf32>
      %63 = arith.mulf %61, %62 : vector<64x128xf32>
      %64 = arith.addf %54, %63 : vector<64x128xf32>
      %c2 = arith.constant 2 : index
      %65 = memref.load %arg4[%c2] : memref<32xf32, #tpu.memory_space<smem>>
      %66 = vector.extract_strided_slice %0 {offsets = [0, 2], sizes = [64, 1], strides = [1, 1]} : vector<64x32xf32> to vector<64x1xf32>
      %67 = vector.extract_strided_slice %43 {offsets = [2, 0], sizes = [1, 128], strides = [1, 1]} : vector<32x128xf32> to vector<1x128xf32>
      %68 = vector.broadcast %66 : vector<64x1xf32> to vector<64x128xf32>
      %69 = vector.broadcast %67 : vector<1x128xf32> to vector<64x128xf32>
      %70 = arith.subf %68, %69 : vector<64x128xf32>
      %71 = math.absf %70 : vector<64x128xf32>
      %72 = vector.broadcast %65 : f32 to vector<64x128xf32>
      %73 = arith.mulf %71, %72 : vector<64x128xf32>
      %74 = arith.addf %64, %73 : vector<64x128xf32>
      %c3 = arith.constant 3 : index
      %75 = memref.load %arg4[%c3] : memref<32xf32, #tpu.memory_space<smem>>
      %76 = vector.extract_strided_slice %0 {offsets = [0, 3], sizes = [64, 1], strides = [1, 1]} : vector<64x32xf32> to vector<64x1xf32>
      %77 = vector.extract_strided_slice %43 {offsets = [3, 0], sizes = [1, 128], strides = [1, 1]} : vector<32x128xf32> to vector<1x128xf32>
      %78 = vector.broadcast %76 : vector<64x1xf32> to vector<64x128xf32>
      %79 = vector.broadcast %77 : vector<1x128xf32> to vector<64x128xf32>
      %80 = arith.subf %78, %79 : vector<64x128xf32>
      %81 = math.absf %80 : vector<64x128xf32>
      %82 = vector.broadcast %75 : f32 to vector<64x128xf32>
      %83 = arith.mulf %81, %82 : vector<64x128xf32>
      %84 = arith.addf %74, %83 : vector<64x128xf32>
      %c4 = arith.constant 4 : index
      %85 = memref.load %arg4[%c4] : memref<32xf32, #tpu.memory_space<smem>>
      %86 = vector.extract_strided_slice %0 {offsets = [0, 4], sizes = [64, 1], strides = [1, 1]} : vector<64x32xf32> to vector<64x1xf32>
      %87 = vector.extract_strided_slice %43 {offsets = [4, 0], sizes = [1, 128], strides = [1, 1]} : vector<32x128xf32> to vector<1x128xf32>
      %88 = vector.broadcast %86 : vector<64x1xf32> to vector<64x128xf32>
      %89 = vector.broadcast %87 : vector<1x128xf32> to vector<64x128xf32>
      %90 = arith.subf %88, %89 : vector<64x128xf32>
      %91 = math.absf %90 : vector<64x128xf32>
      %92 = vector.broadcast %85 : f32 to vector<64x128xf32>
      %93 = arith.mulf %91, %92 : vector<64x128xf32>
      %94 = arith.addf %84, %93 : vector<64x128xf32>
      %c5 = arith.constant 5 : index
      %95 = memref.load %arg4[%c5] : memref<32xf32, #tpu.memory_space<smem>>
      %96 = vector.extract_strided_slice %0 {offsets = [0, 5], sizes = [64, 1], strides = [1, 1]} : vector<64x32xf32> to vector<64x1xf32>
      %97 = vector.extract_strided_slice %43 {offsets = [5, 0], sizes = [1, 128], strides = [1, 1]} : vector<32x128xf32> to vector<1x128xf32>
      %98 = vector.broadcast %96 : vector<64x1xf32> to vector<64x128xf32>
      %99 = vector.broadcast %97 : vector<1x128xf32> to vector<64x128xf32>
      %100 = arith.subf %98, %99 : vector<64x128xf32>
      %101 = math.absf %100 : vector<64x128xf32>
      %102 = vector.broadcast %95 : f32 to vector<64x128xf32>
      %103 = arith.mulf %101, %102 : vector<64x128xf32>
      %104 = arith.addf %94, %103 : vector<64x128xf32>
      %c6 = arith.constant 6 : index
      %105 = memref.load %arg4[%c6] : memref<32xf32, #tpu.memory_space<smem>>
      %106 = vector.extract_strided_slice %0 {offsets = [0, 6], sizes = [64, 1], strides = [1, 1]} : vector<64x32xf32> to vector<64x1xf32>
      %107 = vector.extract_strided_slice %43 {offsets = [6, 0], sizes = [1, 128], strides = [1, 1]} : vector<32x128xf32> to vector<1x128xf32>
      %108 = vector.broadcast %106 : vector<64x1xf32> to vector<64x128xf32>
      %109 = vector.broadcast %107 : vector<1x128xf32> to vector<64x128xf32>
      %110 = arith.subf %108, %109 : vector<64x128xf32>
      %111 = math.absf %110 : vector<64x128xf32>
      %112 = vector.broadcast %105 : f32 to vector<64x128xf32>
      %113 = arith.mulf %111, %112 : vector<64x128xf32>
      %114 = arith.addf %104, %113 : vector<64x128xf32>
      %c7 = arith.constant 7 : index
      %115 = memref.load %arg4[%c7] : memref<32xf32, #tpu.memory_space<smem>>
      %116 = vector.extract_strided_slice %0 {offsets = [0, 7], sizes = [64, 1], strides = [1, 1]} : vector<64x32xf32> to vector<64x1xf32>
      %117 = vector.extract_strided_slice %43 {offsets = [7, 0], sizes = [1, 128], strides = [1, 1]} : vector<32x128xf32> to vector<1x128xf32>
      %118 = vector.broadcast %116 : vector<64x1xf32> to vector<64x128xf32>
      %119 = vector.broadcast %117 : vector<1x128xf32> to vector<64x128xf32>
      %120 = arith.subf %118, %119 : vector<64x128xf32>
      %121 = math.absf %120 : vector<64x128xf32>
      %122 = vector.broadcast %115 : f32 to vector<64x128xf32>
      %123 = arith.mulf %121, %122 : vector<64x128xf32>
      %124 = arith.addf %114, %123 : vector<64x128xf32>
      %c8 = arith.constant 8 : index
      %125 = memref.load %arg4[%c8] : memref<32xf32, #tpu.memory_space<smem>>
      %126 = vector.extract_strided_slice %0 {offsets = [0, 8], sizes = [64, 1], strides = [1, 1]} : vector<64x32xf32> to vector<64x1xf32>
      %127 = vector.extract_strided_slice %43 {offsets = [8, 0], sizes = [1, 128], strides = [1, 1]} : vector<32x128xf32> to vector<1x128xf32>
      %128 = vector.broadcast %126 : vector<64x1xf32> to vector<64x128xf32>
      %129 = vector.broadcast %127 : vector<1x128xf32> to vector<64x128xf32>
      %130 = arith.subf %128, %129 : vector<64x128xf32>
      %131 = math.absf %130 : vector<64x128xf32>
      %132 = vector.broadcast %125 : f32 to vector<64x128xf32>
      %133 = arith.mulf %131, %132 : vector<64x128xf32>
      %134 = arith.addf %124, %133 : vector<64x128xf32>
      %c9 = arith.constant 9 : index
      %135 = memref.load %arg4[%c9] : memref<32xf32, #tpu.memory_space<smem>>
      %136 = vector.extract_strided_slice %0 {offsets = [0, 9], sizes = [64, 1], strides = [1, 1]} : vector<64x32xf32> to vector<64x1xf32>
      %137 = vector.extract_strided_slice %43 {offsets = [9, 0], sizes = [1, 128], strides = [1, 1]} : vector<32x128xf32> to vector<1x128xf32>
      %138 = vector.broadcast %136 : vector<64x1xf32> to vector<64x128xf32>
      %139 = vector.broadcast %137 : vector<1x128xf32> to vector<64x128xf32>
      %140 = arith.subf %138, %139 : vector<64x128xf32>
      %141 = math.absf %140 : vector<64x128xf32>
      %142 = vector.broadcast %135 : f32 to vector<64x128xf32>
      %143 = arith.mulf %141, %142 : vector<64x128xf32>
      %144 = arith.addf %134, %143 : vector<64x128xf32>
      %c10 = arith.constant 10 : index
      %145 = memref.load %arg4[%c10] : memref<32xf32, #tpu.memory_space<smem>>
      %146 = vector.extract_strided_slice %0 {offsets = [0, 10], sizes = [64, 1], strides = [1, 1]} : vector<64x32xf32> to vector<64x1xf32>
      %147 = vector.extract_strided_slice %43 {offsets = [10, 0], sizes = [1, 128], strides = [1, 1]} : vector<32x128xf32> to vector<1x128xf32>
      %148 = vector.broadcast %146 : vector<64x1xf32> to vector<64x128xf32>
      %149 = vector.broadcast %147 : vector<1x128xf32> to vector<64x128xf32>
      %150 = arith.subf %148, %149 : vector<64x128xf32>
      %151 = math.absf %150 : vector<64x128xf32>
      %152 = vector.broadcast %145 : f32 to vector<64x128xf32>
      %153 = arith.mulf %151, %152 : vector<64x128xf32>
      %154 = arith.addf %144, %153 : vector<64x128xf32>
      %c11 = arith.constant 11 : index
      %155 = memref.load %arg4[%c11] : memref<32xf32, #tpu.memory_space<smem>>
      %156 = vector.extract_strided_slice %0 {offsets = [0, 11], sizes = [64, 1], strides = [1, 1]} : vector<64x32xf32> to vector<64x1xf32>
      %157 = vector.extract_strided_slice %43 {offsets = [11, 0], sizes = [1, 128], strides = [1, 1]} : vector<32x128xf32> to vector<1x128xf32>
      %158 = vector.broadcast %156 : vector<64x1xf32> to vector<64x128xf32>
      %159 = vector.broadcast %157 : vector<1x128xf32> to vector<64x128xf32>
      %160 = arith.subf %158, %159 : vector<64x128xf32>
      %161 = math.absf %160 : vector<64x128xf32>
      %162 = vector.broadcast %155 : f32 to vector<64x128xf32>
      %163 = arith.mulf %161, %162 : vector<64x128xf32>
      %164 = arith.addf %154, %163 : vector<64x128xf32>
      %c12 = arith.constant 12 : index
      %165 = memref.load %arg4[%c12] : memref<32xf32, #tpu.memory_space<smem>>
      %166 = vector.extract_strided_slice %0 {offsets = [0, 12], sizes = [64, 1], strides = [1, 1]} : vector<64x32xf32> to vector<64x1xf32>
      %167 = vector.extract_strided_slice %43 {offsets = [12, 0], sizes = [1, 128], strides = [1, 1]} : vector<32x128xf32> to vector<1x128xf32>
      %168 = vector.broadcast %166 : vector<64x1xf32> to vector<64x128xf32>
      %169 = vector.broadcast %167 : vector<1x128xf32> to vector<64x128xf32>
      %170 = arith.subf %168, %169 : vector<64x128xf32>
      %171 = math.absf %170 : vector<64x128xf32>
      %172 = vector.broadcast %165 : f32 to vector<64x128xf32>
      %173 = arith.mulf %171, %172 : vector<64x128xf32>
      %174 = arith.addf %164, %173 : vector<64x128xf32>
      %c13 = arith.constant 13 : index
      %175 = memref.load %arg4[%c13] : memref<32xf32, #tpu.memory_space<smem>>
      %176 = vector.extract_strided_slice %0 {offsets = [0, 13], sizes = [64, 1], strides = [1, 1]} : vector<64x32xf32> to vector<64x1xf32>
      %177 = vector.extract_strided_slice %43 {offsets = [13, 0], sizes = [1, 128], strides = [1, 1]} : vector<32x128xf32> to vector<1x128xf32>
      %178 = vector.broadcast %176 : vector<64x1xf32> to vector<64x128xf32>
      %179 = vector.broadcast %177 : vector<1x128xf32> to vector<64x128xf32>
      %180 = arith.subf %178, %179 : vector<64x128xf32>
      %181 = math.absf %180 : vector<64x128xf32>
      %182 = vector.broadcast %175 : f32 to vector<64x128xf32>
      %183 = arith.mulf %181, %182 : vector<64x128xf32>
      %184 = arith.addf %174, %183 : vector<64x128xf32>
      %c14 = arith.constant 14 : index
      %185 = memref.load %arg4[%c14] : memref<32xf32, #tpu.memory_space<smem>>
      %186 = vector.extract_strided_slice %0 {offsets = [0, 14], sizes = [64, 1], strides = [1, 1]} : vector<64x32xf32> to vector<64x1xf32>
      %187 = vector.extract_strided_slice %43 {offsets = [14, 0], sizes = [1, 128], strides = [1, 1]} : vector<32x128xf32> to vector<1x128xf32>
      %188 = vector.broadcast %186 : vector<64x1xf32> to vector<64x128xf32>
      %189 = vector.broadcast %187 : vector<1x128xf32> to vector<64x128xf32>
      %190 = arith.subf %188, %189 : vector<64x128xf32>
      %191 = math.absf %190 : vector<64x128xf32>
      %192 = vector.broadcast %185 : f32 to vector<64x128xf32>
      %193 = arith.mulf %191, %192 : vector<64x128xf32>
      %194 = arith.addf %184, %193 : vector<64x128xf32>
      %c15 = arith.constant 15 : index
      %195 = memref.load %arg4[%c15] : memref<32xf32, #tpu.memory_space<smem>>
      %196 = vector.extract_strided_slice %0 {offsets = [0, 15], sizes = [64, 1], strides = [1, 1]} : vector<64x32xf32> to vector<64x1xf32>
      %197 = vector.extract_strided_slice %43 {offsets = [15, 0], sizes = [1, 128], strides = [1, 1]} : vector<32x128xf32> to vector<1x128xf32>
      %198 = vector.broadcast %196 : vector<64x1xf32> to vector<64x128xf32>
      %199 = vector.broadcast %197 : vector<1x128xf32> to vector<64x128xf32>
      %200 = arith.subf %198, %199 : vector<64x128xf32>
      %201 = math.absf %200 : vector<64x128xf32>
      %202 = vector.broadcast %195 : f32 to vector<64x128xf32>
      %203 = arith.mulf %201, %202 : vector<64x128xf32>
      %204 = arith.addf %194, %203 : vector<64x128xf32>
      %c16 = arith.constant 16 : index
      %205 = memref.load %arg4[%c16] : memref<32xf32, #tpu.memory_space<smem>>
      %206 = vector.extract_strided_slice %0 {offsets = [0, 16], sizes = [64, 1], strides = [1, 1]} : vector<64x32xf32> to vector<64x1xf32>
      %207 = vector.extract_strided_slice %43 {offsets = [16, 0], sizes = [1, 128], strides = [1, 1]} : vector<32x128xf32> to vector<1x128xf32>
      %208 = vector.broadcast %206 : vector<64x1xf32> to vector<64x128xf32>
      %209 = vector.broadcast %207 : vector<1x128xf32> to vector<64x128xf32>
      %210 = arith.subf %208, %209 : vector<64x128xf32>
      %211 = math.absf %210 : vector<64x128xf32>
      %212 = vector.broadcast %205 : f32 to vector<64x128xf32>
      %213 = arith.mulf %211, %212 : vector<64x128xf32>
      %214 = arith.addf %204, %213 : vector<64x128xf32>
      %c17 = arith.constant 17 : index
      %215 = memref.load %arg4[%c17] : memref<32xf32, #tpu.memory_space<smem>>
      %216 = vector.extract_strided_slice %0 {offsets = [0, 17], sizes = [64, 1], strides = [1, 1]} : vector<64x32xf32> to vector<64x1xf32>
      %217 = vector.extract_strided_slice %43 {offsets = [17, 0], sizes = [1, 128], strides = [1, 1]} : vector<32x128xf32> to vector<1x128xf32>
      %218 = vector.broadcast %216 : vector<64x1xf32> to vector<64x128xf32>
      %219 = vector.broadcast %217 : vector<1x128xf32> to vector<64x128xf32>
      %220 = arith.subf %218, %219 : vector<64x128xf32>
      %221 = math.absf %220 : vector<64x128xf32>
      %222 = vector.broadcast %215 : f32 to vector<64x128xf32>
      %223 = arith.mulf %221, %222 : vector<64x128xf32>
      %224 = arith.addf %214, %223 : vector<64x128xf32>
      %c18 = arith.constant 18 : index
      %225 = memref.load %arg4[%c18] : memref<32xf32, #tpu.memory_space<smem>>
      %226 = vector.extract_strided_slice %0 {offsets = [0, 18], sizes = [64, 1], strides = [1, 1]} : vector<64x32xf32> to vector<64x1xf32>
      %227 = vector.extract_strided_slice %43 {offsets = [18, 0], sizes = [1, 128], strides = [1, 1]} : vector<32x128xf32> to vector<1x128xf32>
      %228 = vector.broadcast %226 : vector<64x1xf32> to vector<64x128xf32>
      %229 = vector.broadcast %227 : vector<1x128xf32> to vector<64x128xf32>
      %230 = arith.subf %228, %229 : vector<64x128xf32>
      %231 = math.absf %230 : vector<64x128xf32>
      %232 = vector.broadcast %225 : f32 to vector<64x128xf32>
      %233 = arith.mulf %231, %232 : vector<64x128xf32>
      %234 = arith.addf %224, %233 : vector<64x128xf32>
      %c19 = arith.constant 19 : index
      %235 = memref.load %arg4[%c19] : memref<32xf32, #tpu.memory_space<smem>>
      %236 = vector.extract_strided_slice %0 {offsets = [0, 19], sizes = [64, 1], strides = [1, 1]} : vector<64x32xf32> to vector<64x1xf32>
      %237 = vector.extract_strided_slice %43 {offsets = [19, 0], sizes = [1, 128], strides = [1, 1]} : vector<32x128xf32> to vector<1x128xf32>
      %238 = vector.broadcast %236 : vector<64x1xf32> to vector<64x128xf32>
      %239 = vector.broadcast %237 : vector<1x128xf32> to vector<64x128xf32>
      %240 = arith.subf %238, %239 : vector<64x128xf32>
      %241 = math.absf %240 : vector<64x128xf32>
      %242 = vector.broadcast %235 : f32 to vector<64x128xf32>
      %243 = arith.mulf %241, %242 : vector<64x128xf32>
      %244 = arith.addf %234, %243 : vector<64x128xf32>
      %c20 = arith.constant 20 : index
      %245 = memref.load %arg4[%c20] : memref<32xf32, #tpu.memory_space<smem>>
      %246 = vector.extract_strided_slice %0 {offsets = [0, 20], sizes = [64, 1], strides = [1, 1]} : vector<64x32xf32> to vector<64x1xf32>
      %247 = vector.extract_strided_slice %43 {offsets = [20, 0], sizes = [1, 128], strides = [1, 1]} : vector<32x128xf32> to vector<1x128xf32>
      %248 = vector.broadcast %246 : vector<64x1xf32> to vector<64x128xf32>
      %249 = vector.broadcast %247 : vector<1x128xf32> to vector<64x128xf32>
      %250 = arith.subf %248, %249 : vector<64x128xf32>
      %251 = math.absf %250 : vector<64x128xf32>
      %252 = vector.broadcast %245 : f32 to vector<64x128xf32>
      %253 = arith.mulf %251, %252 : vector<64x128xf32>
      %254 = arith.addf %244, %253 : vector<64x128xf32>
      %c21 = arith.constant 21 : index
      %255 = memref.load %arg4[%c21] : memref<32xf32, #tpu.memory_space<smem>>
      %256 = vector.extract_strided_slice %0 {offsets = [0, 21], sizes = [64, 1], strides = [1, 1]} : vector<64x32xf32> to vector<64x1xf32>
      %257 = vector.extract_strided_slice %43 {offsets = [21, 0], sizes = [1, 128], strides = [1, 1]} : vector<32x128xf32> to vector<1x128xf32>
      %258 = vector.broadcast %256 : vector<64x1xf32> to vector<64x128xf32>
      %259 = vector.broadcast %257 : vector<1x128xf32> to vector<64x128xf32>
      %260 = arith.subf %258, %259 : vector<64x128xf32>
      %261 = math.absf %260 : vector<64x128xf32>
      %262 = vector.broadcast %255 : f32 to vector<64x128xf32>
      %263 = arith.mulf %261, %262 : vector<64x128xf32>
      %264 = arith.addf %254, %263 : vector<64x128xf32>
      %c22 = arith.constant 22 : index
      %265 = memref.load %arg4[%c22] : memref<32xf32, #tpu.memory_space<smem>>
      %266 = vector.extract_strided_slice %0 {offsets = [0, 22], sizes = [64, 1], strides = [1, 1]} : vector<64x32xf32> to vector<64x1xf32>
      %267 = vector.extract_strided_slice %43 {offsets = [22, 0], sizes = [1, 128], strides = [1, 1]} : vector<32x128xf32> to vector<1x128xf32>
      %268 = vector.broadcast %266 : vector<64x1xf32> to vector<64x128xf32>
      %269 = vector.broadcast %267 : vector<1x128xf32> to vector<64x128xf32>
      %270 = arith.subf %268, %269 : vector<64x128xf32>
      %271 = math.absf %270 : vector<64x128xf32>
      %272 = vector.broadcast %265 : f32 to vector<64x128xf32>
      %273 = arith.mulf %271, %272 : vector<64x128xf32>
      %274 = arith.addf %264, %273 : vector<64x128xf32>
      %c23 = arith.constant 23 : index
      %275 = memref.load %arg4[%c23] : memref<32xf32, #tpu.memory_space<smem>>
      %276 = vector.extract_strided_slice %0 {offsets = [0, 23], sizes = [64, 1], strides = [1, 1]} : vector<64x32xf32> to vector<64x1xf32>
      %277 = vector.extract_strided_slice %43 {offsets = [23, 0], sizes = [1, 128], strides = [1, 1]} : vector<32x128xf32> to vector<1x128xf32>
      %278 = vector.broadcast %276 : vector<64x1xf32> to vector<64x128xf32>
      %279 = vector.broadcast %277 : vector<1x128xf32> to vector<64x128xf32>
      %280 = arith.subf %278, %279 : vector<64x128xf32>
      %281 = math.absf %280 : vector<64x128xf32>
      %282 = vector.broadcast %275 : f32 to vector<64x128xf32>
      %283 = arith.mulf %281, %282 : vector<64x128xf32>
      %284 = arith.addf %274, %283 : vector<64x128xf32>
      %c24 = arith.constant 24 : index
      %285 = memref.load %arg4[%c24] : memref<32xf32, #tpu.memory_space<smem>>
      %286 = vector.extract_strided_slice %0 {offsets = [0, 24], sizes = [64, 1], strides = [1, 1]} : vector<64x32xf32> to vector<64x1xf32>
      %287 = vector.extract_strided_slice %43 {offsets = [24, 0], sizes = [1, 128], strides = [1, 1]} : vector<32x128xf32> to vector<1x128xf32>
      %288 = vector.broadcast %286 : vector<64x1xf32> to vector<64x128xf32>
      %289 = vector.broadcast %287 : vector<1x128xf32> to vector<64x128xf32>
      %290 = arith.subf %288, %289 : vector<64x128xf32>
      %291 = math.absf %290 : vector<64x128xf32>
      %292 = vector.broadcast %285 : f32 to vector<64x128xf32>
      %293 = arith.mulf %291, %292 : vector<64x128xf32>
      %294 = arith.addf %284, %293 : vector<64x128xf32>
      %c25 = arith.constant 25 : index
      %295 = memref.load %arg4[%c25] : memref<32xf32, #tpu.memory_space<smem>>
      %296 = vector.extract_strided_slice %0 {offsets = [0, 25], sizes = [64, 1], strides = [1, 1]} : vector<64x32xf32> to vector<64x1xf32>
      %297 = vector.extract_strided_slice %43 {offsets = [25, 0], sizes = [1, 128], strides = [1, 1]} : vector<32x128xf32> to vector<1x128xf32>
      %298 = vector.broadcast %296 : vector<64x1xf32> to vector<64x128xf32>
      %299 = vector.broadcast %297 : vector<1x128xf32> to vector<64x128xf32>
      %300 = arith.subf %298, %299 : vector<64x128xf32>
      %301 = math.absf %300 : vector<64x128xf32>
      %302 = vector.broadcast %295 : f32 to vector<64x128xf32>
      %303 = arith.mulf %301, %302 : vector<64x128xf32>
      %304 = arith.addf %294, %303 : vector<64x128xf32>
      %c26 = arith.constant 26 : index
      %305 = memref.load %arg4[%c26] : memref<32xf32, #tpu.memory_space<smem>>
      %306 = vector.extract_strided_slice %0 {offsets = [0, 26], sizes = [64, 1], strides = [1, 1]} : vector<64x32xf32> to vector<64x1xf32>
      %307 = vector.extract_strided_slice %43 {offsets = [26, 0], sizes = [1, 128], strides = [1, 1]} : vector<32x128xf32> to vector<1x128xf32>
      %308 = vector.broadcast %306 : vector<64x1xf32> to vector<64x128xf32>
      %309 = vector.broadcast %307 : vector<1x128xf32> to vector<64x128xf32>
      %310 = arith.subf %308, %309 : vector<64x128xf32>
      %311 = math.absf %310 : vector<64x128xf32>
      %312 = vector.broadcast %305 : f32 to vector<64x128xf32>
      %313 = arith.mulf %311, %312 : vector<64x128xf32>
      %314 = arith.addf %304, %313 : vector<64x128xf32>
      %c27 = arith.constant 27 : index
      %315 = memref.load %arg4[%c27] : memref<32xf32, #tpu.memory_space<smem>>
      %316 = vector.extract_strided_slice %0 {offsets = [0, 27], sizes = [64, 1], strides = [1, 1]} : vector<64x32xf32> to vector<64x1xf32>
      %317 = vector.extract_strided_slice %43 {offsets = [27, 0], sizes = [1, 128], strides = [1, 1]} : vector<32x128xf32> to vector<1x128xf32>
      %318 = vector.broadcast %316 : vector<64x1xf32> to vector<64x128xf32>
      %319 = vector.broadcast %317 : vector<1x128xf32> to vector<64x128xf32>
      %320 = arith.subf %318, %319 : vector<64x128xf32>
      %321 = math.absf %320 : vector<64x128xf32>
      %322 = vector.broadcast %315 : f32 to vector<64x128xf32>
      %323 = arith.mulf %321, %322 : vector<64x128xf32>
      %324 = arith.addf %314, %323 : vector<64x128xf32>
      %c28 = arith.constant 28 : index
      %325 = memref.load %arg4[%c28] : memref<32xf32, #tpu.memory_space<smem>>
      %326 = vector.extract_strided_slice %0 {offsets = [0, 28], sizes = [64, 1], strides = [1, 1]} : vector<64x32xf32> to vector<64x1xf32>
      %327 = vector.extract_strided_slice %43 {offsets = [28, 0], sizes = [1, 128], strides = [1, 1]} : vector<32x128xf32> to vector<1x128xf32>
      %328 = vector.broadcast %326 : vector<64x1xf32> to vector<64x128xf32>
      %329 = vector.broadcast %327 : vector<1x128xf32> to vector<64x128xf32>
      %330 = arith.subf %328, %329 : vector<64x128xf32>
      %331 = math.absf %330 : vector<64x128xf32>
      %332 = vector.broadcast %325 : f32 to vector<64x128xf32>
      %333 = arith.mulf %331, %332 : vector<64x128xf32>
      %334 = arith.addf %324, %333 : vector<64x128xf32>
      %c29 = arith.constant 29 : index
      %335 = memref.load %arg4[%c29] : memref<32xf32, #tpu.memory_space<smem>>
      %336 = vector.extract_strided_slice %0 {offsets = [0, 29], sizes = [64, 1], strides = [1, 1]} : vector<64x32xf32> to vector<64x1xf32>
      %337 = vector.extract_strided_slice %43 {offsets = [29, 0], sizes = [1, 128], strides = [1, 1]} : vector<32x128xf32> to vector<1x128xf32>
      %338 = vector.broadcast %336 : vector<64x1xf32> to vector<64x128xf32>
      %339 = vector.broadcast %337 : vector<1x128xf32> to vector<64x128xf32>
      %340 = arith.subf %338, %339 : vector<64x128xf32>
      %341 = math.absf %340 : vector<64x128xf32>
      %342 = vector.broadcast %335 : f32 to vector<64x128xf32>
      %343 = arith.mulf %341, %342 : vector<64x128xf32>
      %344 = arith.addf %334, %343 : vector<64x128xf32>
      %c30 = arith.constant 30 : index
      %345 = memref.load %arg4[%c30] : memref<32xf32, #tpu.memory_space<smem>>
      %346 = vector.extract_strided_slice %0 {offsets = [0, 30], sizes = [64, 1], strides = [1, 1]} : vector<64x32xf32> to vector<64x1xf32>
      %347 = vector.extract_strided_slice %43 {offsets = [30, 0], sizes = [1, 128], strides = [1, 1]} : vector<32x128xf32> to vector<1x128xf32>
      %348 = vector.broadcast %346 : vector<64x1xf32> to vector<64x128xf32>
      %349 = vector.broadcast %347 : vector<1x128xf32> to vector<64x128xf32>
      %350 = arith.subf %348, %349 : vector<64x128xf32>
      %351 = math.absf %350 : vector<64x128xf32>
      %352 = vector.broadcast %345 : f32 to vector<64x128xf32>
      %353 = arith.mulf %351, %352 : vector<64x128xf32>
      %354 = arith.addf %344, %353 : vector<64x128xf32>
      %c31 = arith.constant 31 : index
      %355 = memref.load %arg4[%c31] : memref<32xf32, #tpu.memory_space<smem>>
      %356 = vector.extract_strided_slice %0 {offsets = [0, 31], sizes = [64, 1], strides = [1, 1]} : vector<64x32xf32> to vector<64x1xf32>
      %357 = vector.extract_strided_slice %43 {offsets = [31, 0], sizes = [1, 128], strides = [1, 1]} : vector<32x128xf32> to vector<1x128xf32>
      %358 = vector.broadcast %356 : vector<64x1xf32> to vector<64x128xf32>
      %359 = vector.broadcast %357 : vector<1x128xf32> to vector<64x128xf32>
      %360 = arith.subf %358, %359 : vector<64x128xf32>
      %361 = math.absf %360 : vector<64x128xf32>
      %362 = vector.broadcast %355 : f32 to vector<64x128xf32>
      %363 = arith.mulf %361, %362 : vector<64x128xf32>
      %364 = arith.addf %354, %363 : vector<64x128xf32>
      %cst_28 = arith.constant 0.000000e+00 : f32
      %365 = vector.broadcast %cst_28 : f32 to vector<64x128xf32>
      %366 = arith.subf %365, %364 : vector<64x128xf32>
      %367 = math.exp %366 : vector<64x128xf32>
      %cst_29 = arith.constant 1.000000e+00 : f32
      %368 = vector.broadcast %cst_29 : f32 to vector<64x128xf32>
      %369 = arith.addf %368, %367 : vector<64x128xf32>
      %370 = tpu.reciprocal %369 {approx = true} : vector<64x128xf32> -> vector<64x128xf32>
      %c0_30 = arith.constant 0 : index
      %c0_31 = arith.constant 0 : index
      %371 = vector.load %arg5[%c0_30, %c0_31] : memref<64x128xi8, #tpu.memory_space<vmem>>, vector<64x128xi8>
      %c0_i8 = arith.constant 0 : i8
      %372 = vector.broadcast %c0_i8 : i8 to vector<64x128xi8>
      %373 = arith.cmpi ne, %371, %372 : vector<64x128xi8>
      %374 = math.exp %370 : vector<64x128xf32>
      %cst_32 = arith.constant 1.000000e+00 : f32
      %375 = vector.broadcast %cst_32 : f32 to vector<64x128xf32>
      %376 = arith.select %373, %374, %375 : vector<64x128xi1>, vector<64x128xf32>
      %c0_33 = arith.constant 0 : index
      %c0_34 = arith.constant 0 : index
      %377 = vector.load %arg9[%c0_33, %c0_34] : memref<64x128xf32, #tpu.memory_space<vmem>>, vector<64x128xf32>
      tpu.vector_store %arg9[%c0_33, %c0_34], %376 {strides = array<i32>} : memref<64x128xf32, #tpu.memory_space<vmem>>, vector<64x128xf32>,
      %c0_35 = arith.constant 0 : index
      %c0_36 = arith.constant 0 : index
      %378 = vector.load %arg10[%c0_35, %c0_36] : memref<64x1xf32, #tpu.memory_space<vmem>>, vector<64x1xf32>
      %cst_37 = arith.constant dense<0.000000e+00> : vector<64xf32>
      %379 = vector.multi_reduction <add>, %376, %cst_37 [1] : vector<64x128xf32> to vector<64xf32>
      %380 = vector.shape_cast %379 : vector<64xf32> to vector<64x1xf32>
      %381 = arith.addf %378, %380 : vector<64x1xf32>
      %c0_38 = arith.constant 0 : index
      %c0_39 = arith.constant 0 : index
      %382 = vector.load %arg10[%c0_38, %c0_39] : memref<64x1xf32, #tpu.memory_space<vmem>>, vector<64x1xf32>
      tpu.vector_store %arg10[%c0_38, %c0_39], %381 {strides = array<i32>} : memref<64x1xf32, #tpu.memory_space<vmem>>, vector<64x1xf32>,
    } else {
    }
    %c0_i32_5 = arith.constant 0 : i32
    %10 = arith.cmpi eq, %6, %c0_i32_5 : i32
    %11 = arith.extui %10 : i1 to i32
    %c0_i32_6 = arith.constant 0 : i32
    %12 = arith.cmpi ne, %11, %c0_i32_6 : i32
    scf.if %12 {
      %cst_24 = arith.constant 1.000000e+00 : f32
      %43 = vector.broadcast %cst_24 : f32 to vector<64x128xf32>
      %c0_25 = arith.constant 0 : index
      %c0_26 = arith.constant 0 : index
      %44 = vector.load %arg9[%c0_25, %c0_26] : memref<64x128xf32, #tpu.memory_space<vmem>>, vector<64x128xf32>
      tpu.vector_store %arg9[%c0_25, %c0_26], %43 {strides = array<i32>} : memref<64x128xf32, #tpu.memory_space<vmem>>, vector<64x128xf32>,
      %c0_27 = arith.constant 0 : index
      %c0_28 = arith.constant 0 : index
      %45 = vector.load %arg10[%c0_27, %c0_28] : memref<64x1xf32, #tpu.memory_space<vmem>>, vector<64x1xf32>
      %cst_29 = arith.constant 1.280000e+02 : f32
      %46 = vector.broadcast %cst_29 : f32 to vector<64x1xf32>
      %47 = arith.addf %45, %46 : vector<64x1xf32>
      %c0_30 = arith.constant 0 : index
      %c0_31 = arith.constant 0 : index
      %48 = vector.load %arg10[%c0_30, %c0_31] : memref<64x1xf32, #tpu.memory_space<vmem>>, vector<64x1xf32>
      tpu.vector_store %arg10[%c0_30, %c0_31], %47 {strides = array<i32>} : memref<64x1xf32, #tpu.memory_space<vmem>>, vector<64x1xf32>,
    } else {
    }
    %c0_7 = arith.constant 0 : index
    %c0_8 = arith.constant 0 : index
    %13 = vector.load %arg9[%c0_7, %c0_8] : memref<64x128xf32, #tpu.memory_space<vmem>>, vector<64x128xf32>
    %c0_9 = arith.constant 0 : index
    %c0_10 = arith.constant 0 : index
    %14 = vector.load %arg6[%c0_9, %c0_10] : memref<128x128xf32, #tpu.memory_space<vmem>>, vector<128x128xf32>
    %cst_11 = arith.constant dense<0.000000e+00> : vector<64x128xf32>
    %15 = tpu.matmul %13, %14, %cst_11 {dimension_numbers = #tpu.dot_dimension_numbers<[1], [0], [0], [1], [0, 0, 1, 1], [], []>} : vector<64x128xf32>, vector<128x128xf32>, vector<64x128xf32> -> vector<64x128xf32>
    %c0_12 = arith.constant 0 : index
    %c0_13 = arith.constant 0 : index
    %16 = vector.load %arg10[%c0_12, %c0_13] : memref<64x1xf32, #tpu.memory_space<vmem>>, vector<64x1xf32>
    %cst_14 = arith.constant 1.000000e+00 : f32
    %17 = vector.broadcast %cst_14 : f32 to vector<64x1xf32>
    %18 = arith.divf %17, %16 : vector<64x1xf32>
    %19 = vector.broadcast %18 : vector<64x1xf32> to vector<64x128xf32>
    %20 = arith.mulf %15, %19 : vector<64x128xf32>
    %c0_15 = arith.constant 0 : index
    %c0_16 = arith.constant 0 : index
    %21 = vector.load %arg7[%c0_15, %c0_16] : memref<1x128xf32, #tpu.memory_space<vmem>>, vector<1x128xf32>
    %22 = vector.broadcast %21 : vector<1x128xf32> to vector<64x128xf32>
    %23 = arith.addf %20, %22 : vector<64x128xf32>
    %cst_17 = arith.constant 0.000000e+00 : f32
    %24 = vector.broadcast %cst_17 : f32 to vector<64x128xf32>
    %25 = arith.maximumf %23, %24 : vector<64x128xf32>
    %26 = tpu.iota {dimensions = array<i32: 1>} : vector<64x128xi32>
    %c8_i32 = arith.constant 8 : i32
    %27 = vector.broadcast %c8_i32 : i32 to vector<64x128xi32>
    %28 = arith.cmpi slt, %26, %27 : vector<64x128xi32>
    %cst_18 = arith.constant -1.000000e+30 : f32
    %29 = vector.broadcast %cst_18 : f32 to vector<64x128xf32>
    %30 = arith.select %28, %25, %29 : vector<64x128xi1>, vector<64x128xf32>
    %cst_19 = arith.constant dense<0xFF800000> : vector<64xf32>
    %31 = vector.multi_reduction <maximumf>, %30, %cst_19 [1] : vector<64x128xf32> to vector<64xf32>
    %32 = vector.shape_cast %31 : vector<64xf32> to vector<64x1xf32>
    %33 = vector.broadcast %32 : vector<64x1xf32> to vector<64x128xf32>
    %34 = arith.subf %30, %33 : vector<64x128xf32>
    %35 = math.exp %34 : vector<64x128xf32>
    %cst_20 = arith.constant 0.000000e+00 : f32
    %36 = vector.broadcast %cst_20 : f32 to vector<64x128xf32>
    %37 = arith.select %28, %35, %36 : vector<64x128xi1>, vector<64x128xf32>
    %cst_21 = arith.constant dense<0.000000e+00> : vector<64xf32>
    %38 = vector.multi_reduction <add>, %37, %cst_21 [1] : vector<64x128xf32> to vector<64xf32>
    %39 = vector.shape_cast %38 : vector<64xf32> to vector<64x1xf32>
    %40 = vector.broadcast %39 : vector<64x1xf32> to vector<64x128xf32>
    %41 = arith.divf %37, %40 : vector<64x128xf32>
    %c0_22 = arith.constant 0 : index
    %c0_23 = arith.constant 0 : index
    %42 = vector.load %arg8[%c0_22, %c0_23] : memref<64x128xf32, #tpu.memory_space<vmem>>, vector<64x128xf32>
    tpu.vector_store %arg8[%c0_22, %c0_23], %41 {strides = array<i32>} : memref<64x128xf32, #tpu.memory_space<vmem>>, vector<64x128xf32>,
    return
  }
  func.func @transform_0(%arg0: i32, %arg1: memref<2xi32, #tpu.memory_space<smem>>) -> (i32, i32) {
    %c0_i32 = arith.constant 0 : i32
    %c0_i32_0 = arith.constant 0 : i32
    return %arg0, %c0_i32 : i32, i32
  }
  func.func @transform_1(%arg0: i32, %arg1: memref<2xi32, #tpu.memory_space<smem>>) -> (i32, i32) {
    %c0_i32 = arith.constant 0 : i32
    %c0_i32_0 = arith.constant 0 : i32
    %c0_i32_1 = arith.constant 0 : i32
    return %c0_i32, %c0_i32_0 : i32, i32
  }
  func.func @transform_2(%arg0: i32, %arg1: memref<2xi32, #tpu.memory_space<smem>>) -> i32 {
    %c0_i32 = arith.constant 0 : i32
    %c0_i32_0 = arith.constant 0 : i32
    return %c0_i32 : i32
  }
  func.func @transform_3(%arg0: i32, %arg1: memref<2xi32, #tpu.memory_space<smem>>) -> (i32, i32) {
    %c0_i32 = arith.constant 0 : i32
    %c0_i32_0 = arith.constant 0 : i32
    return %arg0, %c0_i32 : i32, i32
  }
  func.func @transform_4(%arg0: i32, %arg1: memref<2xi32, #tpu.memory_space<smem>>) -> (i32, i32) {
    %c0_i32 = arith.constant 0 : i32
    %c0_i32_0 = arith.constant 0 : i32
    %c0_i32_1 = arith.constant 0 : i32
    return %c0_i32, %c0_i32_0 : i32, i32
  }
  func.func @transform_5(%arg0: i32, %arg1: memref<2xi32, #tpu.memory_space<smem>>) -> (i32, i32) {
    %c0_i32 = arith.constant 0 : i32
    %c0_i32_0 = arith.constant 0 : i32
    %c0_i32_1 = arith.constant 0 : i32
    return %c0_i32, %c0_i32_0 : i32, i32
  }
  func.func @transform_6(%arg0: i32, %arg1: memref<2xi32, #tpu.memory_space<smem>>) -> (i32, i32) {
    %c0_i32 = arith.constant 0 : i32
    %c0_i32_0 = arith.constant 0 : i32
    return %arg0, %c0_i32 : i32, i32
  }
}

</mosaic_0001>

<bundles_post_ra>
// kernel: tpu_custom_call.1
= control target key start
LH: loop header
LB: loop body
LE: loop exit
PB: predicated region body
PF: predicated region fallthrough
CT: control target
= control target key end

     0   :  { %s6134_s0 = inlined_call_operand.vmem [shape: s32[2], index: 0, kind: input, shape index: {}]   ;;  %s6135_s1 = inlined_call_operand.vmem [shape: f32[128,32], index: 1, kind: input, shape index: {}]   ;;  %s6136_s2 = inlined_call_operand.vmem [shape: f32[32,128], index: 2, kind: input, shape index: {}]   ;;  %s6137_s3 = inlined_call_operand.vmem [shape: f32[32], index: 3, kind: input, shape index: {}]   ;;  %s6138_s4 = inlined_call_operand.hbm [shape: s8[128,128], index: 4, kind: input, shape index: {}]   ;;  %s6139_s5 = inlined_call_operand.vmem [shape: f32[128,128], index: 5, kind: input, shape index: {}]   ;;  %s6140_s6 = inlined_call_operand.vmem [shape: f32[1,128], index: 6, kind: input, shape index: {}]   ;;  %s6141_s7 = inlined_call_operand.hbm [shape: f32[128,128], index: 7, kind: output, shape index: {}]  }
   0x1   :  { %6212 = sst [smem:[#allocation119_spill]] %s6137_s3  ;;  %s12_s26 = sshll.u32 %s6134_s0, 4  ;;  %s13_s26 = int_to_ptr.vmem [resolvable:$true] %s12_s26 }
   0x2   :  { %s3648_s27 = scalar_lea.vmem %s13_s26, 16  ;;  %p3653_p1 = scmp.lt.s32.totalorder %s13_s26, %s13_s26 }
   0x3   :  { %p3649_p0 = scmp.ne.s32.totalorder %s13_s26, %s3648_s27  ;;  %p3654_p2 = scmp.lt.s32.totalorder %s3648_s27, %s3648_s27 }
   0x5   :  { %p3655_p3 = por %p3654_p2, %p3653_p1 }
   0x7   :  { %p3656_p4 = pnand %p3655_p3, %p3649_p0 }
   0x9   :  { %3659 = shalt.err (!%p3656_p4)  }
   0xa   :  { %s3775_s28 = smov [#allocation5]  }
   0xb   :  { %15 = dma.vmem_to_smem %s13_s26, 16, %s3775_s28, [#allocation4] }
   0xc   :  { %3745 = dma.done.wait [#allocation4], 16 }
   0xd   :  { %3746 = vsyncadd [#allocation4], 4294967280 }
   0xe   :  { %17 = sfence }
   0xf   :  { %18 = vsyncpa [#allocation9], 0 }
  0x10   :  { %19 = vsyncpa [#allocation7], 0 }
  0x11   :  { %21 = vsyncpa [#allocation7 + $0x1], 0 }
  0x12   :  { %22 = vsyncpa [#allocation8], 0 }
  0x13   :  { %24 = vsyncpa [#allocation8 + $0x1], 0  ;;  %s3861_s29 = smov 0   ;;  %s3863_s0 = smov 0  }
  0x14   :  { %s3865_s30 = smov 0   ;;  %s3867_s8 = smov 0  }
  0x15 LB: > { %s3882_s9 = sadd.s32 4294967295, %s3773_s8   ;;  %s3235_s10 = sadd.s32 4294967294, %s3773_s8   ;;  %s3773_s8 = sphi %s3867_s8, %s6573_s8   ;;  %s3769_s30 = sphi %s3865_s30, %s6572_s30   ;;  %s3765_s0 = sphi %s3863_s0, %s6571_s0   ;;  %s3761_s29 = sphi %s3861_s29, %s6570_s29  }
  0x16   : > { %s3886_s11 = sadd.s32 1, %s3773_s8   ;;  %s105_s12 = sadd.s32 1, %s3769_s30 }
  0x17   : > { %s102_s13 = ssub.s32 %s3773_s8, %s3886_s11  ;;  %p112_p5 = scmp.ne.s32.totalorder %s3769_s30, %s3765_s0 }
  0x18   : > { %p103_p6 = scmp.eq.s32.totalorder %s102_s13, 0  ;;  %p113_p7 = scmp.eq.s32.totalorder %s3773_s8, 0 }
  0x19   : > { %p118_p8 = scmp.ne.s32.totalorder %s3765_s0, %s3761_s29  ;;  %p6143_p9 = scmp.eq.s32.totalorder %s3882_s9, 0 }
  0x1a   : > { %s3898_s14 = scalar_select %p103_p6, %s3769_s30, %s105_s12  }
  0x1b   : > { %p3900_p10 = por %p113_p7, %p112_p5  ;;  %p3906_p11 = por %p6143_p9, %p118_p8 }
  0x1c   : > { %p184_p12 = scmp.eq.s32.totalorder %s3882_s9, 1  ;;  %p190_p13 = scmp.eq.s32.totalorder %s3235_s10, 1 }
  0x1d   : > { %s6214_s16 = scalar_select %p3906_p11, 1, 0 }
  0x1e   : > { %p3236_p0 = scmp.ge.s32.totalorder %s3773_s8, 1  ;;  %p197_p1 = scmp.lt.s32.totalorder %s3773_s8, 3 }
  0x1f   : > { %p3913_p2 = por %p184_p12, %p112_p5  ;;  %p3917_p3 = por %p190_p13, %p118_p8 }
  0x20   : > { %p3921_p4 = pnand %p3236_p0, %p197_p1  ;;  %s6218_s3 = sld [smem:[#allocation119_spill]] }
  0x21   : > { %s6215_s17 = scalar_select %p3913_p2, 1, 0 }
  0x22   : > { %s6216_s18 = scalar_select %p3917_p3, 1, 0 }
  0x23   : > { %s6217_s19 = scalar_select %p3921_p4, 1, 0 }
  0x24   : > { %p3397_p6 = pneg %p3921_p4  ;;  %p3410_p7 = scmp.lt.s32.totalorder %s3773_s8, 2 }
  0x25   : > { %s239_s24 = sand.u32 1, %s3769_s30  }
  0x26   : > { %s213_s22 = sshll.u32 %s6218_s3, 4  ;;  %p3934_p12 = pnand %p3397_p6, %p6143_p9  ;;  %s214_s22 = int_to_ptr.vmem [resolvable:$true] %s213_s22 }
  0x27   : > { %p3941_p8 = pnand %p3410_p7, %p3900_p10  ;;  %s3239_s26 = sshll.u32 %s239_s24, 4 }
  0x28   : > { %s3660_s27 = scalar_lea.vmem %s214_s22, 16  ;;  %p3662_p0 = pneg %p3934_p12 }
  0x29   : > { %p3661_p13 = scmp.ne.s32.totalorder %s214_s22, %s3660_s27  ;;  %p3668_p3 = scmp.lt.s32.totalorder %s214_s22, %s214_s22 }
  0x2a   : > { %p3669_p2 = scmp.lt.s32.totalorder %s3660_s27, %s3660_s27 }
  0x2b   : > { %p3663_p1 = pnand %p3662_p0, %p3661_p13 }
  0x2c   : > { %p3670_p6 = por %p3669_p2, %p3668_p3 }
  0x2d   : > { %p3664_p5 = pneg %p3663_p1 }
  0x2f   : > { %p3671_p9 = pnand %p3670_p6, %p3664_p5 }
  0x31   : > { %3674 = shalt.err (!%p3671_p9)
}
  0x32   : > { %s3776_s28 = smov [#allocation6]   ;;  %s3287_s10 = sshll.u32 %s3773_s8, 8 }
  0x33   : > { %3400 = dma.vmem_to_smem (!%p3934_p12), %s214_s22, 16, %s3776_s28, [#allocation9]  }
  0x34   : > { %s243_s12 = scalar_lea.vmem [#allocation10], %s3239_s26  ;;  %s3953_s21 = scalar_lea.hbm %s6138_s4, %s3287_s10 }
  0x35   : > { %s250_s13 = sshll.u32 %s243_s12, 4  ;;  %s3957_s27 = scalar_lea.sflag [#allocation7], %s239_s24  ;;  %s3955_s13 = int_to_ptr.vmem [resolvable:$true] %s250_s13 }
  0x36   : > { %s3675_s3 = scalar_lea.hbm %s3953_s21, 256  ;;  %p3677_p10 = pneg %p3941_p8 }
  0x37   : > { %p3676_p9 = scmp.ne.s32.totalorder %s3953_s21, %s3675_s3  ;;  %s3680_s26 = scalar_lea.hbm %s6138_s4, 512 }
  0x38   : > { %p3681_p5 = scmp.lt.s32.totalorder %s3953_s21, %s6138_s4  ;;  %p3682_p7 = scmp.lt.s32.totalorder %s3680_s26, %s3675_s3 }
  0x39   : > { %p3678_p2 = pnand %p3677_p10, %p3676_p9 }
  0x3a   : > { %p3683_p12 = por %p3682_p7, %p3681_p5 }
  0x3b   : > { %p3679_p3 = pneg %p3678_p2 }
  0x3d   : > { %p3684_p13 = pnand %p3683_p12, %p3679_p3 }
  0x3f   : > { %3687 = shalt.err (!%p3684_p13)
}
  0x40   : > { %s3688_s24 = scalar_lea.vmem %s3955_s13, 256  ;;  %s3777_s12 = smov [#allocation10]  }
  0x41   : > { %p3689_p0 = scmp.ne.s32.totalorder %s3955_s13, %s3688_s24  ;;  %s3693_s15 = sshll.u32 %s3777_s12, 4  ;;  %s3694_s15 = int_to_ptr.vmem [resolvable:$false] %s3693_s15 }
  0x42   : > { %s3695_s20 = scalar_lea.vmem %s3694_s15, 512  ;;  %p3696_p9 = scmp.lt.s32.totalorder %s3955_s13, %s3694_s15 }
  0x43   : > { %p3691_p1 = pnand %p3689_p0, %p3677_p10  ;;  %p3697_p2 = scmp.lt.s32.totalorder %s3695_s20, %s3688_s24 }
  0x45   : > { %p3692_p6 = pneg %p3691_p1  ;;  %p3698_p11 = por %p3697_p2, %p3696_p9 }
  0x47   : > { %p3699_p4 = pnand %p3698_p11, %p3692_p6 }
  0x49   : > { %3702 = shalt.err (!%p3699_p4)
}
  0x4a   : > { %s3778_s3 = smov 128   ;;  %s3779_s22 = smov 8  }
  0x4b   : > { %3404 = dma.hbm_to_vmem [thread:$0]  (!%p3941_p8), %s3953_s21, 256, %s3955_s13, %s3957_s27, %s3778_s3, %s3778_s3, %s3779_s22  }
  0x4c   : > { %p6221_p10 = scmp.ne.s32.totalorder %s6217_s19, 0 }
  0x4e   : > { %262 = sbr.rel (%p6221_p10) target bundleno = 1623 (0x657), region = 44 }
  0x53   : > { %p6222_p3 = scmp.eq.s32.totalorder %s3882_s9, 0 }
  0x55   : > { %3748 = dma.done.wait (%p6222_p3), [#allocation9], 16   ;;  %p6223_p5 = pmov %p6222_p3 }
  0x56   : > { %s3985_s23 = sand.u32 1, %s3765_s0   ;;  %p6224_p11 = scmp.ne.s32.totalorder %s6214_s16, 0 }
  0x57   : > { %3750 = vsyncadd (%p6223_p5), [#allocation9], 4294967280  ;;  %s3244_s26 = sshll.u32 %s3985_s23, 4  ;;  %s269_s28 = scalar_lea.sflag [#allocation7], %s3985_s23 }
  0x58   : > { %s3989_s10 = scalar_lea.vmem [#allocation10], %s3244_s26 }
  0x59   : > { %3752 = dma.done.wait (%p6224_p11), %s269_s28, 256  }
  0x5a   : > { %3754 = vsyncadd (%p6224_p11), %s269_s28, 4294967040 }
  0x5b   : > { %277 = sfence }
  0x5c   : > { %s3245_s19 = sshll.u32 %s3985_s23, 6  ;;  %s3246_s25 = sshll.u32 %s3882_s9, 3  ;;  %vm325_vm0 = vcmask 7168   ;;  %v3780_v0 = vmov 0.0  }
  0x5d   : > { %p308_p4 = scmp.lt.s32.totalorder %s3246_s25, 15  ;;  %326 = vst.msk [vmem:[#allocation3] sm:$0xff] %vm325_vm0, %v3780_v0  ;;  %327 = vst.msk [vmem:[#allocation3 + $0x8] sm:$0xff] %vm325_vm0, %v3780_v0  ;;  %s4006_s16 = sld [smem:[#allocation5 + %s3882_s9]] }
  0x5e   : > { %328 = vst.msk [vmem:[#allocation3 + $0x10] sm:$0xff] %vm325_vm0, %v3780_v0  ;;  %329 = vst.msk [vmem:[#allocation3 + $0x18] sm:$0xff] %vm325_vm0, %v3780_v0  ;;  %s4027_s12 = scalar_lea.vmem [#allocation11], %s3245_s19 }
  0x5f   : > { %330 = vst.msk [vmem:[#allocation3 + $0x20] sm:$0xff] %vm325_vm0, %v3780_v0  ;;  %331 = vst.msk [vmem:[#allocation3 + $0x28] sm:$0xff] %vm325_vm0, %v3780_v0  ;;  %s6575_s25 = smov (!%p308_p4, %s3246_s25), 15 }
  0x60   : > { %332 = vst.msk [vmem:[#allocation3 + $0x30] sm:$0xff] %vm325_vm0, %v3780_v0  ;;  %333 = vst.msk [vmem:[#allocation3 + $0x38] sm:$0xff] %vm325_vm0, %v3780_v0  ;;  %s3247_s13 = sshll.u32 %s6575_s25, 3 }
  0x61   : > { %s311_s24 = scalar_lea.vmem %s6135_s1, %s3247_s13 }
  0x62   : > { %v4011_v1 = vld [vmem:[%s311_s24] sm:$0xff]  ;;  %v4013_v2 = vld [vmem:[%s311_s24 + $0x8] sm:$0xff]  ;;  %v4015_v3 = vld [vmem:[%s311_s24 + $0x10] sm:$0xff] }
  0x63   : > { %6225 = vst [vmem:[#allocation16_spill] sm:$0xff] %v4011_v1  ;;  %6226 = vst [vmem:[#allocation17_spill] sm:$0xff] %v4013_v2  ;;  %v4017_v4 = vld [vmem:[%s311_s24 + $0x18] sm:$0xff]  ;;  %v4019_v5 = vld [vmem:[%s311_s24 + $0x20] sm:$0xff]  ;;  %p3248_p8 = scmp.le.s32.totalorder %s4006_s16, 0 }
  0x64   : > { %6227 = vst [vmem:[#allocation18_spill] sm:$0xff] %v4017_v4  ;;  %6228 = vst [vmem:[#allocation19_spill] sm:$0xff] %v4019_v5  ;;  %v4021_v6 = vld [vmem:[%s311_s24 + $0x28] sm:$0xff]  ;;  %v4023_v7 = vld [vmem:[%s311_s24 + $0x30] sm:$0xff] }
  0x65   : > { %6229 = vst [vmem:[#allocation20_spill] sm:$0xff] %v4023_v7  ;;  %v4025_v8 = vld [vmem:[%s311_s24 + $0x38] sm:$0xff]  ;;  %338 = sbr.rel (%p3248_p8) target bundleno = 1031 (0x407), region = 56 }
  0x66   : > { %6230 = vst [vmem:[#allocation21_spill] sm:$0xff] %v4025_v8 }
  0x6a   : > { %v6146_v9 = vmov 0   ;;  %v3782_v10 = vmov 1   ;;  %v3783_v11 = vmov 2   ;;  %v3784_v12 = vmov 3   ;;  %s343_s15 = sld [smem:[#allocation6]] }
  0x6b   : > { %3487 = vset.pattern.permute.xlu1 %v6146_v9  ;;  %3486 = vset.pattern.permute.xlu0 %v6146_v9  ;;  %v3785_v13 = vmov 4   ;;  %v3786_v14 = vmov 5   ;;  %v3787_v15 = vmov 6   ;;  %v3788_v16 = vmov 7   ;;  %s3249_s20 = sld [smem:[#allocation6 + $0x1]] }
  0x6c   : > { %356 = vperm.xlu1 %3487, %v4015_v3   ;;  %346 = vperm.xlu0 %3486, %v4011_v1   ;;  %v3789_v19 = vmov 8   ;;  %v3790_v26 = vmov 9   ;;  %v3791_v35 = vmov 10   ;;  %v3792_v42 = vmov 11   ;;  %s3250_s3 = sld [smem:[#allocation6 + $0x2]] }
  0x6d   : > { %v3793_v51 = vmov 12   ;;  %v3794_v58 = vmov 13   ;;  %s3251_s28 = sld [smem:[#allocation6 + $0x3]] }
  0x6e   : > { %s4423_s19 = sld [smem:[#allocation6 + $0x4]] }
  0x6f   : > { %s4427_s25 = sld [smem:[#allocation6 + $0x5]] }
  0x70   : > { %361 = vperm.xlu1 %3487, %v4017_v4   ;;  %351 = vperm.xlu0 %3486, %v4013_v2   ;;  %s4440_s13 = sld [smem:[#allocation6 + $0x6]] }
  0x71   : > { %s4456_s21 = sld [smem:[#allocation6 + $0x7]] }
  0x72   : > { %s4655_s22 = sld [smem:[#allocation6 + $0xb]] }
  0x73   : > { %s4734_s26 = sld [smem:[#allocation6 + $0xc]] }
  0x74   : > { %371 = vperm.xlu1 %3487, %v4021_v6   ;;  %366 = vperm.xlu0 %3486, %v4019_v5   ;;  %s5019_s24 = sld [smem:[#allocation6 + $0x11]] }
  0x75   : > { %s3274_s27 = sld [smem:[#allocation6 + $0x1a]] }
  0x78   : > { %381 = vperm.xlu1 %3487, %v4025_v8   ;;  %376 = vperm.xlu0 %3486, %v4023_v7  }
  0x7c   : > { %3489 = vset.pattern.permute.xlu1 %v3782_v10  ;;  %3488 = vset.pattern.permute.xlu0 %v3782_v10 }
  0x7d   : > { %427 = vperm.xlu1 %3489, %v4013_v2   ;;  %423 = vperm.xlu0 %3488, %v4011_v1  }
  0x81   : > { %431 = vperm.xlu1 %3489, %v4015_v3   ;;  %435 = vperm.xlu0 %3488, %v4017_v4  }
  0x85   : > { %439 = vperm.xlu1 %3489, %v4019_v5   ;;  %443 = vperm.xlu0 %3488, %v4021_v6  }
  0x89   : > { %447 = vperm.xlu1 %3489, %v4023_v7   ;;  %451 = vperm.xlu0 %3488, %v4025_v8  }
  0x8d   : > { %3490 = vset.pattern.permute.xlu1 %v3783_v11  ;;  %3491 = vset.pattern.permute.xlu0 %v3783_v11 }
  0x8e   : > { %493 = vperm.xlu1 %3490, %v4011_v1   ;;  %497 = vperm.xlu0 %3491, %v4013_v2  }
  0x92   : > { %501 = vperm.xlu1 %3490, %v4015_v3   ;;  %509 = vperm.xlu0 %3491, %v4019_v5  }
  0x96   : > { %505 = vperm.xlu1 %3490, %v4017_v4   ;;  %517 = vperm.xlu0 %3491, %v4023_v7  }
  0x9a   : > { %513 = vperm.xlu1 %3490, %v4021_v6   ;;  %3492 = vset.pattern.permute.xlu0 %v3784_v12 }
  0x9b   : > { %563 = vperm.xlu0 %3492, %v4011_v1  }
  0x9e   : > { %521 = vperm.xlu1 %3490, %v4025_v8  }
  0x9f   : > { %575 = vperm.xlu0 %3492, %v4017_v4  }
  0xa2   : > { %3493 = vset.pattern.permute.xlu1 %v3784_v12  ;;  %v3795_v12 = vmov 14  }
  0xa3   : > { %567 = vperm.xlu1 %3493, %v4013_v2   ;;  %583 = vperm.xlu0 %3492, %v4021_v6  }
  0xa7   : > { %571 = vperm.xlu1 %3493, %v4015_v3   ;;  %591 = vperm.xlu0 %3492, %v4025_v8  }
  0xab   : > { %579 = vperm.xlu1 %3493, %v4019_v5   ;;  %3495 = vset.pattern.permute.xlu0 %v3785_v13 }
  0xac   : > { %637 = vperm.xlu0 %3495, %v4013_v2  }
  0xaf   : > { %587 = vperm.xlu1 %3493, %v4023_v7  }
  0xb0   : > { %649 = vperm.xlu0 %3495, %v4019_v5  }
  0xb3   : > { %3494 = vset.pattern.permute.xlu1 %v3785_v13 }
  0xb4   : > { %633 = vperm.xlu1 %3494, %v4011_v1   ;;  %657 = vperm.xlu0 %3495, %v4023_v7  }
  0xb8   : > { %641 = vperm.xlu1 %3494, %v4015_v3   ;;  %3496 = vset.pattern.permute.xlu0 %v3786_v14 }
  0xb9   : > { %703 = vperm.xlu0 %3496, %v4011_v1  }
  0xbc   : > { %645 = vperm.xlu1 %3494, %v4017_v4  }
  0xbd   : > { %715 = vperm.xlu0 %3496, %v4017_v4  }
  0xc0   : > { %653 = vperm.xlu1 %3494, %v4021_v6  }
  0xc1   : > { %723 = vperm.xlu0 %3496, %v4021_v6  }
  0xc4   : > { %661 = vperm.xlu1 %3494, %v4025_v8  }
  0xc5   : > { %731 = vperm.xlu0 %3496, %v4025_v8  }
  0xc8   : > { %3497 = vset.pattern.permute.xlu1 %v3786_v14 }
  0xc9   : > { %707 = vperm.xlu1 %3497, %v4013_v2   ;;  %3499 = vset.pattern.permute.xlu0 %v3787_v15 }
  0xca   : > { %777 = vperm.xlu0 %3499, %v4013_v2  }
  0xcd   : > { %711 = vperm.xlu1 %3497, %v4015_v3  }
  0xce   : > { %789 = vperm.xlu0 %3499, %v4019_v5  }
  0xd1   : > { %719 = vperm.xlu1 %3497, %v4019_v5  }
  0xd2   : > { %797 = vperm.xlu0 %3499, %v4023_v7  }
  0xd5   : > { %727 = vperm.xlu1 %3497, %v4023_v7  }
  0xd6   : > { %3500 = vset.pattern.permute.xlu0 %v3788_v16 }
  0xd7   : > { %843 = vperm.xlu0 %3500, %v4011_v1  }
  0xd9   : > { %3498 = vset.pattern.permute.xlu1 %v3787_v15 }
  0xda   : > { %773 = vperm.xlu1 %3498, %v4011_v1  }
  0xdb   : > { %855 = vperm.xlu0 %3500, %v4017_v4  }
  0xde   : > { %781 = vperm.xlu1 %3498, %v4015_v3  }
  0xdf   : > { %863 = vperm.xlu0 %3500, %v4021_v6  }
  0xe2   : > { %785 = vperm.xlu1 %3498, %v4017_v4  }
  0xe3   : > { %871 = vperm.xlu0 %3500, %v4025_v8  }
  0xe6   : > { %793 = vperm.xlu1 %3498, %v4021_v6  }
  0xe7   : > { %v4091_v17 = vpop.permute.xlu1 %356  ;;  %v4093_v18 = vpop.permute.xlu0 %346  ;;  %3503 = vset.pattern.permute.xlu0 %v3789_v19 }
  0xe8   : > { %917 = vperm.xlu0 %3503, %v4013_v2  }
  0xea   : > { %801 = vperm.xlu1 %3498, %v4025_v8  }
  0xeb   : > { %v4097_v20 = vpop.permute.xlu1 %361  ;;  %v4099_v21 = vpop.permute.xlu0 %351 }
  0xec   : > { %929 = vperm.xlu0 %3503, %v4019_v5  }
  0xee   : > { %3501 = vset.pattern.permute.xlu1 %v3788_v16 }
  0xef   : > { %847 = vperm.xlu1 %3501, %v4013_v2   ;;  %v4103_v22 = vpop.permute.xlu1 %371  ;;  %v4105_v23 = vpop.permute.xlu0 %366 }
  0xf0   : > { %937 = vperm.xlu0 %3503, %v4023_v7  }
  0xf3   : > { %851 = vperm.xlu1 %3501, %v4015_v3   ;;  %v4109_v24 = vpop.permute.xlu1 %381  ;;  %v4111_v25 = vpop.permute.xlu0 %376 }
  0xf4   : > { %3504 = vset.pattern.permute.xlu0 %v3790_v26 }
  0xf5   : > { %983 = vperm.xlu0 %3504, %v4011_v1  }
  0xf7   : > { %859 = vperm.xlu1 %3501, %v4019_v5  }
  0xf8   : > { %v4115_v27 = vpop.permute.xlu1 %427  ;;  %v4117_v28 = vpop.permute.xlu0 %423 }
  0xf9   : > { %995 = vperm.xlu0 %3504, %v4017_v4  }
  0xfb   : > { %867 = vperm.xlu1 %3501, %v4023_v7  }
  0xfc   : > { %v4121_v29 = vpop.permute.xlu1 %431  ;;  %v4123_v30 = vpop.permute.xlu0 %435 }
  0xfd   : > { %1003 = vperm.xlu0 %3504, %v4021_v6  }
  0xff   : > { %3502 = vset.pattern.permute.xlu1 %v3789_v19 }
 0x100   : > { %913 = vperm.xlu1 %3502, %v4011_v1   ;;  %v4127_v31 = vpop.permute.xlu1 %439  ;;  %v4129_v32 = vpop.permute.xlu0 %443 }
 0x101   : > { %1011 = vperm.xlu0 %3504, %v4025_v8  }
 0x104   : > { %921 = vperm.xlu1 %3502, %v4015_v3   ;;  %v4133_v33 = vpop.permute.xlu1 %447  ;;  %v4135_v34 = vpop.permute.xlu0 %451 }
 0x105   : > { %3507 = vset.pattern.permute.xlu0 %v3791_v35 }
 0x106   : > { %1057 = vperm.xlu0 %3507, %v4013_v2  }
 0x108   : > { %925 = vperm.xlu1 %3502, %v4017_v4  }
 0x109   : > { %v4139_v36 = vpop.permute.xlu1 %493  ;;  %v4141_v37 = vpop.permute.xlu0 %497 }
 0x10a   : > { %1069 = vperm.xlu0 %3507, %v4019_v5  }
 0x10c   : > { %933 = vperm.xlu1 %3502, %v4021_v6  }
 0x10d   : > { %v4145_v38 = vpop.permute.xlu1 %501  ;;  %v4147_v39 = vpop.permute.xlu0 %509 }
 0x10e   : > { %1077 = vperm.xlu0 %3507, %v4023_v7  }
 0x110   : > { %941 = vperm.xlu1 %3502, %v4025_v8  }
 0x111   : > { %v4151_v40 = vpop.permute.xlu1 %505  ;;  %v4153_v41 = vpop.permute.xlu0 %517 }
 0x112   : > { %3508 = vset.pattern.permute.xlu0 %v3792_v42 }
 0x113   : > { %1123 = vperm.xlu0 %3508, %v4011_v1  }
 0x114   : > { %3505 = vset.pattern.permute.xlu1 %v3790_v26 }
 0x115   : > { %987 = vperm.xlu1 %3505, %v4013_v2   ;;  %v4157_v43 = vpop.permute.xlu1 %513 }
 0x116   : > { %v4159_v44 = vpop.permute.xlu0 %563 }
 0x117   : > { %1135 = vperm.xlu0 %3508, %v4017_v4  }
 0x119   : > { %991 = vperm.xlu1 %3505, %v4015_v3   ;;  %v4163_v45 = vpop.permute.xlu1 %521 }
 0x11a   : > { %v4165_v46 = vpop.permute.xlu0 %575 }
 0x11b   : > { %1143 = vperm.xlu0 %3508, %v4021_v6  }
 0x11d   : > { %999 = vperm.xlu1 %3505, %v4019_v5  }
 0x11e   : > { %v4169_v47 = vpop.permute.xlu1 %567  ;;  %v4171_v48 = vpop.permute.xlu0 %583 }
 0x11f   : > { %1151 = vperm.xlu0 %3508, %v4025_v8  }
 0x121   : > { %1007 = vperm.xlu1 %3505, %v4023_v7  }
 0x122   : > { %v4175_v49 = vpop.permute.xlu1 %571  ;;  %v4177_v50 = vpop.permute.xlu0 %591 }
 0x123   : > { %3511 = vset.pattern.permute.xlu0 %v3793_v51 }
 0x124   : > { %1197 = vperm.xlu0 %3511, %v4013_v2  }
 0x125   : > { %3506 = vset.pattern.permute.xlu1 %v3791_v35  ;;  %v3796_v35 = vmov 15  }
 0x126   : > { %1053 = vperm.xlu1 %3506, %v4011_v1   ;;  %v4181_v52 = vpop.permute.xlu1 %579 }
 0x127   : > { %v4183_v53 = vpop.permute.xlu0 %637 }
 0x128   : > { %1209 = vperm.xlu0 %3511, %v4019_v5  }
 0x12a   : > { %1061 = vperm.xlu1 %3506, %v4015_v3   ;;  %v4187_v54 = vpop.permute.xlu1 %587 }
 0x12b   : > { %6231 = vst [vmem:[#allocation22_spill] sm:$0xff] %v4187_v54  ;;  %v4189_v55 = vpop.permute.xlu0 %649 }
 0x12c   : > { %6232 = vst [vmem:[#allocation23_spill] sm:$0xff] %v4189_v55  ;;  %1217 = vperm.xlu0 %3511, %v4023_v7  }
 0x12e   : > { %1065 = vperm.xlu1 %3506, %v4017_v4  }
 0x12f   : > { %v4193_v56 = vpop.permute.xlu1 %633  ;;  %v4195_v57 = vpop.permute.xlu0 %657 }
 0x130   : > { %6233 = vst [vmem:[#allocation24_spill] sm:$0xff] %v4193_v56  ;;  %6234 = vst [vmem:[#allocation25_spill] sm:$0xff] %v4195_v57  ;;  %3512 = vset.pattern.permute.xlu0 %v3794_v58 }
 0x131   : > { %1263 = vperm.xlu0 %3512, %v4011_v1  }
 0x132   : > { %1073 = vperm.xlu1 %3506, %v4021_v6  }
 0x133   : > { %v4199_v59 = vpop.permute.xlu1 %641 }
 0x134   : > { %6235 = vst [vmem:[#allocation26_spill] sm:$0xff] %v4199_v59  ;;  %v4201_v60 = vpop.permute.xlu0 %703 }
 0x135   : > { %6236 = vst [vmem:[#allocation27_spill] sm:$0xff] %v4201_v60  ;;  %1275 = vperm.xlu0 %3512, %v4017_v4  }
 0x136   : > { %1081 = vperm.xlu1 %3506, %v4025_v8  }
 0x137   : > { %v4205_v61 = vpop.permute.xlu1 %645 }
 0x138   : > { %6237 = vst [vmem:[#allocation28_spill] sm:$0xff] %v4205_v61  ;;  %v4207_v62 = vpop.permute.xlu0 %715 }
 0x139   : > { %6238 = vst [vmem:[#allocation29_spill] sm:$0xff] %v4207_v62  ;;  %1283 = vperm.xlu0 %3512, %v4021_v6  }
 0x13a   : > { %3509 = vset.pattern.permute.xlu1 %v3792_v42 }
 0x13b   : > { %1127 = vperm.xlu1 %3509, %v4013_v2   ;;  %v4211_v63 = vpop.permute.xlu1 %653 }
 0x13c   : > { %6239 = vst [vmem:[#allocation30_spill] sm:$0xff] %v4211_v63  ;;  %v4213_v0 = vpop.permute.xlu0 %723 }
 0x13d   : > { %6240 = vst [vmem:[#allocation31_spill] sm:$0xff] %v4213_v0  ;;  %1291 = vperm.xlu0 %3512, %v4025_v8  }
 0x13f   : > { %1131 = vperm.xlu1 %3509, %v4015_v3   ;;  %v4217_v10 = vpop.permute.xlu1 %661 }
 0x140   : > { %6241 = vst [vmem:[#allocation32_spill] sm:$0xff] %v4217_v10  ;;  %v4219_v11 = vpop.permute.xlu0 %731 }
 0x141   : > { %6242 = vst [vmem:[#allocation33_spill] sm:$0xff] %v4219_v11  ;;  %3515 = vset.pattern.permute.xlu0 %v3795_v12  ;;  %v4447_v11 = vstv %s3249_s20  ;;  %s4546_s20 = sld [smem:[#allocation6 + $0x9]] }
 0x142   : > { %1337 = vperm.xlu0 %3515, %v4013_v2  }
 0x143   : > { %1139 = vperm.xlu1 %3509, %v4019_v5  }
 0x144   : > { %v4223_v13 = vpop.permute.xlu1 %707 }
 0x145   : > { %6243 = vst [vmem:[#allocation34_spill] sm:$0xff] %v4223_v13  ;;  %v4225_v14 = vpop.permute.xlu0 %777 }
 0x146   : > { %6244 = vst [vmem:[#allocation35_spill] sm:$0xff] %v4225_v14  ;;  %1349 = vperm.xlu0 %3515, %v4019_v5  }
 0x147   : > { %1147 = vperm.xlu1 %3509, %v4023_v7  }
 0x148   : > { %v4229_v15 = vpop.permute.xlu1 %711 }
 0x149   : > { %6245 = vst [vmem:[#allocation36_spill] sm:$0xff] %v4229_v15  ;;  %v4231_v16 = vpop.permute.xlu0 %789 }
 0x14a   : > { %6246 = vst [vmem:[#allocation37_spill] sm:$0xff] %v4231_v16  ;;  %1357 = vperm.xlu0 %3515, %v4023_v7  }
 0x14b   : > { %3510 = vset.pattern.permute.xlu1 %v3793_v51 }
 0x14c   : > { %1193 = vperm.xlu1 %3510, %v4011_v1   ;;  %v4235_v19 = vpop.permute.xlu1 %719 }
 0x14d   : > { %6247 = vst [vmem:[#allocation38_spill] sm:$0xff] %v4235_v19  ;;  %v4237_v26 = vpop.permute.xlu0 %797  ;;  %v4442_v19 = vstv %s343_s15  ;;  %s4537_s15 = sld [smem:[#allocation6 + $0x8]] }
 0x14e   : > { %6248 = vst [vmem:[#allocation39_spill] sm:$0xff] %v4237_v26  ;;  %3516 = vset.pattern.permute.xlu0 %v3796_v35 }
 0x14f   : > { %1403 = vperm.xlu0 %3516, %v4011_v1  }
 0x150   : > { %1201 = vperm.xlu1 %3510, %v4015_v3   ;;  %v4241_v42 = vpop.permute.xlu1 %727 }
 0x151   : > { %6249 = vst [vmem:[#allocation40_spill] sm:$0xff] %v4241_v42  ;;  %v3797_v42 = vmov 16  }
 0x152   : > { %v4243_v9 = vpop.permute.xlu0 %843 }
 0x153   : > { %6250 = vst [vmem:[#allocation41_spill] sm:$0xff] %v4243_v9  ;;  %1415 = vperm.xlu0 %3516, %v4017_v4  }
 0x154   : > { %1205 = vperm.xlu1 %3510, %v4017_v4  }
 0x155   : > { %v4247_v51 = vpop.permute.xlu1 %773 }
 0x156   : > { %6251 = vst [vmem:[#allocation42_spill] sm:$0xff] %v4247_v51  ;;  %v4249_v16 = vpop.permute.xlu0 %855  ;;  %v6148_v51 = vmov 17  }
 0x157   : > { %6252 = vst [vmem:[#allocation43_spill] sm:$0xff] %v4249_v16  ;;  %1423 = vperm.xlu0 %3516, %v4021_v6  }
 0x158   : > { %1213 = vperm.xlu1 %3510, %v4021_v6  }
 0x159   : > { %v4253_v26 = vpop.permute.xlu1 %781 }
 0x15a   : > { %6253 = vst [vmem:[#allocation44_spill] sm:$0xff] %v4253_v26  ;;  %v4255_v15 = vpop.permute.xlu0 %863 }
 0x15b   : > { %6254 = vst [vmem:[#allocation45_spill] sm:$0xff] %v4255_v15  ;;  %1431 = vperm.xlu0 %3516, %v4025_v8  }
 0x15c   : > { %1221 = vperm.xlu1 %3510, %v4025_v8  }
 0x15d   : > { %v4259_v9 = vpop.permute.xlu1 %785 }
 0x15e   : > { %6255 = vst [vmem:[#allocation46_spill] sm:$0xff] %v4259_v9  ;;  %v4261_v14 = vpop.permute.xlu0 %871 }
 0x15f   : > { %6256 = vst [vmem:[#allocation47_spill] sm:$0xff] %v4261_v14  ;;  %3519 = vset.pattern.permute.xlu0 %v3797_v42 }
 0x160   : > { %3513 = vset.pattern.permute.xlu1 %v3794_v58  ;;  %1477 = vperm.xlu0 %3519, %v4013_v2  }
 0x161   : > { %1267 = vperm.xlu1 %3513, %v4013_v2   ;;  %v4265_v16 = vpop.permute.xlu1 %793 }
 0x162   : > { %6257 = vst [vmem:[#allocation48_spill] sm:$0xff] %v4265_v16 }
 0x163   : > { %v4267_v26 = vpop.permute.xlu0 %917 }
 0x164   : > { %6258 = vst [vmem:[#allocation49_spill] sm:$0xff] %v4267_v26  ;;  %1489 = vperm.xlu0 %3519, %v4019_v5  }
 0x165   : > { %1271 = vperm.xlu1 %3513, %v4015_v3   ;;  %v4271_v15 = vpop.permute.xlu1 %801 }
 0x166   : > { %6259 = vst [vmem:[#allocation50_spill] sm:$0xff] %v4271_v15 }
 0x167   : > { %v4273_v9 = vpop.permute.xlu0 %929 }
 0x168   : > { %6260 = vst [vmem:[#allocation51_spill] sm:$0xff] %v4273_v9  ;;  %1497 = vperm.xlu0 %3519, %v4023_v7  }
 0x169   : > { %1279 = vperm.xlu1 %3513, %v4019_v5  }
 0x16a   : > { %v4277_v58 = vpop.permute.xlu1 %847 }
 0x16b   : > { %6261 = vst [vmem:[#allocation52_spill] sm:$0xff] %v4277_v58  ;;  %v4279_v14 = vpop.permute.xlu0 %937  ;;  %v6149_v58 = vmov 18  }
 0x16c   : > { %6262 = vst [vmem:[#allocation53_spill] sm:$0xff] %v4279_v14  ;;  %3520 = vset.pattern.permute.xlu0 %v6148_v51 }
 0x16d   : > { %1287 = vperm.xlu1 %3513, %v4023_v7   ;;  %1543 = vperm.xlu0 %3520, %v4011_v1  }
 0x16e   : > { %v4284_v26 = vpop.permute.xlu1 %851 }
 0x16f   : > { %6263 = vst [vmem:[#allocation54_spill] sm:$0xff] %v4284_v26 }
 0x170   : > { %v4290_v15 = vpop.permute.xlu0 %983 }
 0x171   : > { %3514 = vset.pattern.permute.xlu1 %v3795_v12  ;;  %1555 = vperm.xlu0 %3520, %v4017_v4   ;;  %6265 = vst [vmem:[#allocation56_spill] sm:$0xff] %v4290_v15 }
 0x172   : > { %1333 = vperm.xlu1 %3514, %v4011_v1   ;;  %v4288_v9 = vpop.permute.xlu1 %859 }
 0x173   : > { %6264 = vst [vmem:[#allocation55_spill] sm:$0xff] %v4288_v9 }
 0x174   : > { %v4296_v14 = vpop.permute.xlu0 %995 }
 0x175   : > { %1563 = vperm.xlu0 %3520, %v4021_v6   ;;  %6267 = vst [vmem:[#allocation58_spill] sm:$0xff] %v4296_v14 }
 0x176   : > { %1341 = vperm.xlu1 %3514, %v4015_v3   ;;  %v4294_v51 = vpop.permute.xlu1 %867 }
 0x177   : > { %6266 = vst [vmem:[#allocation57_spill] sm:$0xff] %v4294_v51 }
 0x178   : > { %v4302_v26 = vpop.permute.xlu0 %1003 }
 0x179   : > { %1571 = vperm.xlu0 %3520, %v4025_v8   ;;  %6269 = vst [vmem:[#allocation60_spill] sm:$0xff] %v4302_v26 }
 0x17a   : > { %1345 = vperm.xlu1 %3514, %v4017_v4  }
 0x17b   : > { %v4300_v12 = vpop.permute.xlu1 %913 }
 0x17c   : > { %6268 = vst [vmem:[#allocation59_spill] sm:$0xff] %v4300_v12  ;;  %v4310_v14 = vpop.permute.xlu0 %1011  ;;  %v6150_v12 = vmov 19  }
 0x17d   : > { %3523 = vset.pattern.permute.xlu0 %v6149_v58  ;;  %6271 = vst [vmem:[#allocation62_spill] sm:$0xff] %v4310_v14 }
 0x17e   : > { %1353 = vperm.xlu1 %3514, %v4021_v6   ;;  %1617 = vperm.xlu0 %3523, %v4013_v2  }
 0x17f   : > { %v4307_v15 = vpop.permute.xlu1 %921 }
 0x180   : > { %6270 = vst [vmem:[#allocation61_spill] sm:$0xff] %v4307_v15 }
 0x181   : > { %v4319_v26 = vpop.permute.xlu0 %1057 }
 0x182   : > { %1361 = vperm.xlu1 %3514, %v4025_v8   ;;  %1629 = vperm.xlu0 %3523, %v4019_v5   ;;  %6274 = vst [vmem:[#allocation65_spill] sm:$0xff] %v4319_v26 }
 0x183   : > { %v4313_v51 = vpop.permute.xlu1 %925 }
 0x184   : > { %6272 = vst [vmem:[#allocation63_spill] sm:$0xff] %v4313_v51 }
 0x185   : > { %v4326_v14 = vpop.permute.xlu0 %1069 }
 0x186   : > { %3517 = vset.pattern.permute.xlu1 %v3796_v35  ;;  %1637 = vperm.xlu0 %3523, %v4023_v7   ;;  %6276 = vst [vmem:[#allocation67_spill] sm:$0xff] %v4326_v14 }
 0x187   : > { %1407 = vperm.xlu1 %3517, %v4013_v2   ;;  %v4317_v58 = vpop.permute.xlu1 %933 }
 0x188   : > { %6273 = vst [vmem:[#allocation64_spill] sm:$0xff] %v4317_v58 }
 0x189   : > { %v4332_v58 = vpop.permute.xlu0 %1077 }
 0x18a   : > { %3524 = vset.pattern.permute.xlu0 %v6150_v12  ;;  %6278 = vst [vmem:[#allocation69_spill] sm:$0xff] %v4332_v58 }
 0x18b   : > { %1411 = vperm.xlu1 %3517, %v4015_v3   ;;  %v4323_v15 = vpop.permute.xlu1 %941  ;;  %1683 = vperm.xlu0 %3524, %v4011_v1  }
 0x18c   : > { %6275 = vst [vmem:[#allocation66_spill] sm:$0xff] %v4323_v15  ;;  %v6151_v15 = vmov 20  }
 0x18e   : > { %v4342_v26 = vpop.permute.xlu0 %1123 }
 0x18f   : > { %1419 = vperm.xlu1 %3517, %v4019_v5   ;;  %1695 = vperm.xlu0 %3524, %v4017_v4   ;;  %6281 = vst [vmem:[#allocation72_spill] sm:$0xff] %v4342_v26 }
 0x190   : > { %v4330_v35 = vpop.permute.xlu1 %987 }
 0x191   : > { %6277 = vst [vmem:[#allocation68_spill] sm:$0xff] %v4330_v35 }
 0x192   : > { %v4348_v35 = vpop.permute.xlu0 %1135 }
 0x193   : > { %1427 = vperm.xlu1 %3517, %v4023_v7   ;;  %1703 = vperm.xlu0 %3524, %v4021_v6   ;;  %6283 = vst [vmem:[#allocation74_spill] sm:$0xff] %v4348_v35  ;;  %v6152_v35 = vmov 21  }
 0x194   : > { %v4336_v12 = vpop.permute.xlu1 %991 }
 0x195   : > { %6279 = vst [vmem:[#allocation70_spill] sm:$0xff] %v4336_v12 }
 0x196   : > { %v4355_v12 = vpop.permute.xlu0 %1143 }
 0x197   : > { %3518 = vset.pattern.permute.xlu1 %v3797_v42  ;;  %1711 = vperm.xlu0 %3524, %v4025_v8   ;;  %6285 = vst [vmem:[#allocation76_spill] sm:$0xff] %v4355_v12 }
 0x198   : > { %1473 = vperm.xlu1 %3518, %v4011_v1   ;;  %v4340_v14 = vpop.permute.xlu1 %999 }
 0x199   : > { %6280 = vst [vmem:[#allocation71_spill] sm:$0xff] %v4340_v14 }
 0x19b   : > { %3527 = vset.pattern.permute.xlu0 %v6151_v15 }
 0x19c   : > { %1481 = vperm.xlu1 %3518, %v4015_v3   ;;  %v4346_v58 = vpop.permute.xlu1 %1007  ;;  %1757 = vperm.xlu0 %3527, %v4013_v2  }
 0x19d   : > { %6282 = vst [vmem:[#allocation73_spill] sm:$0xff] %v4346_v58  ;;  %v4362_v58 = vpop.permute.xlu0 %1151 }
 0x19e   : > { %6287 = vst [vmem:[#allocation78_spill] sm:$0xff] %v4362_v58 }
 0x1a0   : > { %1485 = vperm.xlu1 %3518, %v4017_v4   ;;  %1769 = vperm.xlu0 %3527, %v4019_v5  }
 0x1a1   : > { %v4353_v42 = vpop.permute.xlu1 %1053 }
 0x1a2   : > { %6284 = vst [vmem:[#allocation75_spill] sm:$0xff] %v4353_v42  ;;  %v6289_v42 = vmov 17  }
 0x1a4   : > { %1493 = vperm.xlu1 %3518, %v4021_v6   ;;  %1777 = vperm.xlu0 %3527, %v4023_v7  }
 0x1a5   : > { %v4359_v15 = vpop.permute.xlu1 %1061 }
 0x1a6   : > { %6286 = vst [vmem:[#allocation77_spill] sm:$0xff] %v4359_v15  ;;  %v4373_v15 = vpop.permute.xlu0 %1197 }
 0x1a7   : > { %6291 = vst [vmem:[#allocation81_spill] sm:$0xff] %v4373_v15 }
 0x1a8   : > { %1501 = vperm.xlu1 %3518, %v4025_v8   ;;  %3528 = vset.pattern.permute.xlu0 %v6152_v35 }
 0x1a9   : > { %v4365_v14 = vpop.permute.xlu1 %1065  ;;  %1823 = vperm.xlu0 %3528, %v4011_v1  }
 0x1aa   : > { %6288 = vst [vmem:[#allocation79_spill] sm:$0xff] %v4365_v14  ;;  %v4379_v35 = vpop.permute.xlu0 %1209 }
 0x1ab   : > { %6293 = vst [vmem:[#allocation83_spill] sm:$0xff] %v4379_v35 }
 0x1ac   : > { %3521 = vset.pattern.permute.xlu1 %v6289_v42 }
 0x1ad   : > { %1547 = vperm.xlu1 %3521, %v4013_v2   ;;  %v4370_v12 = vpop.permute.xlu1 %1073  ;;  %1835 = vperm.xlu0 %3528, %v4017_v4  }
 0x1ae   : > { %6290 = vst [vmem:[#allocation80_spill] sm:$0xff] %v4370_v12  ;;  %v4385_v14 = vpop.permute.xlu0 %1217  ;;  %v6153_v12 = vmov 22  }
 0x1af   : > { %6295 = vst [vmem:[#allocation85_spill] sm:$0xff] %v4385_v14 }
 0x1b1   : > { %1551 = vperm.xlu1 %3521, %v4015_v3   ;;  %v4376_v58 = vpop.permute.xlu1 %1081  ;;  %1843 = vperm.xlu0 %3528, %v4021_v6  }
 0x1b2   : > { %6292 = vst [vmem:[#allocation82_spill] sm:$0xff] %v4376_v58  ;;  %v6297_v58 = vmov 18   ;;  %v4396_v26 = vpop.permute.xlu0 %1263 }
 0x1b3   : > { %6299 = vst [vmem:[#allocation88_spill] sm:$0xff] %v4396_v26 }
 0x1b5   : > { %1559 = vperm.xlu1 %3521, %v4019_v5   ;;  %1851 = vperm.xlu0 %3528, %v4025_v8  }
 0x1b6   : > { %v4383_v42 = vpop.permute.xlu1 %1127  ;;  %v4402_v14 = vpop.permute.xlu0 %1275 }
 0x1b7   : > { %6294 = vst [vmem:[#allocation84_spill] sm:$0xff] %v4383_v42  ;;  %6301 = vst [vmem:[#allocation90_spill] sm:$0xff] %v4402_v14 }
 0x1b9   : > { %1567 = vperm.xlu1 %3521, %v4023_v7   ;;  %3531 = vset.pattern.permute.xlu0 %v6153_v12  ;;  %v384_v12 = vlaneseq }
 0x1ba   : > { %v4389_v15 = vpop.permute.xlu1 %1131  ;;  %1897 = vperm.xlu0 %3531, %v4013_v2   ;;  %v4410_v26 = vpop.permute.xlu0 %1283 }
 0x1bb   : > { %6296 = vst [vmem:[#allocation86_spill] sm:$0xff] %v4389_v15  ;;  %v385_v15 = vshrl.u32 %v384_v12, 7  ;;  %6303 = vst [vmem:[#allocation92_spill] sm:$0xff] %v4410_v26  ;;  %v339_v12 = vld [vmem:[%s6136_s2] sm:$0xff] }
 0x1bd   : > { %3522 = vset.pattern.permute.xlu1 %v6297_v58  ;;  %v6155_v58 = vmov 23   ;;  %v4433_v51 = vsub.s32 3, %v385_v15  ;;  %v4438_v16 = vsub.s32 4, %v385_v15  ;;  %v4454_v62 = vsub.s32 5, %v385_v15 }
 0x1be   : > { %1613 = vperm.xlu1 %3522, %v4011_v1   ;;  %v4394_v35 = vpop.permute.xlu1 %1139  ;;  %1909 = vperm.xlu0 %3531, %v4019_v5   ;;  %v4430_v26 = vpop.permute.xlu0 %1291  ;;  %v4464_v63 = vsub.s32 6, %v385_v15  ;;  %v4481_v54 = vsub.s32 7, %v385_v15 }
 0x1bf   : > { %6298 = vst [vmem:[#allocation87_spill] sm:$0xff] %v4394_v35  ;;  %6308 = vst [vmem:[#allocation97_spill] sm:$0xff] %v4430_v26  ;;  %v4449_v26 = vstv %s3250_s3  ;;  %v4462_v10 = vrot.slane %v339_v12, %v4433_v51  ;;  %s4599_s3 = sld [smem:[#allocation6 + $0xa]] }
 0x1c0   : > { %6309 = vst [vmem:[#allocation98_spill] sm:$0xff] %v4433_v51  ;;  %6311 = vst [vmem:[#allocation100_spill] sm:$0xff] %v4438_v16 }
 0x1c1   : > { %6312 = vst [vmem:[#allocation101_spill] sm:$0xff] %v4454_v62  ;;  %6314 = vst [vmem:[#allocation102_spill] sm:$0xff] %v4464_v63 }
 0x1c2   : > { %1621 = vperm.xlu1 %3522, %v4015_v3   ;;  %v4400_v42 = vpop.permute.xlu1 %1147  ;;  %1917 = vperm.xlu0 %3531, %v4023_v7   ;;  %6318 = vst [vmem:[#allocation106_spill] sm:$0xff] %v4481_v54 }
 0x1c3   : > { %6300 = vst [vmem:[#allocation89_spill] sm:$0xff] %v4400_v42  ;;  %v4413_v42 = vsub.s32 0, %v385_v15 }
 0x1c5   : > { %6304 = vst [vmem:[#allocation93_spill] sm:$0xff] %v4413_v42 }
 0x1c6   : > { %1625 = vperm.xlu1 %3522, %v4017_v4   ;;  %3532 = vset.pattern.permute.xlu0 %v6155_v58  ;;  %v4421_v58 = vsub.s32 1, %v385_v15 }
 0x1c7   : > { %v4407_v35 = vpop.permute.xlu1 %1193  ;;  %1963 = vperm.xlu0 %3532, %v4011_v1  }
 0x1c8   : > { %6302 = vst [vmem:[#allocation91_spill] sm:$0xff] %v4407_v35  ;;  %6306 = vst [vmem:[#allocation95_spill] sm:$0xff] %v4421_v58  ;;  %v4425_v35 = vsub.s32 2, %v385_v15  ;;  %v4445_v13 = vrot.slane %v339_v12, %v4421_v58 }
 0x1ca   : > { %1633 = vperm.xlu1 %3522, %v4021_v6   ;;  %6307 = vst [vmem:[#allocation96_spill] sm:$0xff] %v4425_v35  ;;  %v4452_v0 = vrot.slane %v339_v12, %v4425_v35 }
 0x1cb   : > { %v4415_v14 = vpop.permute.xlu1 %1201  ;;  %1975 = vperm.xlu0 %3532, %v4017_v4  }
 0x1cc   : > { %6305 = vst [vmem:[#allocation94_spill] sm:$0xff] %v4415_v14  ;;  %v387_v14 = vrot.slane %v339_v12, %v4413_v42 }
 0x1ce   : > { %1641 = vperm.xlu1 %3522, %v4025_v8   ;;  %v390_v60 = vsub.f32 %v4091_v17, %v387_v14  ;;  %v388_v59 = vsub.f32 %v4093_v18, %v387_v14  ;;  %v391_v57 = vsub.f32 %v4097_v20, %v387_v14  ;;  %v4474_v17 = vrot.slane %v339_v12, %v4438_v16  ;;  %v4476_v18 = vpop.permute.xlu0 %1337 }
 0x1cf   : > { %v4435_v9 = vpop.permute.xlu1 %1205  ;;  %1983 = vperm.xlu0 %3532, %v4021_v6   ;;  %6317 = vst [vmem:[#allocation105_spill] sm:$0xff] %v4476_v18  ;;  %v389_v51 = vsub.f32 %v4099_v21, %v387_v14  ;;  %v393_v56 = vsub.f32 %v4103_v22, %v387_v14  ;;  %v392_v55 = vsub.f32 %v4105_v23, %v387_v14  ;;  %v4488_v20 = vstv %s4427_s25  ;;  %s4887_s25 = sld [smem:[#allocation6 + $0xf]] }
 0x1d0   : > { %6310 = vst [vmem:[#allocation99_spill] sm:$0xff] %v4435_v9  ;;  %v6313_v9 = vmov 19   ;;  %6319 = vst [vmem:[#allocation107_spill] sm:$0xff] %v4488_v20  ;;  %v4491_v16 = vrot.slane %v339_v12, %v4454_v62  ;;  %v396_v18 = vand.u32 2147483647, %v388_v59  ;;  %v459_v21 = vsub.f32 %v4115_v27, %v4445_v13  ;;  %v4511_v27 = vld [vmem:[%s6136_s2 + $0x8] sm:$0xff] }
 0x1d1   : > { %v4496_v22 = vrot.slane %v339_v12, %v4464_v63  ;;  %v399_v15 = vand.u32 2147483647, %v391_v57  ;;  %v394_v62 = vsub.f32 %v4111_v25, %v387_v14  ;;  %v458_v59 = vsub.f32 %v4117_v28, %v4445_v13 }
 0x1d2   : > { %3525 = vset.pattern.permute.xlu1 %v6313_v9  ;;  %v4471_v9 = vstv %s3251_s28  ;;  %6320 = vst [vmem:[#allocation108_spill] sm:$0xff] %v4491_v16  ;;  %v4513_v63 = vpop.permute.xlu0 %1349  ;;  %v401_v20 = vand.u32 2147483647, %v393_v56  ;;  %v4517_v57 = vrot.slane %v339_v12, %v4481_v54  ;;  %v460_v28 = vsub.f32 %v4121_v29, %v4445_v13  ;;  %s4775_s28 = sld [smem:[#allocation6 + $0xd]] }
 0x1d3   : > { %1687 = vperm.xlu1 %3525, %v4013_v2   ;;  %v4467_v61 = vpop.permute.xlu1 %1213  ;;  %1991 = vperm.xlu0 %3532, %v4025_v8   ;;  %6316 = vst [vmem:[#allocation104_spill] sm:$0xff] %v4471_v9  ;;  %v4485_v8 = vstv %s4423_s19  ;;  %v398_v9 = vand.u32 2147483647, %v390_v60  ;;  %6321 = vst [vmem:[#allocation109_spill] sm:$0xff] %v4496_v22  ;;  %v4506_v60 = vstv %s4440_s13  ;;  %v467_v16 = vand.u32 2147483647, %v459_v21 }
 0x1d4   : > { %6315 = vst [vmem:[#allocation103_spill] sm:$0xff] %v4467_v61  ;;  %v395_v61 = vsub.f32 %v4109_v24, %v387_v14  ;;  %v6168_v24 = vmov 24   ;;  %6323 = vst [vmem:[#allocation111_spill] sm:$0xff] %v4506_v60  ;;  %v461_v14 = vsub.f32 %v4123_v30, %v4445_v13  ;;  %v4524_v60 = vstv %s4456_s21  ;;  %s4834_s19 = sld [smem:[#allocation6 + $0xe]] }
 0x1d5   : > { %6324 = vst [vmem:[#allocation112_spill] sm:$0xff] %v4513_v63  ;;  %v407_v22 = vmul.f32 %v4442_v19, %v398_v9  ;;  %v405_v63 = vmul.f32 %v4442_v19, %v396_v18  ;;  %v402_v56 = vand.u32 2147483647, %v394_v62  ;;  %v462_v29 = vsub.f32 %v4127_v31, %v4445_v13  ;;  %s4956_s13 = sld [smem:[#allocation6 + $0x10]] }
 0x1d6   : > { %v403_v25 = vand.u32 2147483647, %v395_v61  ;;  %v466_v61 = vand.u32 2147483647, %v458_v59  ;;  %v463_v30 = vsub.f32 %v4129_v32, %v4445_v13  ;;  %v408_v12 = vmul.f32 %v4442_v19, %v399_v15  ;;  %s3273_s21 = sld [smem:[#allocation6 + $0x19]] }
 0x1d7   : > { %1691 = vperm.xlu1 %3525, %v4015_v3   ;;  %v4499_v23 = vpop.permute.xlu1 %1221  ;;  %3535 = vset.pattern.permute.xlu0 %v6168_v24  ;;  %v400_v24 = vand.u32 2147483647, %v392_v55  ;;  %v4530_v55 = vrot.slane %v4511_v27, %v4413_v42  ;;  %v410_v18 = vmul.f32 %v4442_v19, %v401_v20  ;;  %v468_v32 = vand.u32 2147483647, %v460_v28 }
 0x1d8   : > { %6322 = vst [vmem:[#allocation110_spill] sm:$0xff] %v4499_v23  ;;  %2037 = vperm.xlu0 %3535, %v4013_v2   ;;  %v397_v23 = vand.u32 2147483647, %v389_v51  ;;  %v4549_v31 = vmul.f32 %v4442_v19, %v403_v25  ;;  %v469_v21 = vand.u32 2147483647, %v461_v14  ;;  %v464_v59 = vsub.f32 %v4133_v33, %v4445_v13 }
 0x1d9   : > { %v409_v62 = vmul.f32 %v4442_v19, %v400_v24  ;;  %v476_v15 = vmul.f32 %v4447_v11, %v467_v16  ;;  %v528_v20 = vsub.f32 %v4139_v36, %v4452_v0  ;;  %v529_v24 = vsub.f32 %v4141_v37, %v4452_v0 }
 0x1da   : > { %v406_v9 = vmul.f32 %v4442_v19, %v397_v23  ;;  %v465_v23 = vsub.f32 %v4135_v34, %v4445_v13  ;;  %v411_v25 = vmul.f32 %v4442_v19, %v402_v56  ;;  %v475_v28 = vmul.f32 %v4447_v11, %v466_v61 }
 0x1db   : > { %1699 = vperm.xlu1 %3525, %v4019_v5   ;;  %v470_v33 = vand.u32 2147483647, %v462_v29  ;;  %v471_v14 = vand.u32 2147483647, %v463_v30  ;;  %v530_v34 = vsub.f32 %v4145_v38, %v4452_v0  ;;  %v532_v36 = vsub.f32 %v4147_v39, %v4452_v0 }
 0x1dc   : > { %v4539_v51 = vpop.permute.xlu1 %1267  ;;  %2049 = vperm.xlu0 %3535, %v4019_v5   ;;  %v4574_v37 = vrot.slane %v4511_v27, %v4421_v58  ;;  %v477_v13 = vmul.f32 %v4447_v11, %v468_v32  ;;  %v478_v16 = vmul.f32 %v4447_v11, %v469_v21  ;;  %v472_v19 = vand.u32 2147483647, %v464_v59 }
 0x1dd   : > { %6325 = vst [vmem:[#allocation113_spill] sm:$0xff] %v4539_v51  ;;  %v4553_v51 = vpop.permute.xlu0 %1357  ;;  %v531_v56 = vsub.f32 %v4151_v40, %v4452_v0  ;;  %v484_v61 = vadd.f32 %v476_v15, %v406_v9  ;;  %v473_v29 = vand.u32 2147483647, %v465_v23  ;;  %v536_v30 = vand.u32 2147483647, %v528_v20 }
 0x1de   : > { %6326 = vst [vmem:[#allocation114_spill] sm:$0xff] %v4553_v51  ;;  %v537_v38 = vand.u32 2147483647, %v529_v24  ;;  %v483_v39 = vadd.f32 %v475_v28, %v405_v63  ;;  %v479_v42 = vmul.f32 %v4447_v11, %v470_v33  ;;  %v480_v58 = vmul.f32 %v4447_v11, %v471_v14 }
 0x1df   : > { %1707 = vperm.xlu1 %3525, %v4023_v7   ;;  %v4584_v54 = vstv %s4537_s15  ;;  %v6178_v40 = vmov 25   ;;  %v538_v9 = vand.u32 2147483647, %v530_v34  ;;  %v540_v59 = vand.u32 2147483647, %v532_v36  ;;  %s5082_s15 = sld [smem:[#allocation6 + $0x12]] }
 0x1e0   : > { %v4565_v51 = vpop.permute.xlu1 %1271  ;;  %2057 = vperm.xlu0 %3535, %v4023_v7   ;;  %v534_v63 = vsub.f32 %v4153_v41, %v4452_v0  ;;  %v485_v15 = vadd.f32 %v477_v13, %v407_v22  ;;  %v486_v23 = vadd.f32 %v478_v16, %v408_v12  ;;  %v481_v20 = vmul.f32 %v4447_v11, %v472_v19 }
 0x1e1   : > { %6327 = vst [vmem:[#allocation115_spill] sm:$0xff] %v4565_v51  ;;  %v6328_v51 = vmov 20   ;;  %v4589_v21 = vpop.permute.xlu0 %1403  ;;  %v539_v24 = vand.u32 2147483647, %v531_v56  ;;  %v482_v28 = vmul.f32 %v4447_v11, %v473_v29  ;;  %v545_v33 = vmul.f32 %v4449_v26, %v536_v30 }
 0x1e2   : > { %v546_v14 = vmul.f32 %v4449_v26, %v537_v38  ;;  %v533_v41 = vsub.f32 %v4157_v43, %v4452_v0  ;;  %v487_v34 = vadd.f32 %v479_v42, %v409_v62  ;;  %v488_v36 = vadd.f32 %v480_v58, %v410_v18 }
 0x1e3   : > { %3526 = vset.pattern.permute.xlu1 %v6328_v51  ;;  %v4595_v51 = vstv %s4546_s20  ;;  %v598_v22 = vsub.f32 %v4159_v44, %v4462_v10  ;;  %v535_v12 = vsub.f32 %v4163_v45, %v4452_v0  ;;  %v547_v16 = vmul.f32 %v4449_v26, %v538_v9  ;;  %s5157_s20 = sld [smem:[#allocation6 + $0x13]] }
 0x1e4   : > { %1753 = vperm.xlu1 %3526, %v4011_v1   ;;  %v4587_v32 = vpop.permute.xlu1 %1279  ;;  %3536 = vset.pattern.permute.xlu0 %v6178_v40  ;;  %v549_v19 = vmul.f32 %v4449_v26, %v540_v59  ;;  %v542_v56 = vand.u32 2147483647, %v534_v63  ;;  %v601_v43 = vsub.f32 %v4165_v46, %v4462_v10  ;;  %v489_v44 = vadd.f32 %v481_v20, %v411_v25  ;;  %v6339_v40 = vld [vmem:[#allocation98_spill] sm:$0xff] }
 0x1e5   : > { %2103 = vperm.xlu0 %3536, %v4011_v1   ;;  %v4613_v11 = vpop.permute.xlu0 %1415  ;;  %v548_v42 = vmul.f32 %v4449_v26, %v539_v24  ;;  %v599_v45 = vsub.f32 %v4169_v47, %v4462_v10  ;;  %v603_v0 = vsub.f32 %v4171_v48, %v4462_v10  ;;  %v490_v58 = vadd.f32 %v482_v28, %v4549_v31 }
 0x1e6   : > { %v553_v18 = vadd.f32 %v545_v33, %v483_v39  ;;  %v554_v62 = vadd.f32 %v546_v14, %v484_v61  ;;  %v541_v29 = vand.u32 2147483647, %v533_v41  ;;  %v606_v30 = vand.u32 2147483647, %v598_v22  ;;  %v6332_v14 = vld [vmem:[#allocation104_spill] sm:$0xff]  ;;  %v6333_v22 = vld [vmem:[#allocation22_spill] sm:$0xff] }
 0x1e7   : > { %v543_v38 = vand.u32 2147483647, %v535_v12  ;;  %v600_v46 = vsub.f32 %v4175_v49, %v4462_v10  ;;  %v4630_v25 = vrot.slane %v4511_v27, %v4425_v35  ;;  %v555_v47 = vadd.f32 %v547_v16, %v485_v15 }
 0x1e8   : > { %1761 = vperm.xlu1 %3526, %v4015_v3   ;;  %v4611_v13 = vpop.permute.xlu1 %1287  ;;  %v4633_v9 = vadd.f32 %v549_v19, %v487_v34  ;;  %v551_v48 = vmul.f32 %v4449_v26, %v542_v56  ;;  %v609_v31 = vand.u32 2147483647, %v601_v43  ;;  %v556_v39 = vadd.f32 %v548_v42, %v486_v23 }
 0x1e9   : > { %6329 = vst [vmem:[#allocation116_spill] sm:$0xff] %v4611_v13  ;;  %2115 = vperm.xlu0 %3536, %v4017_v4   ;;  %v607_v59 = vand.u32 2147483647, %v599_v45  ;;  %v611_v63 = vand.u32 2147483647, %v603_v0  ;;  %v4640_v49 = vstv %s4599_s3  ;;  %v4642_v20 = vpop.permute.xlu0 %1423  ;;  %v550_v24 = vmul.f32 %v4449_v26, %v541_v29  ;;  %v6338_v45 = vld [vmem:[#allocation25_spill] sm:$0xff] }
 0x1ea   : > { %6331 = vst [vmem:[#allocation118_spill] sm:$0xff] %v4640_v49  ;;  %v605_v15 = vsub.f32 %v4177_v50, %v4462_v10  ;;  %v602_v28 = vsub.f32 %v4181_v52, %v4462_v10  ;;  %v669_v33 = vsub.f32 %v4183_v53, %v4474_v17  ;;  %v615_v41 = vmul.f32 %v6332_v14, %v606_v30  ;;  %v6334_v52 = vld [vmem:[#allocation23_spill] sm:$0xff]  ;;  %v6335_v53 = vld [vmem:[#allocation24_spill] sm:$0xff]  ;;  %s5220_s3 = sld [smem:[#allocation6 + $0x14]] }
 0x1eb   : > { %v552_v23 = vmul.f32 %v4449_v26, %v543_v38  ;;  %v608_v34 = vand.u32 2147483647, %v600_v46  ;;  %v604_v12 = vsub.f32 %v6333_v22, %v4462_v10  ;;  %v559_v16 = vadd.f32 %v551_v48, %v489_v44  ;;  %v6337_v26 = vld [vmem:[#allocation21_spill] sm:$0xff] }
 0x1ec   : > { %1765 = vperm.xlu1 %3526, %v4017_v4   ;;  %v618_v50 = vmul.f32 %v6332_v14, %v609_v31  ;;  %v672_v19 = vsub.f32 %v6334_v52, %v4474_v17  ;;  %v668_v56 = vsub.f32 %v6335_v53, %v4474_v17  ;;  %v616_v42 = vmul.f32 %v6332_v14, %v607_v59 }
 0x1ed   : > { %v4636_v61 = vpop.permute.xlu1 %1333  ;;  %2123 = vperm.xlu0 %3536, %v4021_v6   ;;  %v620_v10 = vmul.f32 %v6332_v14, %v611_v63  ;;  %v674_v0 = vsub.f32 %v6338_v45, %v4474_v17  ;;  %v558_v44 = vadd.f32 %v550_v24, %v488_v36  ;;  %v613_v29 = vand.u32 2147483647, %v605_v15  ;;  %v4672_v52 = vpop.permute.xlu0 %1431 }
 0x1ee   : > { %6330 = vst [vmem:[#allocation117_spill] sm:$0xff] %v4636_v61  ;;  %v610_v30 = vand.u32 2147483647, %v602_v28  ;;  %v677_v38 = vand.u32 2147483647, %v669_v33  ;;  %v623_v46 = vadd.f32 %v615_v41, %v553_v18  ;;  %v560_v48 = vadd.f32 %v552_v23, %v490_v58  ;;  %v6342_v28 = vld [vmem:[#allocation28_spill] sm:$0xff] }
 0x1ef   : > { %v617_v31 = vmul.f32 %v6332_v14, %v608_v34  ;;  %v612_v22 = vand.u32 2147483647, %v604_v12  ;;  %v4674_v53 = vadd.f32 %v618_v50, %v556_v39  ;;  %v680_v59 = vand.u32 2147483647, %v672_v19  ;;  %v6343_v34 = vld [vmem:[#allocation30_spill] sm:$0xff]  ;;  %v6344_v19 = vld [vmem:[#allocation32_spill] sm:$0xff] }
 0x1f0   : > { %1773 = vperm.xlu1 %3526, %v4021_v6   ;;  %v676_v63 = vand.u32 2147483647, %v668_v56  ;;  %v4678_v45 = vrot.slane %v4511_v27, %v6339_v40  ;;  %v6179_v18 = vmov 26   ;;  %v624_v58 = vadd.f32 %v616_v42, %v554_v62 }
 0x1f1   : > { %v4663_v43 = vpop.permute.xlu1 %1341  ;;  %2131 = vperm.xlu0 %3536, %v6337_v26   ;;  %v4683_v24 = vadd.f32 %v620_v10, %v558_v44  ;;  %v682_v15 = vand.u32 2147483647, %v674_v0  ;;  %v671_v39 = vsub.f32 %v6342_v28, %v4474_v17  ;;  %v622_v33 = vmul.f32 %v6332_v14, %v613_v29  ;;  %v6347_v29 = vld [vmem:[#allocation26_spill] sm:$0xff]  ;;  %v6349_v28 = vld [vmem:[#allocation27_spill] sm:$0xff] }
 0x1f2   : > { %6336 = vst [vmem:[#allocation104_spill] sm:$0xff] %v4663_v43  ;;  %6340 = vst [vmem:[#allocation22_spill] sm:$0xff] %v4678_v45  ;;  %v619_v41 = vmul.f32 %v6332_v14, %v610_v30  ;;  %v686_v23 = vmul.f32 %v4485_v8, %v677_v38  ;;  %v673_v12 = vsub.f32 %v6343_v34, %v4474_v17  ;;  %v4699_v42 = vstv %s4655_s22  ;;  %v6348_v38 = vld [vmem:[#allocation108_spill] sm:$0xff]  ;;  %v6351_v34 = vld [vmem:[#allocation29_spill] sm:$0xff]  ;;  %s5272_s22 = sld [smem:[#allocation6 + $0x15]] }
 0x1f3   : > { %v4693_v50 = vadd.f32 %v617_v31, %v555_v47  ;;  %v621_v62 = vmul.f32 %v6332_v14, %v612_v22  ;;  %v675_v56 = vsub.f32 %v6344_v19, %v4474_v17  ;;  %6345 = vst [vmem:[#allocation24_spill] sm:$0xff] %v4699_v42  ;;  %v6346_v10 = vmov 21  }
 0x1f4   : > { %1781 = vperm.xlu1 %3526, %v6337_v26   ;;  %v689_v0 = vmul.f32 %v4485_v8, %v680_v59  ;;  %v685_v44 = vmul.f32 %v4485_v8, %v676_v63  ;;  %v670_v30 = vsub.f32 %v6347_v29, %v4474_v17  ;;  %v738_v47 = vsub.f32 %v6349_v28, %v6348_v38  ;;  %v6352_v59 = vld [vmem:[#allocation31_spill] sm:$0xff]  ;;  %v4716_v63 = vpop.permute.xlu0 %1477 }
 0x1f5   : > { %v4680_v36 = vpop.permute.xlu1 %1345  ;;  %3539 = vset.pattern.permute.xlu0 %v6179_v18  ;;  %v691_v31 = vmul.f32 %v4485_v8, %v682_v15  ;;  %v679_v22 = vand.u32 2147483647, %v671_v39  ;;  %v741_v19 = vsub.f32 %v6351_v34, %v6348_v38  ;;  %6353 = vst [vmem:[#allocation28_spill] sm:$0xff] %v4716_v63  ;;  %v630_v17 = vadd.f32 %v622_v33, %v560_v48  ;;  %v6354_v15 = vld [vmem:[#allocation33_spill] sm:$0xff]  ;;  %v6355_v34 = vld [vmem:[#allocation34_spill] sm:$0xff] }
 0x1f6   : > { %6341 = vst [vmem:[#allocation23_spill] sm:$0xff] %v4680_v36  ;;  %2177 = vperm.xlu0 %3539, %v4013_v2   ;;  %v627_v29 = vadd.f32 %v619_v41, %v4633_v9  ;;  %v4720_v28 = vadd.f32 %v686_v23, %v624_v58  ;;  %v681_v18 = vand.u32 2147483647, %v673_v12  ;;  %v629_v43 = vadd.f32 %v621_v62, %v559_v16  ;;  %v6358_v23 = vld [vmem:[#allocation38_spill] sm:$0xff]  ;;  %v6359_v62 = vld [vmem:[#allocation40_spill] sm:$0xff] }
 0x1f7   : > { %v745_v39 = vsub.f32 %v6354_v15, %v6348_v38  ;;  %v739_v36 = vsub.f32 %v6355_v34, %v6348_v38  ;;  %v678_v63 = vand.u32 2147483647, %v670_v30  ;;  %v746_v13 = vand.u32 2147483647, %v738_v47  ;;  %v6360_v30 = vld [vmem:[#allocation109_spill] sm:$0xff]  ;;  %v6361_v47 = vld [vmem:[#allocation35_spill] sm:$0xff] }
 0x1f8   : > { %3529 = vset.pattern.permute.xlu1 %v6346_v10  ;;  %v743_v10 = vsub.f32 %v6352_v59, %v6348_v38  ;;  %v4726_v61 = vadd.f32 %v689_v0, %v627_v29  ;;  %v693_v59 = vadd.f32 %v685_v44, %v623_v46  ;;  %v4731_v9 = vadd.f32 %v691_v31, %v629_v43  ;;  %v4736_v41 = vpop.permute.xlu0 %1489  ;;  %v6363_v29 = vld [vmem:[#allocation36_spill] sm:$0xff]  ;;  %v6364_v15 = vld [vmem:[#allocation37_spill] sm:$0xff] }
 0x1f9   : > { %1827 = vperm.xlu1 %3529, %v4013_v2   ;;  %v4709_v14 = vpop.permute.xlu1 %1353  ;;  %v688_v16 = vmul.f32 %v4485_v8, %v679_v22  ;;  %v749_v58 = vand.u32 2147483647, %v741_v19  ;;  %6357 = vst [vmem:[#allocation32_spill] sm:$0xff] %v4736_v41  ;;  %v690_v46 = vmul.f32 %v4485_v8, %v681_v18  ;;  %v742_v12 = vsub.f32 %v6358_v23, %v6348_v38  ;;  %v6362_v19 = vld [vmem:[#allocation107_spill] sm:$0xff] }
 0x1fa   : > { %6350 = vst [vmem:[#allocation25_spill] sm:$0xff] %v4709_v14  ;;  %2189 = vperm.xlu0 %3539, %v4019_v5   ;;  %v683_v14 = vand.u32 2147483647, %v675_v56  ;;  %v751_v33 = vand.u32 2147483647, %v743_v10  ;;  %v744_v56 = vsub.f32 %v6359_v62, %v6348_v38  ;;  %v809_v31 = vsub.f32 %v6361_v47, %v6360_v30  ;;  %v6366_v62 = vld [vmem:[#allocation100_spill] sm:$0xff] }
 0x1fb   : > { %v753_v0 = vand.u32 2147483647, %v745_v39  ;;  %v747_v44 = vand.u32 2147483647, %v739_v36  ;;  %v687_v22 = vmul.f32 %v4485_v8, %v678_v63  ;;  %v755_v10 = vmul.f32 %v6362_v19, %v746_v13  ;;  %v6365_v36 = vld [vmem:[#allocation39_spill] sm:$0xff] }
 0x1fc   : > { %v692_v43 = vmul.f32 %v4485_v8, %v683_v14  ;;  %v740_v18 = vsub.f32 %v6363_v29, %v6348_v38  ;;  %v812_v34 = vsub.f32 %v6364_v15, %v6360_v30  ;;  %v696_v23 = vadd.f32 %v688_v16, %v4674_v53 }
 0x1fd   : > { %1831 = vperm.xlu1 %3529, %v4015_v3   ;;  %v4729_v48 = vpop.permute.xlu1 %1361  ;;  %v758_v14 = vmul.f32 %v6362_v19, %v749_v58  ;;  %v814_v39 = vsub.f32 %v6365_v36, %v6360_v30  ;;  %v4760_v8 = vrot.slane %v4511_v27, %v6366_v62  ;;  %v6180_v63 = vmov 27  }
 0x1fe   : > { %6356 = vst [vmem:[#allocation30_spill] sm:$0xff] %v4729_v48  ;;  %2197 = vperm.xlu0 %3539, %v4023_v7   ;;  %v698_v38 = vadd.f32 %v690_v46, %v4683_v24  ;;  %v760_v47 = vmul.f32 %v6362_v19, %v751_v33  ;;  %v750_v29 = vand.u32 2147483647, %v742_v12  ;;  %v752_v53 = vand.u32 2147483647, %v744_v56  ;;  %v4770_v48 = vpop.permute.xlu0 %1497  ;;  %v6370_v12 = vld [vmem:[#allocation42_spill] sm:$0xff] }
 0x1ff   : > { %6367 = vst [vmem:[#allocation26_spill] sm:$0xff] %v4760_v8  ;;  %v700_v16 = vadd.f32 %v692_v43, %v630_v17  ;;  %v762_v58 = vmul.f32 %v6362_v19, %v753_v0  ;;  %v756_v15 = vmul.f32 %v6362_v19, %v747_v44  ;;  %v817_v36 = vand.u32 2147483647, %v809_v31  ;;  %6369 = vst [vmem:[#allocation27_spill] sm:$0xff] %v4770_v48  ;;  %v6373_v44 = vld [vmem:[#allocation41_spill] sm:$0xff] }
 0x200   : > { %v748_v24 = vand.u32 2147483647, %v740_v18  ;;  %v820_v46 = vand.u32 2147483647, %v812_v34  ;;  %v4778_v33 = vadd.f32 %v758_v14, %v696_v23  ;;  %v822_v17 = vand.u32 2147483647, %v814_v39 }
 0x201   : > { %1839 = vperm.xlu1 %3529, %v4019_v5   ;;  %v808_v56 = vsub.f32 %v6370_v12, %v6360_v30  ;;  %v4783_v43 = vstv %s4734_s26  ;;  %v878_v31 = vsub.f32 %v6373_v44, %v4517_v57  ;;  %v4794_v18 = vadd.f32 %v760_v47, %v698_v38  ;;  %v6375_v14 = vld [vmem:[#allocation111_spill] sm:$0xff]  ;;  %v6376_v12 = vld [vmem:[#allocation48_spill] sm:$0xff]  ;;  %s5333_s26 = sld [smem:[#allocation6 + $0x16]] }
 0x202   : > { %v4762_v13 = vpop.permute.xlu1 %1407  ;;  %3540 = vset.pattern.permute.xlu0 %v6180_v63  ;;  %v4773_v63 = vadd.f32 %v755_v10, %v693_v59  ;;  %6371 = vst [vmem:[#allocation29_spill] sm:$0xff] %v4783_v43  ;;  %v761_v59 = vmul.f32 %v6362_v19, %v752_v53  ;;  %v4796_v34 = vadd.f32 %v762_v58, %v700_v16  ;;  %v6378_v48 = vmov 22   ;;  %v6379_v16 = vld [vmem:[#allocation44_spill] sm:$0xff]  ;;  %v6380_v58 = vld [vmem:[#allocation43_spill] sm:$0xff] }
 0x203   : > { %6368 = vst [vmem:[#allocation108_spill] sm:$0xff] %v4762_v13  ;;  %2243 = vperm.xlu0 %3540, %v4011_v1   ;;  %v695_v13 = vadd.f32 %v687_v22, %v4693_v50  ;;  %v759_v50 = vmul.f32 %v6362_v19, %v750_v29  ;;  %v6374_v22 = vld [vmem:[#allocation46_spill] sm:$0xff]  ;;  %v764_v23 = vadd.f32 %v756_v15, %v4720_v28  ;;  %v816_v47 = vand.u32 2147483647, %v808_v56 }
 0x204   : > { %v811_v10 = vsub.f32 %v6374_v22, %v6360_v30  ;;  %v826_v39 = vmul.f32 %v6375_v14, %v817_v36  ;;  %v757_v29 = vmul.f32 %v6362_v19, %v748_v24  ;;  %v829_v53 = vmul.f32 %v6375_v14, %v820_v46  ;;  %v4815_v36 = vpop.permute.xlu0 %1543 }
 0x205   : > { %1847 = vperm.xlu1 %3529, %v4023_v7   ;;  %v813_v44 = vsub.f32 %v6376_v12, %v6360_v30  ;;  %v831_v38 = vmul.f32 %v6375_v14, %v822_v17  ;;  %v810_v28 = vsub.f32 %v6379_v16, %v6360_v30  ;;  %v881_v15 = vsub.f32 %v6380_v58, %v4517_v57  ;;  %v6384_v12 = vld [vmem:[#allocation52_spill] sm:$0xff]  ;;  %v6385_v58 = vld [vmem:[#allocation101_spill] sm:$0xff] }
 0x206   : > { %v4785_v0 = vpop.permute.xlu1 %1411  ;;  %6382 = vst [vmem:[#allocation34_spill] sm:$0xff] %v4815_v36  ;;  %v767_v24 = vadd.f32 %v759_v50, %v4726_v61  ;;  %v886_v46 = vand.u32 2147483647, %v878_v31  ;;  %v819_v17 = vand.u32 2147483647, %v811_v10  ;;  %v834_v56 = vadd.f32 %v826_v39, %v764_v23  ;;  %v6387_v61 = vld [vmem:[#allocation47_spill] sm:$0xff] }
 0x207   : > { %6372 = vst [vmem:[#allocation31_spill] sm:$0xff] %v4785_v0  ;;  %2255 = vperm.xlu0 %3540, %v4017_v4   ;;  %v6377_v0 = vld [vmem:[#allocation50_spill] sm:$0xff]  ;;  %v879_v16 = vsub.f32 %v6384_v12, %v4517_v57  ;;  %v821_v36 = vand.u32 2147483647, %v813_v44  ;;  %v4831_v50 = vstv %s4775_s28  ;;  %v825_v31 = vmul.f32 %v6375_v14, %v816_v47  ;;  %s5538_s28 = sld [smem:[#allocation6 + $0x17]] }
 0x208   : > { %v815_v22 = vsub.f32 %v6377_v0, %v6360_v30  ;;  %v6383_v30 = vld [vmem:[#allocation45_spill] sm:$0xff]  ;;  %6388 = vst [vmem:[#allocation40_spill] sm:$0xff] %v4831_v50  ;;  %v818_v10 = vand.u32 2147483647, %v810_v28  ;;  %v889_v23 = vand.u32 2147483647, %v881_v15  ;;  %v4841_v44 = vadd.f32 %v829_v53, %v767_v24 }
 0x209   : > { %3530 = vset.pattern.permute.xlu1 %v6378_v48  ;;  %v769_v48 = vadd.f32 %v761_v59, %v4731_v9  ;;  %v883_v0 = vsub.f32 %v6383_v30, %v4517_v57  ;;  %v885_v9 = vsub.f32 %v6387_v61, %v4517_v57  ;;  %v765_v59 = vadd.f32 %v757_v29, %v695_v13  ;;  %v4839_v30 = vpop.permute.xlu0 %1555  ;;  %v6391_v28 = vld [vmem:[#allocation49_spill] sm:$0xff]  ;;  %v6392_v53 = vld [vmem:[#allocation51_spill] sm:$0xff] }
 0x20a   : > { %1893 = vperm.xlu1 %3530, %v4011_v1   ;;  %v4813_v19 = vpop.permute.xlu1 %1419  ;;  %v823_v41 = vand.u32 2147483647, %v815_v22  ;;  %6390 = vst [vmem:[#allocation35_spill] sm:$0xff] %v4839_v30  ;;  %v895_v12 = vmul.f32 %v4524_v60, %v886_v46  ;;  %v828_v13 = vmul.f32 %v6375_v14, %v819_v17  ;;  %v887_v47 = vand.u32 2147483647, %v879_v16  ;;  %v6393_v17 = vld [vmem:[#allocation55_spill] sm:$0xff] }
 0x20b   : > { %6381 = vst [vmem:[#allocation33_spill] sm:$0xff] %v4813_v19  ;;  %2263 = vperm.xlu0 %3540, %v4021_v6   ;;  %v4826_v19 = vrot.slane %v4511_v27, %v6385_v58  ;;  %v4843_v22 = vadd.f32 %v831_v38, %v769_v48  ;;  %v891_v29 = vand.u32 2147483647, %v883_v0  ;;  %v949_v15 = vsub.f32 %v6391_v28, %v4530_v55 }
 0x20c   : > { %v830_v61 = vmul.f32 %v6375_v14, %v821_v36  ;;  %v893_v58 = vand.u32 2147483647, %v885_v9  ;;  %v952_v38 = vsub.f32 %v6392_v53, %v4530_v55  ;;  %v833_v24 = vadd.f32 %v825_v31, %v4773_v63  ;;  %v6394_v36 = vld [vmem:[#allocation54_spill] sm:$0xff]  ;;  %v6395_v9 = vld [vmem:[#allocation53_spill] sm:$0xff] }
 0x20d   : > { %6386 = vst [vmem:[#allocation38_spill] sm:$0xff] %v4826_v19  ;;  %v827_v48 = vmul.f32 %v6375_v14, %v818_v10  ;;  %v898_v46 = vmul.f32 %v4524_v60, %v889_v23  ;;  %v882_v0 = vsub.f32 %v6393_v17, %v4517_v57  ;;  %v836_v16 = vadd.f32 %v828_v13, %v4778_v33  ;;  %v6396_v53 = vld [vmem:[#allocation102_spill] sm:$0xff]  ;;  %v6399_v13 = vld [vmem:[#allocation57_spill] sm:$0xff] }
 0x20e   : > { %1901 = vperm.xlu1 %3530, %v4015_v3   ;;  %v4837_v39 = vpop.permute.xlu1 %1427  ;;  %v954_v28 = vsub.f32 %v6395_v9, %v4530_v55  ;;  %v4867_v63 = vrot.slane %v4511_v27, %v6396_v53  ;;  %v6181_v31 = vmov 28   ;;  %v900_v10 = vmul.f32 %v4524_v60, %v891_v29 }
 0x20f   : > { %6389 = vst [vmem:[#allocation109_spill] sm:$0xff] %v4837_v39  ;;  %2271 = vperm.xlu0 %3540, %v6337_v26   ;;  %v832_v39 = vmul.f32 %v6375_v14, %v823_v41  ;;  %v880_v41 = vsub.f32 %v6394_v36, %v4517_v57  ;;  %v896_v33 = vmul.f32 %v4524_v60, %v887_v47  ;;  %v957_v23 = vand.u32 2147483647, %v949_v15  ;;  %v4876_v36 = vpop.permute.xlu0 %1563 }
 0x210   : > { %6397 = vst [vmem:[#allocation107_spill] sm:$0xff] %v4867_v63  ;;  %v884_v17 = vsub.f32 %v6399_v13, %v4517_v57  ;;  %6400 = vst [vmem:[#allocation37_spill] sm:$0xff] %v4876_v36  ;;  %v838_v9 = vadd.f32 %v830_v61, %v4794_v18  ;;  %v902_v53 = vmul.f32 %v4524_v60, %v893_v58  ;;  %v960_v30 = vand.u32 2147483647, %v952_v38  ;;  %v6402_v18 = vld [vmem:[#allocation59_spill] sm:$0xff]  ;;  %v6404_v61 = vld [vmem:[#allocation56_spill] sm:$0xff] }
 0x211   : > { %v835_v29 = vadd.f32 %v827_v48, %v765_v59  ;;  %v890_v62 = vand.u32 2147483647, %v882_v0  ;;  %v4885_v47 = vstv %s4834_s19  ;;  %v4890_v57 = vadd.f32 %v898_v46, %v836_v16  ;;  %v6405_v0 = vld [vmem:[#allocation58_spill] sm:$0xff] }
 0x212   : > { %1905 = vperm.xlu1 %3530, %v4017_v4   ;;  %6401 = vst [vmem:[#allocation39_spill] sm:$0xff] %v4885_v47  ;;  %v888_v15 = vand.u32 2147483647, %v880_v41  ;;  %v962_v13 = vand.u32 2147483647, %v954_v28  ;;  %v904_v58 = vadd.f32 %v896_v33, %v834_v56  ;;  %v1018_v38 = vsub.f32 %v6404_v61, %v4574_v37  ;;  %v6406_v56 = vld [vmem:[#allocation63_spill] sm:$0xff] }
 0x213   : > { %v4869_v14 = vpop.permute.xlu1 %1473  ;;  %3543 = vset.pattern.permute.xlu0 %v6181_v31  ;;  %v4882_v31 = vadd.f32 %v895_v12, %v833_v24  ;;  %v966_v12 = vmul.f32 %v4584_v54, %v957_v23  ;;  %v892_v59 = vand.u32 2147483647, %v884_v17  ;;  %v4900_v24 = vadd.f32 %v900_v10, %v838_v9  ;;  %v6407_v33 = vld [vmem:[#allocation60_spill] sm:$0xff]  ;;  %v6408_v17 = vld [vmem:[#allocation106_spill] sm:$0xff] }
 0x214   : > { %6398 = vst [vmem:[#allocation36_spill] sm:$0xff] %v4869_v14  ;;  %2317 = vperm.xlu0 %3543, %v4013_v2   ;;  %v840_v14 = vadd.f32 %v832_v39, %v4796_v34  ;;  %v948_v34 = vsub.f32 %v6402_v18, %v4530_v55  ;;  %v969_v46 = vmul.f32 %v4584_v54, %v960_v30  ;;  %v6411_v10 = vld [vmem:[#allocation64_spill] sm:$0xff] }
 0x215   : > { %v1021_v16 = vsub.f32 %v6405_v0, %v4574_v37  ;;  %v899_v41 = vmul.f32 %v4524_v60, %v890_v62  ;;  %v951_v28 = vsub.f32 %v6406_v56, %v4530_v55  ;;  %v1023_v23 = vsub.f32 %v6407_v33, %v4574_v37  ;;  %v6413_v33 = vld [vmem:[#allocation61_spill] sm:$0xff] }
 0x216   : > { %1913 = vperm.xlu1 %3530, %v4021_v6   ;;  %v4902_v48 = vadd.f32 %v902_v53, %v840_v14  ;;  %v4914_v18 = vrot.slane %v4511_v27, %v6408_v17  ;;  %v4917_v53 = vpop.permute.xlu0 %1571  ;;  %v897_v30 = vmul.f32 %v4524_v60, %v888_v15  ;;  %v971_v14 = vmul.f32 %v4584_v54, %v962_v13  ;;  %v6414_v17 = vld [vmem:[#allocation66_spill] sm:$0xff] }
 0x217   : > { %v4894_v39 = vpop.permute.xlu1 %1481  ;;  %6410 = vst [vmem:[#allocation46_spill] sm:$0xff] %v4917_v53  ;;  %v956_v62 = vand.u32 2147483647, %v948_v34  ;;  %v953_v9 = vsub.f32 %v6411_v10, %v4530_v55  ;;  %v4925_v0 = vadd.f32 %v966_v12, %v904_v58  ;;  %v901_v27 = vmul.f32 %v4524_v60, %v892_v59  ;;  %v6415_v34 = vld [vmem:[#allocation62_spill] sm:$0xff] }
 0x218   : > { %6403 = vst [vmem:[#allocation42_spill] sm:$0xff] %v4894_v39  ;;  %2329 = vperm.xlu0 %3543, %v4019_v5   ;;  %6409 = vst [vmem:[#allocation41_spill] sm:$0xff] %v4914_v18  ;;  %v1026_v56 = vand.u32 2147483647, %v1018_v38  ;;  %v950_v39 = vsub.f32 %v6413_v33, %v4530_v55  ;;  %v1029_v15 = vand.u32 2147483647, %v1021_v16  ;;  %v955_v13 = vsub.f32 %v6414_v17, %v4530_v55 }
 0x219   : > { %v1025_v53 = vsub.f32 %v6415_v34, %v4574_v37  ;;  %v907_v10 = vadd.f32 %v899_v41, %v4841_v44  ;;  %v1031_v58 = vand.u32 2147483647, %v1023_v23  ;;  %v4937_v12 = vstv %s4887_s25  ;;  %v6418_v16 = vld [vmem:[#allocation68_spill] sm:$0xff] }
 0x21a   : > { %1921 = vperm.xlu1 %3530, %v6337_v26   ;;  %6416 = vst [vmem:[#allocation48_spill] sm:$0xff] %v4937_v12  ;;  %v6417_v60 = vmov 23   ;;  %v905_v59 = vadd.f32 %v897_v30, %v835_v29  ;;  %v965_v38 = vmul.f32 %v4584_v54, %v956_v62  ;;  %v961_v33 = vand.u32 2147483647, %v953_v9  ;;  %v4950_v34 = vpop.permute.xlu0 %1617 }
 0x21b   : > { %v4923_v61 = vpop.permute.xlu1 %1485  ;;  %v1019_v36 = vsub.f32 %v6418_v16, %v4574_v37  ;;  %v909_v17 = vadd.f32 %v901_v27, %v4843_v22  ;;  %v1035_v44 = vmul.f32 %v4595_v51, %v1026_v56  ;;  %v958_v41 = vand.u32 2147483647, %v950_v39  ;;  %6421 = vst [vmem:[#allocation44_spill] sm:$0xff] %v4950_v34  ;;  %v6423_v56 = vld [vmem:[#allocation69_spill] sm:$0xff] }
 0x21c   : > { %6412 = vst [vmem:[#allocation111_spill] sm:$0xff] %v4923_v61  ;;  %2337 = vperm.xlu0 %3543, %v4023_v7   ;;  %v959_v61 = vand.u32 2147483647, %v951_v28  ;;  %v6420_v28 = vld [vmem:[#allocation65_spill] sm:$0xff]  ;;  %v6182_v29 = vmov 29   ;;  %v1038_v30 = vmul.f32 %v4595_v51, %v1029_v15  ;;  %v4959_v22 = vadd.f32 %v969_v46, %v907_v10  ;;  %v6425_v46 = vld [vmem:[#allocation72_spill] sm:$0xff] }
 0x21d   : > { %v1089_v23 = vsub.f32 %v6420_v28, %v4630_v25  ;;  %v963_v62 = vand.u32 2147483647, %v955_v13  ;;  %v1033_v9 = vand.u32 2147483647, %v1025_v53  ;;  %v1040_v27 = vmul.f32 %v4595_v51, %v1031_v58  ;;  %v4968_v53 = vld [vmem:[%s6136_s2 + $0x10] sm:$0xff] }
 0x21e   : > { %3533 = vset.pattern.permute.xlu1 %v6417_v60  ;;  %v6422_v60 = vld [vmem:[#allocation67_spill] sm:$0xff]  ;;  %v968_v39 = vmul.f32 %v4584_v54, %v959_v61  ;;  %v1094_v28 = vsub.f32 %v6423_v56, %v4630_v25  ;;  %6424 = vst [vmem:[#allocation43_spill] sm:$0xff] %v4968_v53  ;;  %v973_v15 = vadd.f32 %v965_v38, %v4882_v31  ;;  %v4982_v12 = vpop.permute.xlu0 %1629 }
 0x21f   : > { %1967 = vperm.xlu1 %3533, %v4013_v2   ;;  %v4944_v55 = vpop.permute.xlu1 %1493  ;;  %v1092_v16 = vsub.f32 %v6422_v60, %v4630_v25  ;;  %v970_v13 = vmul.f32 %v4584_v54, %v961_v33  ;;  %v1027_v60 = vand.u32 2147483647, %v1019_v36  ;;  %v1158_v10 = vsub.f32 %v6425_v46, %v4678_v45  ;;  %6428 = vst [vmem:[#allocation52_spill] sm:$0xff] %v4982_v12  ;;  %v6429_v33 = vld [vmem:[#allocation93_spill] sm:$0xff] }
 0x220   : > { %6419 = vst [vmem:[#allocation50_spill] sm:$0xff] %v4944_v55  ;;  %3544 = vset.pattern.permute.xlu0 %v6182_v29  ;;  %v4977_v58 = vadd.f32 %v971_v14, %v909_v17  ;;  %v967_v56 = vmul.f32 %v4584_v54, %v958_v41  ;;  %v1097_v29 = vand.u32 2147483647, %v1089_v23  ;;  %v6427_v55 = vld [vmem:[#allocation71_spill] sm:$0xff]  ;;  %v972_v31 = vmul.f32 %v4584_v54, %v963_v62  ;;  %v6430_v17 = vld [vmem:[#allocation73_spill] sm:$0xff]  ;;  %v6431_v23 = vld [vmem:[#allocation74_spill] sm:$0xff] }
 0x221   : > { %2383 = vperm.xlu0 %3544, %v4011_v1   ;;  %v1022_v34 = vsub.f32 %v6427_v55, %v4574_v37  ;;  %v1042_v36 = vmul.f32 %v4595_v51, %v1033_v9  ;;  %v1100_v38 = vand.u32 2147483647, %v1092_v16  ;;  %v4988_v46 = vrot.slane %v4968_v53, %v6429_v33 }
 0x222   : > { %v976_v14 = vadd.f32 %v968_v39, %v4890_v57  ;;  %v1024_v41 = vsub.f32 %v6430_v17, %v4574_v37  ;;  %v1102_v55 = vand.u32 2147483647, %v1094_v28  ;;  %v4996_v54 = vadd.f32 %v1035_v44, %v973_v15  ;;  %v6433_v39 = vld [vmem:[#allocation70_spill] sm:$0xff] }
 0x223   : > { %1971 = vperm.xlu1 %3533, %v4015_v3   ;;  %v4975_v61 = vpop.permute.xlu1 %1501  ;;  %v978_v62 = vadd.f32 %v970_v13, %v4900_v24  ;;  %v1036_v9 = vmul.f32 %v4595_v51, %v1027_v60  ;;  %v1166_v16 = vand.u32 2147483647, %v1158_v10  ;;  %v5001_v33 = vadd.f32 %v967_v56, %v905_v59  ;;  %v6435_v24 = vld [vmem:[#allocation75_spill] sm:$0xff] }
 0x224   : > { %6426 = vst [vmem:[#allocation45_spill] sm:$0xff] %v4975_v61  ;;  %v1161_v61 = vsub.f32 %v6431_v23, %v4678_v45  ;;  %v1106_v57 = vmul.f32 %v4640_v49, %v1097_v29  ;;  %v1020_v17 = vsub.f32 %v6433_v39, %v4574_v37  ;;  %v1030_v28 = vand.u32 2147483647, %v1022_v34  ;;  %v5021_v34 = vpop.permute.xlu0 %1637 }
 0x225   : > { %2395 = vperm.xlu0 %3544, %v4017_v4   ;;  %6432 = vst [vmem:[#allocation47_spill] sm:$0xff] %v5001_v33  ;;  %v980_v44 = vadd.f32 %v972_v31, %v4902_v48  ;;  %v1109_v15 = vmul.f32 %v4640_v49, %v1100_v38  ;;  %v1088_v13 = vsub.f32 %v6435_v24, %v4630_v25  ;;  %v5013_v60 = vstv %s4956_s13  ;;  %v6437_v38 = vld [vmem:[#allocation76_spill] sm:$0xff]  ;;  %v6442_v24 = vld [vmem:[#allocation81_spill] sm:$0xff]  ;;  %s5604_s13 = sld [smem:[#allocation6 + $0x18]] }
 0x226   : > { %v5016_v59 = vadd.f32 %v1038_v30, %v976_v14  ;;  %v1032_v29 = vand.u32 2147483647, %v1024_v41  ;;  %v1111_v10 = vmul.f32 %v4640_v49, %v1102_v55  ;;  %v1169_v37 = vand.u32 2147483647, %v1161_v61  ;;  %6436 = vst [vmem:[#allocation51_spill] sm:$0xff] %v5021_v34  ;;  %v6438_v61 = vld [vmem:[#allocation79_spill] sm:$0xff] }
 0x227   : > { %1979 = vperm.xlu1 %3533, %v4019_v5   ;;  %v5023_v48 = vadd.f32 %v1040_v27, %v978_v62  ;;  %v1044_v56 = vadd.f32 %v1036_v9, %v4925_v0  ;;  %v5027_v31 = vmul.f32 %v4699_v42, %v1166_v16  ;;  %v1163_v23 = vsub.f32 %v6437_v38, %v4678_v45  ;;  %v6439_v55 = vld [vmem:[#allocation78_spill] sm:$0xff]  ;;  %v6441_v16 = vld [vmem:[#allocation80_spill] sm:$0xff] }
 0x228   : > { %v5006_v12 = vpop.permute.xlu1 %1547  ;;  %v1028_v30 = vand.u32 2147483647, %v1020_v17  ;;  %v1039_v14 = vmul.f32 %v4595_v51, %v1030_v28  ;;  %v1091_v41 = vsub.f32 %v6438_v61, %v4630_v25  ;;  %v1165_v27 = vsub.f32 %v6439_v55, %v4678_v45  ;;  %v6443_v61 = vld [vmem:[#allocation95_spill] sm:$0xff] }
 0x229   : > { %6434 = vst [vmem:[#allocation49_spill] sm:$0xff] %v5006_v12  ;;  %2403 = vperm.xlu0 %3544, %v4021_v6   ;;  %v5039_v0 = vadd.f32 %v1042_v36, %v980_v44  ;;  %v1096_v9 = vand.u32 2147483647, %v1088_v13  ;;  %v1093_v39 = vsub.f32 %v6441_v16, %v4630_v25  ;;  %v1229_v38 = vsub.f32 %v6442_v24, %v4760_v8  ;;  %v6444_v13 = vld [vmem:[#allocation82_spill] sm:$0xff] }
 0x22a   : > { %v1041_v17 = vmul.f32 %v4595_v51, %v1032_v29  ;;  %v5048_v28 = vmul.f32 %v4699_v42, %v1169_v37  ;;  %v5052_v55 = vrot.slane %v4968_v53, %v6443_v61  ;;  %v5054_v36 = vadd.f32 %v1106_v57, %v1044_v56  ;;  %v5068_v56 = vpop.permute.xlu0 %1683 }
 0x22b   : > { %1987 = vperm.xlu1 %3533, %v4023_v7   ;;  %v1171_v44 = vand.u32 2147483647, %v1163_v23  ;;  %v1095_v16 = vsub.f32 %v6444_v13, %v4630_v25  ;;  %v6446_v33 = vmov 24   ;;  %v5062_v29 = vmul.f32 %v4595_v51, %v1028_v30  ;;  %6449 = vst [vmem:[#allocation57_spill] sm:$0xff] %v5068_v56  ;;  %v6451_v30 = vld [vmem:[#allocation84_spill] sm:$0xff] }
 0x22c   : > { %v5037_v62 = vpop.permute.xlu1 %1551  ;;  %v1047_v37 = vadd.f32 %v1039_v14, %v4959_v22  ;;  %v1099_v12 = vand.u32 2147483647, %v1091_v41  ;;  %v1173_v61 = vand.u32 2147483647, %v1165_v27  ;;  %v1105_v23 = vmul.f32 %v4640_v49, %v1096_v9  ;;  %v6452_v41 = vld [vmem:[#allocation88_spill] sm:$0xff]  ;;  %v6454_v9 = vld [vmem:[#allocation77_spill] sm:$0xff] }
 0x22d   : > { %6440 = vst [vmem:[#allocation55_spill] sm:$0xff] %v5037_v62  ;;  %2411 = vperm.xlu0 %3544, %v6337_v26   ;;  %v6445_v62 = vld [vmem:[#allocation83_spill] sm:$0xff]  ;;  %6447 = vst [vmem:[#allocation54_spill] sm:$0xff] %v5062_v29  ;;  %v1101_v13 = vand.u32 2147483647, %v1093_v39  ;;  %v6184_v51 = vmov 30   ;;  %v1049_v22 = vadd.f32 %v1041_v17, %v4977_v58  ;;  %v1159_v14 = vsub.f32 %v6451_v30, %v4678_v45 }
 0x22e   : > { %v1232_v24 = vsub.f32 %v6445_v62, %v4760_v8  ;;  %v1237_v62 = vand.u32 2147483647, %v1229_v38  ;;  %v1298_v27 = vsub.f32 %v6452_v41, %v4826_v19  ;;  %v5080_v29 = vstv %s5019_s24  ;;  %v6455_v41 = vld [vmem:[#allocation90_spill] sm:$0xff]  ;;  %s3275_s24 = sld [smem:[#allocation6 + $0x1b]] }
 0x22f   : > { %3534 = vset.pattern.permute.xlu1 %v6446_v33  ;;  %v6450_v33 = vld [vmem:[#allocation85_spill] sm:$0xff]  ;;  %6453 = vst [vmem:[#allocation59_spill] sm:$0xff] %v5080_v29  ;;  %v1090_v39 = vsub.f32 %v6454_v9, %v4630_v25  ;;  %v1180_v38 = vmul.f32 %v4699_v42, %v1171_v44  ;;  %v5088_v58 = vadd.f32 %v1109_v15, %v1047_v37  ;;  %v5097_v29 = vpop.permute.xlu0 %1695 }
 0x230   : > { %2033 = vperm.xlu1 %3534, %v4011_v1   ;;  %v5066_v57 = vpop.permute.xlu1 %1559  ;;  %v1234_v34 = vsub.f32 %v6450_v33, %v4760_v8  ;;  %v1103_v33 = vand.u32 2147483647, %v1095_v16  ;;  %v1108_v17 = vmul.f32 %v4640_v49, %v1099_v12  ;;  %v1182_v30 = vmul.f32 %v4699_v42, %v1173_v61 }
 0x231   : > { %6448 = vst [vmem:[#allocation53_spill] sm:$0xff] %v5066_v57  ;;  %3547 = vset.pattern.permute.xlu0 %v6184_v51  ;;  %v1240_v51 = vand.u32 2147483647, %v1232_v24  ;;  %v1301_v57 = vsub.f32 %v6455_v41, %v4826_v19  ;;  %v1113_v25 = vadd.f32 %v1105_v23, %v4996_v54  ;;  %v1110_v44 = vmul.f32 %v4640_v49, %v1101_v13  ;;  %v6457_v24 = vld [vmem:[#allocation87_spill] sm:$0xff]  ;;  %v6459_v23 = vld [vmem:[#allocation92_spill] sm:$0xff]  ;;  %v6460_v13 = vld [vmem:[#allocation89_spill] sm:$0xff] }
 0x232   : > { %2457 = vperm.xlu0 %3547, %v4013_v2   ;;  %v5102_v15 = vmul.f32 %v4783_v43, %v1237_v62  ;;  %v1242_v16 = vand.u32 2147483647, %v1234_v34  ;;  %v5104_v12 = vadd.f32 %v1111_v10, %v1049_v22  ;;  %v1167_v61 = vand.u32 2147483647, %v1159_v14 }
 0x233   : > { %v1162_v37 = vsub.f32 %v6457_v24, %v4678_v45  ;;  %v1306_v9 = vand.u32 2147483647, %v1298_v27  ;;  %v5109_v41 = vand.u32 2147483647, %v1090_v39  ;;  %v5113_v54 = vmul.f32 %v4783_v43, %v1240_v51 }
 0x234   : > { %2041 = vperm.xlu1 %3534, %v4015_v3   ;;  %v5095_v56 = vpop.permute.xlu1 %1567  ;;  %v1303_v34 = vsub.f32 %v6459_v23, %v4826_v19  ;;  %v1116_v10 = vadd.f32 %v1108_v17, %v5016_v59  ;;  %v1164_v62 = vsub.f32 %v6460_v13, %v4678_v45  ;;  %v1309_v22 = vand.u32 2147483647, %v1301_v57  ;;  %v6461_v59 = vld [vmem:[#allocation97_spill] sm:$0xff] }
 0x235   : > { %6456 = vst [vmem:[#allocation56_spill] sm:$0xff] %v5095_v56  ;;  %6458 = vst [vmem:[#allocation58_spill] sm:$0xff] %v5109_v41  ;;  %v1112_v56 = vmul.f32 %v4640_v49, %v1103_v33  ;;  %v5122_v14 = vrot.slane %v4968_v53, %v4425_v35  ;;  %v5126_v27 = vadd.f32 %v5027_v31, %v1113_v25  ;;  %v1170_v24 = vand.u32 2147483647, %v1162_v37  ;;  %v5143_v31 = vpop.permute.xlu0 %1703  ;;  %v6463_v25 = vld [vmem:[#allocation91_spill] sm:$0xff] }
 0x236   : > { %2469 = vperm.xlu0 %3547, %v4019_v5   ;;  %v1118_v51 = vadd.f32 %v1110_v44, %v5023_v48  ;;  %v5130_v39 = vmul.f32 %v4783_v43, %v1242_v16  ;;  %v1305_v33 = vsub.f32 %v6461_v59, %v4826_v19  ;;  %v1176_v57 = vmul.f32 %v4699_v42, %v1167_v61 }
 0x237   : > { %v5138_v23 = vmul.f32 %v4831_v50, %v1306_v9  ;;  %v5141_v13 = vstv %s5082_s15  ;;  %v1120_v48 = vadd.f32 %v1112_v56, %v5039_v0  ;;  %v1228_v44 = vsub.f32 %v6463_v25, %v4760_v8  ;;  %v6464_v9 = vld [vmem:[#allocation105_spill] sm:$0xff]  ;;  %v6465_v0 = vld [vmem:[#allocation99_spill] sm:$0xff]  ;;  %s3276_s15 = sld [smem:[#allocation6 + $0x1c]] }
 0x238   : > { %2045 = vperm.xlu1 %3534, %v4017_v4   ;;  %v1311_v16 = vand.u32 2147483647, %v1303_v34  ;;  %v5150_v59 = vadd.f32 %v5048_v28, %v1116_v10  ;;  %v1172_v61 = vand.u32 2147483647, %v1164_v62  ;;  %v5153_v37 = vmul.f32 %v4831_v50, %v1309_v22  ;;  %v6466_v28 = vld [vmem:[#allocation112_spill] sm:$0xff] }
 0x239   : > { %v5134_v17 = vpop.permute.xlu1 %1613  ;;  %v1369_v35 = vsub.f32 %v6464_v9, %v4867_v63  ;;  %v5160_v49 = vadd.f32 %v1180_v38, %v1118_v51  ;;  %v1231_v56 = vsub.f32 %v6465_v0, %v4760_v8  ;;  %v1313_v34 = vand.u32 2147483647, %v1305_v33  ;;  %v6468_v9 = vld [vmem:[#allocation103_spill] sm:$0xff] }
 0x23a   : > { %6462 = vst [vmem:[#allocation63_spill] sm:$0xff] %v5134_v17  ;;  %2477 = vperm.xlu0 %3547, %v4023_v7   ;;  %v1372_v10 = vsub.f32 %v6466_v28, %v4867_v63  ;;  %v1184_v22 = vadd.f32 %v1176_v57, %v5054_v36  ;;  %v1179_v25 = vmul.f32 %v4699_v42, %v1170_v24  ;;  %v6469_v17 = vld [vmem:[#allocation114_spill] sm:$0xff]  ;;  %v6189_v51 = vmov 31  }
 0x23b   : > { %v1233_v41 = vsub.f32 %v6468_v9, %v4760_v8  ;;  %v1374_v38 = vsub.f32 %v6469_v17, %v4867_v63  ;;  %v5175_v0 = vadd.f32 %v1182_v30, %v1120_v48  ;;  %v1236_v33 = vand.u32 2147483647, %v1228_v44  ;;  %v5191_v30 = vpop.permute.xlu0 %1711 }
 0x23c   : > { %2053 = vperm.xlu1 %3534, %v4021_v6   ;;  %v5178_v28 = vmul.f32 %v4831_v50, %v1311_v16  ;;  %v1181_v9 = vmul.f32 %v4699_v42, %v1172_v61  ;;  %v1377_v17 = vand.u32 2147483647, %v1369_v35  ;;  %v1239_v48 = vand.u32 2147483647, %v1231_v56 }
 0x23d   : > { %v5166_v62 = vpop.permute.xlu1 %1621  ;;  %v5194_v44 = vmul.f32 %v4831_v50, %v1313_v34  ;;  %v1380_v16 = vand.u32 2147483647, %v1372_v10  ;;  %v5201_v35 = vadd.f32 %v5102_v15, %v1184_v22  ;;  %v1187_v61 = vadd.f32 %v1179_v25, %v5088_v58  ;;  %v6472_v34 = vld [vmem:[#allocation113_spill] sm:$0xff] }
 0x23e   : > { %6467 = vst [vmem:[#allocation60_spill] sm:$0xff] %v5166_v62  ;;  %3548 = vset.pattern.permute.xlu0 %v6189_v51  ;;  %v6470_v62 = vld [vmem:[#allocation110_spill] sm:$0xff]  ;;  %v5188_v51 = vrot.slane %v4968_v53, %v6339_v40  ;;  %v1241_v40 = vand.u32 2147483647, %v1233_v41  ;;  %v1382_v42 = vand.u32 2147483647, %v1374_v38  ;;  %v1245_v45 = vmul.f32 %v4783_v43, %v1236_v33 }
 0x23f   : > { %v1235_v36 = vsub.f32 %v6470_v62, %v4760_v8  ;;  %2523 = vperm.xlu0 %3548, %v4011_v1   ;;  %v1438_v62 = vsub.f32 %v4589_v21, %v4914_v18  ;;  %v1299_v57 = vsub.f32 %v6472_v34, %v4826_v19  ;;  %v1441_v10 = vsub.f32 %v4613_v11, %v4914_v18 }
 0x240   : > { %2061 = vperm.xlu1 %3534, %v6337_v26   ;;  %v1189_v21 = vadd.f32 %v1181_v9, %v5104_v12  ;;  %v5212_v15 = vmul.f32 %v4885_v47, %v1377_v17  ;;  %v1443_v58 = vsub.f32 %v4642_v20, %v4914_v18  ;;  %v5217_v41 = vstv %s5157_s20  ;;  %s3277_s20 = sld [smem:[#allocation6 + $0x1d]] }
 0x241   : > { %v5198_v24 = vpop.permute.xlu1 %1625  ;;  %v1243_v56 = vand.u32 2147483647, %v1235_v36  ;;  %v6473_v22 = vmov 25   ;;  %v1248_v25 = vmul.f32 %v4783_v43, %v1239_v48  ;;  %v1302_v11 = vsub.f32 %v4587_v32, %v4826_v19  ;;  %v5238_v48 = vpop.permute.xlu0 %1757 }
 0x242   : > { %v5226_v38 = vmul.f32 %v4885_v47, %v1380_v16  ;;  %v1446_v12 = vand.u32 2147483647, %v1438_v62  ;;  %v1257_v20 = vadd.f32 %v5113_v54, %v1187_v61  ;;  %v1250_v36 = vmul.f32 %v4783_v43, %v1241_v40  ;;  %6474 = vst [vmem:[#allocation64_spill] sm:$0xff] %v5238_v48  ;;  %v6475_v40 = vld [vmem:[#allocation116_spill] sm:$0xff] }
 0x243   : > { %2535 = vperm.xlu0 %3548, %v4017_v4   ;;  %v5234_v9 = vmul.f32 %v4885_v47, %v1382_v42  ;;  %v1445_v17 = vsub.f32 %v4672_v52, %v4914_v18  ;;  %v1253_v32 = vadd.f32 %v1245_v45, %v5126_v27  ;;  %v1252_v16 = vmul.f32 %v4783_v43, %v1243_v56  ;;  %v6477_v48 = vld [vmem:[#allocation48_spill] sm:$0xff] }
 0x244   : > { %3537 = vset.pattern.permute.xlu1 %v6473_v22  ;;  %v1307_v62 = vand.u32 2147483647, %v1299_v57  ;;  %v1449_v34 = vand.u32 2147483647, %v1441_v10  ;;  %v1259_v54 = vadd.f32 %v5130_v39, %v1189_v21  ;;  %v1304_v61 = vsub.f32 %v6475_v40, %v4826_v19  ;;  %v6476_v22 = vld [vmem:[#allocation28_spill] sm:$0xff]  ;;  %v6479_v10 = vld [vmem:[#allocation117_spill] sm:$0xff] }
 0x245   : > { %2107 = vperm.xlu1 %3537, %v4013_v2   ;;  %v5229_v33 = vpop.permute.xlu1 %1633  ;;  %v1451_v42 = vand.u32 2147483647, %v1443_v58  ;;  %v1509_v8 = vsub.f32 %v6476_v22, %v4988_v46  ;;  %v1256_v52 = vadd.f32 %v1248_v25, %v5150_v59  ;;  %v1310_v2 = vand.u32 2147483647, %v1302_v11  ;;  %v6478_v57 = vld [vmem:[#allocation100_spill] sm:$0xff]  ;;  %v5264_v11 = vpop.permute.xlu0 %1769 }
 0x246   : > { %v5250_v45 = vmul.f32 %v6477_v48, %v1446_v12  ;;  %v5257_v39 = vrot.slane %v4968_v53, %v6478_v57  ;;  %v1258_v56 = vadd.f32 %v1250_v36, %v5160_v49  ;;  %v1368_v21 = vsub.f32 %v6479_v10, %v4867_v63  ;;  %v6480_v59 = vld [vmem:[#allocation32_spill] sm:$0xff]  ;;  %6481 = vst [vmem:[#allocation61_spill] sm:$0xff] %v5264_v11 }
 0x247   : > { %2543 = vperm.xlu0 %3548, %v4021_v6   ;;  %v1453_v58 = vand.u32 2147483647, %v1445_v17  ;;  %v1512_v25 = vsub.f32 %v6480_v59, %v4988_v46  ;;  %v1323_v12 = vadd.f32 %v5138_v23, %v1253_v32  ;;  %v1260_v40 = vadd.f32 %v1252_v16, %v5175_v0  ;;  %v6483_v32 = vld [vmem:[#allocation23_spill] sm:$0xff] }
 0x248   : > { %v1316_v22 = vmul.f32 %v4831_v50, %v1307_v62  ;;  %v5270_v57 = vmul.f32 %v6477_v48, %v1449_v34  ;;  %v1312_v49 = vand.u32 2147483647, %v1304_v61  ;;  %v5276_v36 = vmul.f32 %v6477_v48, %v1451_v42  ;;  %v6484_v62 = vld [vmem:[#allocation27_spill] sm:$0xff] }
 0x249   : > { %2111 = vperm.xlu1 %3537, %v4015_v3   ;;  %v5253_v27 = vpop.permute.xlu1 %1641  ;;  %v1517_v17 = vand.u32 2147483647, %v1509_v8  ;;  %v5279_v10 = vstv %s5220_s3  ;;  %v1326_v23 = vadd.f32 %v5153_v37, %v1256_v52  ;;  %v1319_v0 = vmul.f32 %v4831_v50, %v1310_v2  ;;  %v6485_v52 = vld [vmem:[#allocation25_spill] sm:$0xff]  ;;  %s5830_s3 = sld [smem:[#allocation6 + $0x1f]] }
 0x24a   : > { %6482 = vst [vmem:[#allocation66_spill] sm:$0xff] %v5279_v10  ;;  %v1371_v16 = vsub.f32 %v6483_v32, %v4867_v63  ;;  %v1514_v34 = vsub.f32 %v6484_v62, %v4988_v46  ;;  %v5289_v61 = vadd.f32 %v5178_v28, %v1258_v56  ;;  %v1376_v42 = vand.u32 2147483647, %v1368_v21  ;;  %v6486_v62 = vld [vmem:[#allocation34_spill] sm:$0xff]  ;;  %v6487_v21 = vld [vmem:[#allocation35_spill] sm:$0xff] }
 0x24b   : > { %2551 = vperm.xlu0 %3548, %v6337_v26   ;;  %v5292_v8 = vmul.f32 %v6477_v48, %v1453_v58  ;;  %v1520_v59 = vand.u32 2147483647, %v1512_v25  ;;  %v5297_v2 = vadd.f32 %v5194_v44, %v1260_v40  ;;  %v1324_v37 = vadd.f32 %v1316_v22, %v5201_v35  ;;  %v6488_v25 = vld [vmem:[#allocation37_spill] sm:$0xff]  ;;  %v5312_v40 = vpop.permute.xlu0 %1777 }
 0x24c   : > { %v1373_v32 = vsub.f32 %v6485_v52, %v4867_v63  ;;  %v1578_v19 = vsub.f32 %v6486_v62, %v5052_v55  ;;  %v1321_v28 = vmul.f32 %v4831_v50, %v1312_v49  ;;  %v5306_v56 = vmul.f32 %v5013_v60, %v1517_v17  ;;  %6489 = vst [vmem:[#allocation62_spill] sm:$0xff] %v5312_v40  ;;  %v6490_v62 = vld [vmem:[#allocation101_spill] sm:$0xff]  ;;  %v6491_v50 = vld [vmem:[#allocation30_spill] sm:$0xff] }
 0x24d   : > { %2119 = vperm.xlu1 %3537, %v4019_v5   ;;  %v1581_v58 = vsub.f32 %v6487_v21, %v5052_v55  ;;  %v1583_v44 = vsub.f32 %v6488_v25, %v5052_v55  ;;  %v1327_v35 = vadd.f32 %v1319_v0, %v1257_v20  ;;  %v1379_v22 = vand.u32 2147483647, %v1371_v16  ;;  %v6492_v25 = vld [vmem:[#allocation46_spill] sm:$0xff] }
 0x24e   : > { %v5294_v43 = vpop.permute.xlu1 %1687  ;;  %v1522_v52 = vand.u32 2147483647, %v1514_v34  ;;  %v5317_v49 = vrot.slane %v4968_v53, %v6490_v62  ;;  %v1385_v17 = vmul.f32 %v4885_v47, %v1376_v42  ;;  %v1375_v21 = vsub.f32 %v6491_v50, %v4867_v63  ;;  %v6494_v62 = vld [vmem:[#allocation108_spill] sm:$0xff] }
 0x24f   : > { %v5323_v5 = vmul.f32 %v5013_v60, %v1520_v59  ;;  %v1585_v40 = vsub.f32 %v6492_v25, %v5052_v55  ;;  %v1394_v0 = vadd.f32 %v5212_v15, %v1324_v37  ;;  %v1381_v16 = vand.u32 2147483647, %v1373_v32 }
 0x250   : > { %v1586_v34 = vand.u32 2147483647, %v1578_v19  ;;  %v1329_v42 = vadd.f32 %v1321_v28, %v1259_v54  ;;  %v1439_v50 = vsub.f32 %v6494_v62, %v4914_v18  ;;  %v1589_v63 = vand.u32 2147483647, %v1581_v58  ;;  %v6497_v54 = vld [vmem:[#allocation111_spill] sm:$0xff] }
 0x251   : > { %2127 = vperm.xlu1 %3537, %v4023_v7   ;;  %v5331_v7 = vstv %s5272_s22  ;;  %v1591_v59 = vand.u32 2147483647, %v1583_v44  ;;  %v1397_v11 = vadd.f32 %v5226_v38, %v1327_v35  ;;  %v1388_v25 = vmul.f32 %v4885_v47, %v1379_v22  ;;  %v5350_v38 = vpop.permute.xlu0 %1823  ;;  %v6499_v35 = vld [vmem:[#allocation59_spill] sm:$0xff]  ;;  %s5833_s22 = sld [smem:[#allocation6 + $0x1e]] }
 0x252   : > { %v5327_v20 = vpop.permute.xlu1 %1691  ;;  %v5342_v15 = vmul.f32 %v5013_v60, %v1522_v52  ;;  %v6496_v19 = vmov 26   ;;  %v1393_v37 = vadd.f32 %v1385_v17, %v1323_v12  ;;  %v1383_v32 = vand.u32 2147483647, %v1375_v21  ;;  %6498 = vst [vmem:[#allocation65_spill] sm:$0xff] %v5350_v38  ;;  %v6501_v52 = vld [vmem:[#allocation44_spill] sm:$0xff]  ;;  %v6503_v38 = vld [vmem:[#allocation50_spill] sm:$0xff] }
 0x253   : > { %6493 = vst [vmem:[#allocation68_spill] sm:$0xff] %v5327_v20  ;;  %v6495_v20 = vld [vmem:[#allocation33_spill] sm:$0xff]  ;;  %v1511_v28 = vsub.f32 %v6497_v54, %v4988_v46  ;;  %v1593_v62 = vand.u32 2147483647, %v1585_v40  ;;  %v1390_v44 = vmul.f32 %v4885_v47, %v1381_v16  ;;  %v5354_v22 = vmul.f32 %v6499_v35, %v1586_v34  ;;  %v6502_v12 = vld [vmem:[#allocation52_spill] sm:$0xff] }
 0x254   : > { %v1442_v10 = vsub.f32 %v6495_v20, %v4914_v18  ;;  %v1649_v20 = vsub.f32 %v6501_v52, %v5122_v14  ;;  %v1652_v17 = vsub.f32 %v6502_v12, %v5122_v14  ;;  %v5361_v21 = vadd.f32 %v5234_v9, %v1329_v42  ;;  %v6504_v52 = vld [vmem:[#allocation102_spill] sm:$0xff] }
 0x255   : > { %3538 = vset.pattern.permute.xlu1 %v6496_v19  ;;  %6500 = vst [vmem:[#allocation67_spill] sm:$0xff] %v5354_v22  ;;  %v1447_v40 = vand.u32 2147483647, %v1439_v50  ;;  %v5364_v19 = vmul.f32 %v6499_v35, %v1589_v63  ;;  %v5367_v54 = vmul.f32 %v6499_v35, %v1591_v59  ;;  %v1396_v16 = vadd.f32 %v1388_v25, %v1326_v23 }
 0x256   : > { %2173 = vperm.xlu1 %3538, %v4011_v1   ;;  %v5348_v58 = vpop.permute.xlu1 %1699  ;;  %v1450_v34 = vand.u32 2147483647, %v1442_v10  ;;  %v1513_v22 = vsub.f32 %v6503_v38, %v4988_v46  ;;  %v5373_v1 = vrot.slane %v4968_v53, %v6504_v52  ;;  %v5376_v9 = vadd.f32 %v5250_v45, %v1393_v37  ;;  %v1836_v10 = vpop.permute.xlu0 %1835  ;;  %v6505_v37 = vld [vmem:[#allocation51_spill] sm:$0xff] }
 0x257   : > { %v1392_v42 = vmul.f32 %v4885_v47, %v1383_v32  ;;  %v1519_v63 = vand.u32 2147483647, %v1511_v28  ;;  %v5380_v50 = vmul.f32 %v6499_v35, %v1593_v62  ;;  %v1398_v59 = vadd.f32 %v1390_v44, %v5289_v61  ;;  %v6506_v44 = vld [vmem:[#allocation45_spill] sm:$0xff] }
 0x258   : > { %v1657_v25 = vand.u32 2147483647, %v1649_v20  ;;  %v1660_v38 = vand.u32 2147483647, %v1652_v17  ;;  %v5387_v12 = vstv %s5333_s26  ;;  %v1456_v45 = vmul.f32 %v6477_v48, %v1447_v40  ;;  %v6507_v40 = vld [vmem:[#allocation109_spill] sm:$0xff] }
 0x259   : > { %v1654_v32 = vsub.f32 %v6505_v37, %v5122_v14  ;;  %v1651_v28 = vsub.f32 %v5198_v24, %v5122_v14  ;;  %v1721_v62 = vsub.f32 %v5097_v29, %v5188_v51  ;;  %v1466_v52 = vadd.f32 %v5270_v57, %v1396_v16 }
 0x25a   : > { %2181 = vperm.xlu1 %3538, %v4015_v3   ;;  %v5383_v23 = vpop.permute.xlu1 %1707  ;;  %v1459_v47 = vmul.f32 %v6477_v48, %v1450_v34  ;;  %v1521_v61 = vand.u32 2147483647, %v1513_v22  ;;  %v1515_v20 = vsub.f32 %v6506_v44, %v4988_v46  ;;  %v1400_v17 = vadd.f32 %v1392_v42, %v5297_v2  ;;  %v1844_v44 = vpop.permute.xlu0 %1843 }
 0x25b   : > { %v1444_v53 = vsub.f32 %v6507_v40, %v4914_v18  ;;  %v1528_v37 = vmul.f32 %v5013_v60, %v1519_v63  ;;  %v1723_v24 = vsub.f32 %v5143_v31, %v5188_v51  ;;  %v1468_v29 = vadd.f32 %v5276_v36, %v1398_v59 }
 0x25c   : > { %v5409_v57 = vmul.f32 %v5141_v13, %v1657_v25  ;;  %v5412_v22 = vmul.f32 %v5141_v13, %v1660_v38  ;;  %v1653_v2 = vsub.f32 %v5229_v33, %v5122_v14  ;;  %v1464_v34 = vadd.f32 %v1456_v45, %v1394_v0  ;;  %v6509_v25 = vld [vmem:[#allocation49_spill] sm:$0xff] }
 0x25d   : > { %v5418_v42 = vand.u32 2147483647, %v1654_v32  ;;  %v1659_v63 = vand.u32 2147483647, %v1651_v28  ;;  %v1729_v31 = vand.u32 2147483647, %v1721_v62  ;;  %v1467_v40 = vadd.f32 %v1459_v47, %v1397_v11 }
 0x25e   : > { %2185 = vperm.xlu1 %3538, %v4017_v4   ;;  %6508 = vst [vmem:[#allocation69_spill] sm:$0xff] %v5412_v22  ;;  %v1530_v36 = vmul.f32 %v5013_v60, %v1521_v61  ;;  %v1523_v59 = vand.u32 2147483647, %v1515_v20  ;;  %v1579_v18 = vsub.f32 %v6509_v25, %v5052_v55  ;;  %v1470_v38 = vadd.f32 %v5292_v8, %v1400_v17  ;;  %v6510_v0 = vld [vmem:[#allocation57_spill] sm:$0xff] }
 0x25f   : > { %v5416_v16 = vpop.permute.xlu1 %1753  ;;  %v1452_v4 = vand.u32 2147483647, %v1444_v53  ;;  %v1536_v22 = vadd.f32 %v1528_v37, %v1466_v52  ;;  %v1731_v33 = vand.u32 2147483647, %v1723_v24  ;;  %v1661_v32 = vand.u32 2147483647, %v1653_v2  ;;  %v1852_v2 = vpop.permute.xlu0 %1851 }
 0x260   : > { %v1725_v47 = vsub.f32 %v5191_v30, %v5188_v51  ;;  %v1861_v28 = vsub.f32 %v1836_v10, %v5317_v49  ;;  %v1534_v62 = vadd.f32 %v5306_v56, %v1464_v34  ;;  %v1668_v8 = vmul.f32 %v5141_v13, %v1659_v63 }
 0x261   : > { %v1738_v53 = vmul.f32 %v5217_v41, %v1729_v31  ;;  %v1655_v52 = vsub.f32 %v5253_v27, %v5122_v14  ;;  %v5438_v61 = vadd.f32 %v5323_v5, %v1467_v40  ;;  %v1538_v20 = vadd.f32 %v1530_v36, %v1468_v29  ;;  %v6511_v27 = vld [vmem:[#allocation36_spill] sm:$0xff] }
 0x262   : > { %2193 = vperm.xlu1 %3538, %v4021_v6   ;;  %v1532_v17 = vmul.f32 %v5013_v60, %v1523_v59  ;;  %v1587_v30 = vand.u32 2147483647, %v1579_v18  ;;  %v1461_v37 = vmul.f32 %v6477_v48, %v1452_v4  ;;  %v1606_v10 = vadd.f32 %v5364_v19, %v1536_v22  ;;  %v6512_v4 = vld [vmem:[#allocation64_spill] sm:$0xff] }
 0x263   : > { %v5429_v11 = vpop.permute.xlu1 %1761  ;;  %v1740_v56 = vmul.f32 %v5217_v41, %v1731_v33  ;;  %v1863_v24 = vsub.f32 %v1844_v44, %v5317_v49  ;;  %v1508_v34 = vsub.f32 %v6511_v27, %v4988_v46  ;;  %v1670_v5 = vmul.f32 %v5141_v13, %v1661_v32  ;;  %v6513_v32 = vld [vmem:[#allocation53_spill] sm:$0xff] }
 0x264   : > { %v1733_v29 = vand.u32 2147483647, %v1725_v47  ;;  %v1869_v31 = vand.u32 2147483647, %v1861_v28  ;;  %v1676_v18 = vadd.f32 %v1668_v8, %v1606_v10  ;;  %v1663_v40 = vand.u32 2147483647, %v1655_v52 }
 0x265   : > { %v1789_v19 = vsub.f32 %v6512_v4, %v5257_v39  ;;  %v1608_v36 = vadd.f32 %v5367_v54, %v1538_v20  ;;  %v1540_v59 = vadd.f32 %v1532_v17, %v1470_v38  ;;  %v1596_v44 = vmul.f32 %v6499_v35, %v1587_v30  ;;  %v6515_v38 = vld [vmem:[#allocation17_spill] sm:$0xff]  ;;  %v6516_v30 = vld [vmem:[#allocation66_spill] sm:$0xff]  ;;  %v1898_v4 = vpop.permute.xlu0 %1897 }
 0x266   : > { %2201 = vperm.xlu1 %3538, %v6337_v26   ;;  %v1719_v25 = vsub.f32 %v5294_v43, %v5188_v51  ;;  %v1469_v33 = vadd.f32 %v1461_v37, %v5361_v21  ;;  %v1582_v47 = vsub.f32 %v6513_v32, %v5052_v55  ;;  %v6514_v8 = vmov 27  }
 0x267   : > { %v1766_v63 = vpop.permute.xlu1 %1765  ;;  %v1871_v52 = vand.u32 2147483647, %v1863_v24  ;;  %v1678_v10 = vadd.f32 %v1670_v5, %v1608_v36  ;;  %v1742_v27 = vmul.f32 %v5217_v41, %v1733_v29  ;;  %v1878_v54 = vmul.f32 %v5331_v7, %v1869_v31 }
 0x268   : > { %v1791_v22 = vsub.f32 %v1766_v63, %v5257_v39  ;;  %v1865_v17 = vsub.f32 %v1852_v2, %v5317_v49  ;;  %v1746_v43 = vadd.f32 %v1738_v53, %v1676_v18  ;;  %v1672_v21 = vmul.f32 %v5141_v13, %v1663_v40  ;;  %v6517_v2 = vld [vmem:[#allocation56_spill] sm:$0xff] }
 0x269   : > { %v1610_v24 = vadd.f32 %v5380_v50, %v1540_v59  ;;  %v1604_v5 = vadd.f32 %v1596_v44, %v1534_v62  ;;  %v1797_v29 = vand.u32 2147483647, %v1789_v19  ;;  %v1590_v36 = vand.u32 2147483647, %v1582_v47  ;;  %v1910_v59 = vpop.permute.xlu0 %1909 }
 0x26a   : > { %v1799_v28 = vand.u32 2147483647, %v1791_v22  ;;  %3541 = vset.pattern.permute.xlu1 %v6514_v8  ;;  %v1727_v22 = vand.u32 2147483647, %v1719_v25  ;;  %v1880_v8 = vmul.f32 %v5331_v7, %v1871_v52  ;;  %v1584_v53 = vsub.f32 %v6517_v2, %v5052_v55 }
 0x26b   : > { %2247 = vperm.xlu1 %3541, %v6515_v38   ;;  %v1774_v20 = vpop.permute.xlu1 %1773  ;;  %v1748_v18 = vadd.f32 %v1740_v56, %v1678_v10  ;;  %v1680_v45 = vadd.f32 %v1672_v21, %v1610_v24  ;;  %v1516_v44 = vand.u32 2147483647, %v1508_v34  ;;  %v1806_v47 = vmul.f32 %v6516_v30, %v1797_v29  ;;  %v6518_v10 = vld [vmem:[#allocation61_spill] sm:$0xff]  ;;  %v6519_v34 = vld [vmem:[#allocation19_spill] sm:$0xff] }
 0x26c   : > { %v1808_v37 = vmul.f32 %v6516_v30, %v1799_v28  ;;  %v1793_v63 = vsub.f32 %v1774_v20, %v5257_v39  ;;  %v1873_v28 = vand.u32 2147483647, %v1865_v17  ;;  %v1929_v20 = vsub.f32 %v1898_v4, %v5373_v1  ;;  %v6520_v24 = vld [vmem:[#allocation63_spill] sm:$0xff] }
 0x26d   : > { %v1736_v25 = vmul.f32 %v5217_v41, %v1727_v22  ;;  %v1722_v56 = vsub.f32 %v5348_v58, %v5188_v51  ;;  %v1674_v52 = vadd.f32 %v5409_v57, %v1604_v5  ;;  %v1792_v17 = vsub.f32 %v6518_v10, %v5257_v39 }
 0x26e   : > { %v1816_v31 = vadd.f32 %v1808_v37, %v1746_v43  ;;  %v1801_v32 = vand.u32 2147483647, %v1793_v63  ;;  %v1599_v21 = vmul.f32 %v6499_v35, %v1590_v36  ;;  %v1592_v37 = vand.u32 2147483647, %v1584_v53 }
 0x26f   : > { %2251 = vperm.xlu1 %3541, %v4015_v3   ;;  %v1782_v40 = vpop.permute.xlu1 %1781  ;;  %v1882_v63 = vmul.f32 %v5331_v7, %v1873_v28  ;;  %v1937_v4 = vand.u32 2147483647, %v1929_v20  ;;  %v1648_v22 = vsub.f32 %v6520_v24, %v5122_v14  ;;  %v1750_v29 = vadd.f32 %v1742_v27, %v1680_v45  ;;  %v1918_v20 = vpop.permute.xlu0 %1917 }
 0x270   : > { %v5473_v50 = vadd.f32 %v1878_v54, %v1816_v31  ;;  %v1810_v62 = vmul.f32 %v6516_v30, %v1801_v32  ;;  %v1795_v19 = vsub.f32 %v1782_v40, %v5257_v39  ;;  %v1744_v31 = vadd.f32 %v1736_v25, %v1674_v52  ;;  %v6522_v25 = vld [vmem:[#allocation20_spill] sm:$0xff] }
 0x271   : > { %v1730_v32 = vand.u32 2147483647, %v1722_v56  ;;  %v1724_v36 = vsub.f32 %v5383_v23, %v5188_v51  ;;  %v1539_v53 = vadd.f32 %v5342_v15, %v1469_v33  ;;  %v1800_v40 = vand.u32 2147483647, %v1792_v17 }
 0x272   : > { %v1818_v54 = vadd.f32 %v1810_v62, %v1748_v18  ;;  %v1803_v43 = vand.u32 2147483647, %v1795_v19  ;;  %v1525_v18 = vmul.f32 %v5013_v60, %v1516_v44  ;;  %v1607_v45 = vadd.f32 %v1599_v21, %v5438_v61 }
 0x273   : > { %2259 = vperm.xlu1 %3541, %v6519_v34   ;;  %v1601_v27 = vmul.f32 %v6499_v35, %v1592_v37  ;;  %v1656_v23 = vand.u32 2147483647, %v1648_v22  ;;  %v1946_v15 = vmul.f32 %v5387_v12, %v1937_v4  ;;  %v1932_v44 = vsub.f32 %v1910_v59, %v5373_v1  ;;  %v6524_v4 = vld [vmem:[#allocation69_spill] sm:$0xff] }
 0x274   : > { %v5489_v58 = vadd.f32 %v1880_v8, %v1818_v54  ;;  %v1812_v57 = vmul.f32 %v6516_v30, %v1803_v43  ;;  %v1828_v5 = vpop.permute.xlu1 %1827  ;;  %v6521_v8 = vld [vmem:[#allocation62_spill] sm:$0xff]  ;;  %v1814_v52 = vadd.f32 %v1806_v47, %v1744_v31  ;;  %v1739_v61 = vmul.f32 %v5217_v41, %v1730_v32  ;;  %v1964_v32 = vpop.permute.xlu0 %1963 }
 0x275   : > { %v1859_v2 = vsub.f32 %v1828_v5, %v5317_v49  ;;  %v1794_v62 = vsub.f32 %v6521_v8, %v5257_v39  ;;  %v1732_v10 = vand.u32 2147483647, %v1724_v36  ;;  %v1533_v54 = vadd.f32 %v1525_v18, %v5376_v9  ;;  %v6526_v5 = vld [vmem:[#allocation16_spill] sm:$0xff]  ;;  %v6527_v18 = vld [vmem:[#allocation67_spill] sm:$0xff]  ;;  %v6529_v8 = vld [vmem:[#allocation106_spill] sm:$0xff] }
 0x276   : > { %v1820_v28 = vadd.f32 %v1812_v57, %v1750_v29  ;;  %v1671_v43 = vmul.f32 %v5141_v13, %v5418_v42  ;;  %v6523_v21 = vsub.f32 %v6510_v0, %v5188_v51  ;;  %v1677_v59 = vadd.f32 %v6524_v4, %v1607_v45  ;;  %v6528_v45 = vld [vmem:[#allocation65_spill] sm:$0xff] }
 0x277   : > { %v1867_v19 = vand.u32 2147483647, %v1859_v2  ;;  %2267 = vperm.xlu1 %3541, %v6522_v25   ;;  %v1609_v47 = vadd.f32 %v1601_v27, %v1539_v53  ;;  %v1809_v24 = vmul.f32 %v6516_v30, %v1800_v40  ;;  %v6525_v29 = vmov 28  }
 0x278   : > { %v5502_v56 = vadd.f32 %v1882_v63, %v1820_v28  ;;  %v5505_v33 = vpop.permute.xlu1 %1831  ;;  %v1726_v37 = vand.u32 2147483647, %v6523_v21  ;;  %v1788_v63 = vsub.f32 %v5416_v16, %v5257_v39  ;;  %v1665_v9 = vmul.f32 %v5141_v13, %v1656_v23  ;;  %v6531_v23 = vld [vmem:[#allocation26_spill] sm:$0xff]  ;;  %v1976_v4 = vpop.permute.xlu0 %1975 }
 0x279   : > { %v1876_v17 = vmul.f32 %v5331_v7, %v1867_v19  ;;  %v1802_v57 = vand.u32 2147483647, %v1794_v62  ;;  %v1940_v31 = vand.u32 2147483647, %v1932_v44  ;;  %v1934_v0 = vsub.f32 %v1918_v20, %v5373_v1  ;;  %v6530_v62 = vld [vmem:[#allocation43_spill] sm:$0xff]  ;;  %v6532_v20 = vld [vmem:[#allocation94_spill] sm:$0xff] }
 0x27a   : > { %v1747_v36 = vadd.f32 %v1739_v61, %v1677_v59  ;;  %v1741_v16 = vmul.f32 %v5217_v41, %v1732_v10  ;;  %v1603_v40 = vadd.f32 %v6527_v18, %v1533_v54  ;;  %v1796_v28 = vand.u32 2147483647, %v1788_v63  ;;  %v6536_v18 = vld [vmem:[#allocation22_spill] sm:$0xff] }
 0x27b   : > { %v1884_v22 = vadd.f32 %v1876_v17, %v1814_v52  ;;  %3542 = vset.pattern.permute.xlu1 %v6525_v29  ;;  %v1858_v27 = vsub.f32 %v6528_v45, %v5317_v49  ;;  %v5533_v19 = vrot.slane %v6530_v62, %v6529_v8  ;;  %v1230_v44 = vsub.f32 %v6532_v20, %v6531_v23  ;;  %v6539_v62 = vld [vmem:[#allocation115_spill] sm:$0xff]  ;;  %v6540_v23 = vld [vmem:[#allocation58_spill] sm:$0xff] }
 0x27c   : > { %2313 = vperm.xlu1 %3542, %v6526_v5   ;;  %v1840_v42 = vpop.permute.xlu1 %1839  ;;  %v1679_v52 = vadd.f32 %v1671_v43, %v1609_v47  ;;  %v1735_v61 = vmul.f32 %v5217_v41, %v1726_v37  ;;  %v1673_v10 = vadd.f32 %v1665_v9, %v1603_v40  ;;  %v1811_v17 = vmul.f32 %v6516_v30, %v1802_v57  ;;  %v6533_v37 = vld [vmem:[#allocation47_spill] sm:$0xff]  ;;  %v6534_v47 = vld [vmem:[#allocation54_spill] sm:$0xff] }
 0x27d   : > { %v5525_v2 = vadd.f32 %v1946_v15, %v1884_v22  ;;  %v1862_v53 = vsub.f32 %v1840_v42, %v5317_v49  ;;  %v1949_v54 = vmul.f32 %v5387_v12, %v1940_v31  ;;  %v1942_v63 = vand.u32 2147483647, %v1934_v0  ;;  %v6535_v31 = vld [vmem:[#allocation86_spill] sm:$0xff] }
 0x27e   : > { %v1817_v59 = vadd.f32 %v1809_v24, %v1747_v36  ;;  %v1749_v22 = vadd.f32 %v1741_v16, %v1679_v52  ;;  %v1045_v42 = vadd.f32 %v6534_v47, %v6533_v37  ;;  %v1805_v9 = vmul.f32 %v6516_v30, %v1796_v28  ;;  %v6538_v0 = vld [vmem:[#allocation38_spill] sm:$0xff]  ;;  %v6543_v37 = vld [vmem:[#allocation104_spill] sm:$0xff] }
 0x27f   : > { %v1870_v15 = vand.u32 2147483647, %v1862_v53  ;;  %v1866_v53 = vand.u32 2147483647, %v1858_v27  ;;  %v1998_v57 = vsub.f32 %v1964_v32, %v5533_v19  ;;  %v6537_v40 = vsub.f32 %v6535_v31, %v6536_v18  ;;  %v6541_v20 = vld [vmem:[#allocation118_spill] sm:$0xff] }
 0x280   : > { %2321 = vperm.xlu1 %3542, %v4015_v3   ;;  %v1848_v21 = vpop.permute.xlu1 %1847  ;;  %v1300_v24 = vsub.f32 %v6539_v62, %v6538_v0  ;;  %v1107_v52 = vmul.f32 %v6541_v20, %v6540_v23  ;;  %v1743_v28 = vadd.f32 %v1735_v61, %v1673_v10  ;;  %v6544_v27 = vld [vmem:[#allocation18_spill] sm:$0xff]  ;;  %v1819_v32 = vadd.f32 %v1811_v17, %v1749_v22  ;;  %v1984_v0 = vpop.permute.xlu0 %1983  ;;  %v6545_v62 = vld [vmem:[#allocation24_spill] sm:$0xff]  ;;  %v6546_v17 = vld [vmem:[#allocation41_spill] sm:$0xff] }
 0x281   : > { %v1879_v29 = vmul.f32 %v5331_v7, %v1870_v15  ;;  %v1864_v43 = vsub.f32 %v1848_v21, %v5317_v49  ;;  %v1168_v45 = vand.u32 2147483647, %v6537_v40  ;;  %v1238_v15 = vand.u32 2147483647, %v1230_v44  ;;  %v6542_v21 = vld [vmem:[#allocation107_spill] sm:$0xff] }
 0x282   : > { %v1370_v47 = vsub.f32 %v6543_v37, %v6542_v21  ;;  %v1951_v18 = vmul.f32 %v5387_v12, %v1942_v63  ;;  %v2006_v40 = vand.u32 2147483647, %v1998_v57  ;;  %v1308_v61 = vand.u32 2147483647, %v1300_v24 }
 0x283   : > { %v1887_v36 = vadd.f32 %v1879_v29, %v1817_v59  ;;  %v1872_v16 = vand.u32 2147483647, %v1864_v43  ;;  %v1813_v29 = vadd.f32 %v1805_v9, %v1743_v28  ;;  %v1875_v43 = vmul.f32 %v5331_v7, %v1866_v53  ;;  %v6548_v9 = vld [vmem:[#allocation29_spill] sm:$0xff] }
 0x284   : > { %2325 = vperm.xlu1 %3542, %v6544_v27   ;;  %v1177_v23 = vmul.f32 %v6545_v62, %v1168_v45  ;;  %v5567_v20 = vstv %s5538_s28  ;;  %v1115_v63 = vadd.f32 %v1107_v52, %v1045_v42  ;;  %v1378_v53 = vand.u32 2147483647, %v1370_v47  ;;  %v6552_v62 = vld [vmem:[#allocation39_spill] sm:$0xff] }
 0x285   : > { %v5559_v8 = vadd.f32 %v1949_v54, %v1887_v36  ;;  %v1881_v31 = vmul.f32 %v5331_v7, %v1872_v16  ;;  %v1894_v59 = vpop.permute.xlu1 %1893  ;;  %v6547_v54 = vld [vmem:[#allocation31_spill] sm:$0xff]  ;;  %v1247_v16 = vmul.f32 %v6548_v9, %v1238_v15  ;;  %v1883_v37 = vadd.f32 %v1875_v43, %v1813_v29  ;;  %v1992_v29 = vpop.permute.xlu0 %1991 }
 0x286   : > { %v1928_v44 = vsub.f32 %v1894_v59, %v5373_v1  ;;  %v1440_v22 = vsub.f32 %v6547_v54, %v6546_v17  ;;  %v2015_v24 = vmul.f32 %v5567_v20, %v2006_v40  ;;  %v2001_v28 = vsub.f32 %v1976_v4, %v5533_v19  ;;  %v6551_v15 = vld [vmem:[#allocation55_spill] sm:$0xff] }
 0x287   : > { %v1889_v10 = vadd.f32 %v1881_v31, %v1819_v32  ;;  %v1185_v32 = vadd.f32 %v1177_v23, %v1115_v63  ;;  %v6549_v31 = vld [vmem:[#allocation40_spill] sm:$0xff]  ;;  %v1580_v47 = vsub.f32 %v6551_v15, %v5052_v55  ;;  %v2003_v4 = vsub.f32 %v1984_v0, %v5533_v19 }
 0x288   : > { %v1936_v36 = vand.u32 2147483647, %v1928_v44  ;;  %2333 = vperm.xlu1 %3542, %v4021_v6   ;;  %v1317_v59 = vmul.f32 %v6549_v31, %v1308_v61  ;;  %v6550_v44 = vld [vmem:[#allocation42_spill] sm:$0xff]  ;;  %v1448_v52 = vand.u32 2147483647, %v1440_v22  ;;  %v6553_v22 = vld [vmem:[#allocation60_spill] sm:$0xff]  ;;  %v1790_v15 = vsub.f32 %v5429_v11, %v5257_v39 }
 0x289   : > { %v5573_v21 = vadd.f32 %v1951_v18, %v1889_v10  ;;  %v5575_v57 = vpop.permute.xlu1 %1901  ;;  %v1510_v42 = vsub.f32 %v6550_v44, %v4988_v46  ;;  %v1255_v43 = vadd.f32 %v1247_v16, %v1185_v32  ;;  %v1387_v10 = vmul.f32 %v6552_v62, %v1378_v53  ;;  %v6556_v44 = vld [vmem:[#allocation93_spill] sm:$0xff] }
 0x28a   : > { %v1945_v45 = vmul.f32 %v5387_v12, %v1936_v36  ;;  %v2009_v17 = vand.u32 2147483647, %v2001_v28  ;;  %v1650_v55 = vsub.f32 %v6553_v22, %v5122_v14  ;;  %v5596_v36 = vld [vmem:[%s6136_s2 + $0x18] sm:$0xff]  ;;  %v1457_v63 = vmul.f32 %v6477_v48, %v1448_v52 }
 0x28b   : > { %v1325_v46 = vadd.f32 %v1317_v59, %v1255_v43  ;;  %v1518_v54 = vand.u32 2147483647, %v1510_v42  ;;  %v1588_v9 = vand.u32 2147483647, %v1580_v47  ;;  %v6554_v0 = vmov 29   ;;  %v2038_v59 = vpop.permute.xlu0 %2037 }
 0x28c   : > { %v1953_v18 = vadd.f32 %v1945_v45, %v1883_v37  ;;  %2341 = vperm.xlu1 %3542, %v6337_v26   ;;  %v6555_v37 = vld [vmem:[#allocation68_spill] sm:$0xff]  ;;  %v2011_v28 = vand.u32 2147483647, %v2003_v4  ;;  %v2005_v14 = vsub.f32 %v1992_v29, %v5533_v19  ;;  %v2018_v48 = vmul.f32 %v5567_v20, %v2009_v17 }
 0x28d   : > { %v1906_v40 = vpop.permute.xlu1 %1905  ;;  %v1395_v53 = vadd.f32 %v1387_v10, %v1325_v46  ;;  %v1720_v45 = vsub.f32 %v6555_v37, %v5188_v51  ;;  %v5611_v42 = vrot.slane %v5596_v36, %v6556_v44  ;;  %v1527_v51 = vmul.f32 %v5013_v60, %v1518_v54 }
 0x28e   : > { %v5588_v23 = vadd.f32 %v2015_v24, %v1953_v18  ;;  %v1931_v61 = vsub.f32 %v1906_v40, %v5373_v1  ;;  %v1658_v52 = vand.u32 2147483647, %v1650_v55  ;;  %v1597_v18 = vmul.f32 %v6499_v35, %v1588_v9 }
 0x28f   : > { %v1465_v47 = vadd.f32 %v1457_v63, %v1395_v53  ;;  %v1728_v62 = vand.u32 2147483647, %v1720_v45  ;;  %v1860_v10 = vsub.f32 %v5505_v33, %v5317_v49  ;;  %v2020_v40 = vmul.f32 %v5567_v20, %v2011_v28 }
 0x290   : > { %v1939_v16 = vand.u32 2147483647, %v1931_v61  ;;  %3545 = vset.pattern.permute.xlu1 %v6554_v0  ;;  %v2013_v60 = vand.u32 2147483647, %v2005_v14  ;;  %v2069_v11 = vsub.f32 %v2038_v59, %v5611_v42  ;;  %v1667_v46 = vmul.f32 %v5141_v13, %v1658_v52 }
 0x291   : > { %2387 = vperm.xlu1 %3545, %v6515_v38   ;;  %v1914_v24 = vpop.permute.xlu1 %1913  ;;  %v1535_v17 = vadd.f32 %v1527_v51, %v1465_v47  ;;  %v1798_v49 = vand.u32 2147483647, %v1790_v15  ;;  %v1930_v33 = vsub.f32 %v5575_v57, %v5373_v1  ;;  %v1737_v63 = vmul.f32 %v5217_v41, %v1728_v62 }
 0x292   : > { %v1948_v32 = vmul.f32 %v5387_v12, %v1939_v16  ;;  %v1933_v31 = vsub.f32 %v1914_v24, %v5373_v1  ;;  %v1868_v9 = vand.u32 2147483647, %v1860_v10  ;;  %v5634_v16 = vstv %s5604_s13 }
 0x293   : > { %v1605_v55 = vadd.f32 %v1597_v18, %v1535_v17  ;;  %v2022_v13 = vmul.f32 %v5567_v20, %v2013_v60  ;;  %v2077_v45 = vand.u32 2147483647, %v2069_v11  ;;  %v1938_v57 = vand.u32 2147483647, %v1930_v33 }
 0x294   : > { %v1956_v29 = vadd.f32 %v1948_v32, %v5473_v50  ;;  %v1941_v43 = vand.u32 2147483647, %v1933_v31  ;;  %v2050_v50 = vpop.permute.xlu0 %2049  ;;  %v1877_v32 = vmul.f32 %v5331_v7, %v1868_v9 }
 0x295   : > { %2391 = vperm.xlu1 %3545, %v4015_v3   ;;  %v1922_v4 = vpop.permute.xlu1 %1921  ;;  %v2086_v59 = vmul.f32 %v5634_v16, %v2077_v45  ;;  %v2072_v51 = vsub.f32 %v2050_v50, %v5611_v42  ;;  %v1947_v52 = vmul.f32 %v5387_v12, %v1938_v57  ;;  %v5677_v57 = vstv %s3273_s21 }
 0x296   : > { %v5622_v61 = vadd.f32 %v2018_v48, %v1956_v29  ;;  %v1950_v39 = vmul.f32 %v5387_v12, %v1941_v43  ;;  %v1935_v35 = vsub.f32 %v1922_v4, %v5373_v1  ;;  %v1675_v1 = vadd.f32 %v1667_v46, %v1605_v55 }
 0x297   : > { %v6557_v29 = vmov 30   ;;  %v2080_v62 = vand.u32 2147483647, %v2072_v51 }
 0x298   : > { %v1958_v54 = vadd.f32 %v1950_v39, %v5489_v58  ;;  %v1943_v22 = vand.u32 2147483647, %v1935_v35  ;;  %v1807_v58 = vmul.f32 %v6516_v30, %v1798_v49  ;;  %v2058_v28 = vpop.permute.xlu0 %2057  ;;  %v1745_v14 = vadd.f32 %v1737_v63, %v1675_v1  ;;  %v6558_v35 = vld [vmem:[#allocation95_spill] sm:$0xff] }
 0x299   : > { %2399 = vperm.xlu1 %3545, %v6519_v34   ;;  %v2074_v10 = vsub.f32 %v2058_v28, %v5611_v42  ;;  %v2089_v49 = vmul.f32 %v5634_v16, %v2080_v62 }
 0x29a   : > { %v5636_v0 = vadd.f32 %v2020_v40, %v1958_v54  ;;  %v1952_v53 = vmul.f32 %v5387_v12, %v1943_v22  ;;  %v1968_v37 = vpop.permute.xlu1 %1967  ;;  %v1815_v30 = vadd.f32 %v1807_v58, %v1745_v14 }
 0x29b   : > { %v1999_v24 = vsub.f32 %v1968_v37, %v5533_v19  ;;  %v2082_v54 = vand.u32 2147483647, %v2074_v10  ;;  %v6560_v10 = vld [vmem:[#allocation96_spill] sm:$0xff] }
 0x29c   : > { %v1960_v41 = vadd.f32 %v1952_v53, %v5502_v56  ;;  %v1885_v47 = vadd.f32 %v1877_v32, %v1815_v30  ;;  %v2104_v40 = vpop.permute.xlu0 %2103 }
 0x29d   : > { %v2007_v48 = vand.u32 2147483647, %v1999_v24  ;;  %2407 = vperm.xlu1 %3545, %v6522_v25  }
 0x29e   : > { %v5645_v31 = vadd.f32 %v2022_v13, %v1960_v41  ;;  %v1972_v44 = vpop.permute.xlu1 %1971  ;;  %v1955_v4 = vadd.f32 %v1947_v52, %v1885_v47  ;;  %v2091_v13 = vmul.f32 %v5634_v16, %v2082_v54  ;;  %v6559_v47 = vmov 31  }
 0x29f   : > { %v2016_v15 = vmul.f32 %v5567_v20, %v2007_v48  ;;  %v2000_v56 = vsub.f32 %v1972_v44, %v5533_v19 }
 0x2a0   : > { %v2116_v17 = vpop.permute.xlu0 %2115 }
 0x2a1   : > { %v2024_v7 = vadd.f32 %v2016_v15, %v5525_v2  ;;  %v2008_v18 = vand.u32 2147483647, %v2000_v56  ;;  %3546 = vset.pattern.permute.xlu1 %v6557_v29  ;;  %v5662_v2 = vrot.slane %v5596_v36, %v6558_v35 }
 0x2a2   : > { %2453 = vperm.xlu1 %3546, %v6526_v5   ;;  %v1980_v43 = vpop.permute.xlu1 %1979 }
 0x2a3   : > { %v5656_v60 = vadd.f32 %v2086_v59, %v2024_v7  ;;  %v2017_v12 = vmul.f32 %v5567_v20, %v2008_v18  ;;  %v2002_v39 = vsub.f32 %v1980_v43, %v5533_v19  ;;  %v2138_v22 = vsub.f32 %v2104_v40, %v5662_v2 }
 0x2a4   : > { %v2124_v58 = vpop.permute.xlu0 %2123  ;;  %v2141_v14 = vsub.f32 %v2116_v17, %v5662_v2  ;;  %v5701_v40 = vrot.slane %v5596_v36, %v6560_v10 }
 0x2a5   : > { %v2025_v11 = vadd.f32 %v2017_v12, %v1955_v4  ;;  %v2010_v50 = vand.u32 2147483647, %v2002_v39  ;;  %v2146_v1 = vand.u32 2147483647, %v2138_v22 }
 0x2a6   : > { %2461 = vperm.xlu1 %3546, %v4015_v3   ;;  %v1988_v5 = vpop.permute.xlu1 %1987  ;;  %v2149_v52 = vand.u32 2147483647, %v2141_v14 }
 0x2a7   : > { %v2019_v46 = vmul.f32 %v5567_v20, %v2010_v50  ;;  %v2004_v33 = vsub.f32 %v1988_v5, %v5533_v19 }
 0x2a8   : > { %v2158_v18 = vmul.f32 %v5677_v57, %v2149_v52 }
 0x2a9   : > { %v2027_v55 = vadd.f32 %v2019_v46, %v5559_v8  ;;  %v2012_v63 = vand.u32 2147483647, %v2004_v33 }
 0x2aa   : > { %2465 = vperm.xlu1 %3546, %v6544_v27  }
 0x2ab   : > { %v5671_v9 = vadd.f32 %v2089_v49, %v2027_v55  ;;  %v2021_v53 = vmul.f32 %v5567_v20, %v2012_v63  ;;  %v2034_v37 = vpop.permute.xlu1 %2033  ;;  %v2155_v20 = vmul.f32 %v5677_v57, %v2146_v1 }
 0x2ac   : > { %v2068_v45 = vsub.f32 %v2034_v37, %v5611_v42 }
 0x2ad   : > { %v2029_v19 = vadd.f32 %v2021_v53, %v5573_v21  ;;  %v2132_v21 = vpop.permute.xlu0 %2131  ;;  %v5719_v53 = vstv %s3274_s27 }
 0x2ae   : > { %v2076_v24 = vand.u32 2147483647, %v2068_v45  ;;  %2473 = vperm.xlu1 %3546, %v4021_v6   ;;  %v2143_v6 = vsub.f32 %v2124_v58, %v5662_v2  ;;  %v2145_v43 = vsub.f32 %v2132_v21, %v5662_v2 }
 0x2af   : > { %v5680_v8 = vadd.f32 %v2091_v13, %v2029_v19  ;;  %v2042_v27 = vpop.permute.xlu1 %2041 }
 0x2b0   : > { %v2085_v41 = vmul.f32 %v5634_v16, %v2076_v24  ;;  %v2070_v28 = vsub.f32 %v2042_v27, %v5611_v42  ;;  %v2151_v7 = vand.u32 2147483647, %v2143_v6  ;;  %v2153_v5 = vand.u32 2147483647, %v2145_v43 }
 0x2b1   : > { %v2178_v62 = vpop.permute.xlu0 %2177 }
 0x2b2   : > { %v2093_v32 = vadd.f32 %v2085_v41, %v5588_v23  ;;  %v2078_v48 = vand.u32 2147483647, %v2070_v28  ;;  %2481 = vperm.xlu1 %3546, %v6337_v26   ;;  %v2209_v46 = vsub.f32 %v2178_v62, %v5701_v40  ;;  %v2162_v54 = vmul.f32 %v5677_v57, %v2153_v5 }
 0x2b3   : > { %v2046_v59 = vpop.permute.xlu1 %2045 }
 0x2b4   : > { %v5689_v44 = vadd.f32 %v2155_v20, %v2093_v32  ;;  %v2087_v51 = vmul.f32 %v5634_v16, %v2078_v48  ;;  %v2071_v30 = vsub.f32 %v2046_v59, %v5611_v42  ;;  %v2217_v63 = vand.u32 2147483647, %v2209_v46 }
 0x2b5   : > { %v2190_v17 = vpop.permute.xlu0 %2189 }
 0x2b6   : > { %v2095_v15 = vadd.f32 %v2087_v51, %v2025_v11  ;;  %v2079_v56 = vand.u32 2147483647, %v2071_v30  ;;  %3549 = vset.pattern.permute.xlu1 %v6559_v47  ;;  %v2212_v45 = vsub.f32 %v2190_v17, %v5701_v40  ;;  %v2226_v1 = vmul.f32 %v5719_v53, %v2217_v63 }
 0x2b7   : > { %2527 = vperm.xlu1 %3549, %v6515_v38   ;;  %v2054_v23 = vpop.permute.xlu1 %2053  ;;  %v2160_v38 = vmul.f32 %v5677_v57, %v2151_v7 }
 0x2b8   : > { %v2088_v26 = vmul.f32 %v5634_v16, %v2079_v56  ;;  %v2073_v29 = vsub.f32 %v2054_v23, %v5611_v42  ;;  %v2220_v27 = vand.u32 2147483647, %v2212_v45 }
 0x2b9   : > { %v2198_v13 = vpop.permute.xlu0 %2197 }
 0x2ba   : > { %v2096_v4 = vadd.f32 %v2088_v26, %v5622_v61  ;;  %v2081_v12 = vand.u32 2147483647, %v2073_v29  ;;  %v2214_v14 = vsub.f32 %v2198_v13, %v5701_v40  ;;  %v6561_v13 = vld [vmem:[#allocation98_spill] sm:$0xff] }
 0x2bb   : > { %2531 = vperm.xlu1 %3549, %v4015_v3   ;;  %v2062_v39 = vpop.permute.xlu1 %2061 }
 0x2bc   : > { %v5706_v35 = vadd.f32 %v2158_v18, %v2096_v4  ;;  %v2090_v11 = vmul.f32 %v5634_v16, %v2081_v12  ;;  %v2075_v50 = vsub.f32 %v2062_v39, %v5611_v42  ;;  %v2222_v30 = vand.u32 2147483647, %v2214_v14 }
 0x2bd   : > { %v5727_v41 = vpop.permute.xlu0 %2243 }
 0x2be   : > { %v2098_v49 = vadd.f32 %v2090_v11, %v5636_v0  ;;  %v2083_v61 = vand.u32 2147483647, %v2075_v50  ;;  %v2231_v7 = vmul.f32 %v5719_v53, %v2222_v30 }
 0x2bf   : > { %2539 = vperm.xlu1 %3549, %v6519_v34  }
 0x2c0   : > { %v5713_v33 = vadd.f32 %v2160_v38, %v2098_v49  ;;  %v2092_v3 = vmul.f32 %v5634_v16, %v2083_v61  ;;  %v2108_v22 = vpop.permute.xlu1 %2107 }
 0x2c1   : > { %v2139_v55 = vsub.f32 %v2108_v22, %v5662_v2  ;;  %v5732_v59 = vpop.permute.xlu0 %2255 }
 0x2c2   : > { %v2100_v42 = vadd.f32 %v2092_v3, %v5645_v31 }
 0x2c3   : > { %v2147_v37 = vand.u32 2147483647, %v2139_v55  ;;  %2547 = vperm.xlu1 %3549, %v6522_v25  }
 0x2c4   : > { %v2170_v0 = vadd.f32 %v2162_v54, %v2100_v42  ;;  %v2112_v34 = vpop.permute.xlu1 %2111 }
 0x2c5   : > { %v2156_v16 = vmul.f32 %v5677_v57, %v2147_v37  ;;  %v2140_v58 = vsub.f32 %v2112_v34, %v5662_v2  ;;  %v5741_v18 = vpop.permute.xlu0 %2263  ;;  %v2277_v37 = vrot.slane %v5596_v36, %v6561_v13 }
 0x2c7   : > { %v2164_v19 = vadd.f32 %v2156_v16, %v5656_v60  ;;  %v2148_v24 = vand.u32 2147483647, %v2140_v58  ;;  %v2229_v60 = vmul.f32 %v5719_v53, %v2220_v27 }
 0x2c8   : > { %v2120_v31 = vpop.permute.xlu1 %2119 }
 0x2c9   : > { %v2234_v20 = vadd.f32 %v2226_v1, %v2164_v19  ;;  %v2157_v25 = vmul.f32 %v5677_v57, %v2148_v24  ;;  %v2142_v28 = vsub.f32 %v2120_v31, %v5662_v2  ;;  %v5749_v12 = vpop.permute.xlu0 %2271  ;;  %v5774_v19 = vstv %s3275_s24 }
 0x2cb   : > { %v2165_v32 = vadd.f32 %v2157_v25, %v2095_v15  ;;  %v2150_v48 = vand.u32 2147483647, %v2142_v28 }
 0x2cc   : > { %v2128_v21 = vpop.permute.xlu1 %2127 }
 0x2cd   : > { %v2159_v6 = vmul.f32 %v5677_v57, %v2150_v48  ;;  %v2144_v51 = vsub.f32 %v2128_v21, %v5662_v2  ;;  %v5755_v49 = vpop.permute.xlu0 %2317 }
 0x2cf   : > { %v2167_v52 = vadd.f32 %v2159_v6, %v5671_v9  ;;  %v2152_v56 = vand.u32 2147483647, %v2144_v51 }
 0x2d1   : > { %v2237_v47 = vadd.f32 %v2229_v60, %v2167_v52  ;;  %v2161_v23 = vmul.f32 %v5677_v57, %v2152_v56  ;;  %v2174_v15 = vpop.permute.xlu1 %2173  ;;  %v5762_v55 = vpop.permute.xlu0 %2329 }
 0x2d2   : > { %v2208_v26 = vsub.f32 %v2174_v15, %v5701_v40 }
 0x2d3   : > { %v2169_v29 = vadd.f32 %v2161_v23, %v5680_v8 }
 0x2d4   : > { %v2216_v43 = vand.u32 2147483647, %v2208_v26 }
 0x2d5   : > { %v2239_v62 = vadd.f32 %v2231_v7, %v2169_v29  ;;  %v2182_v10 = vpop.permute.xlu1 %2181  ;;  %v5772_v1 = vpop.permute.xlu0 %2337 }
 0x2d6   : > { %v2225_v2 = vmul.f32 %v5719_v53, %v2216_v43  ;;  %v2210_v9 = vsub.f32 %v2182_v10, %v5701_v40 }
 0x2d8   : > { %v5747_v4 = vadd.f32 %v2225_v2, %v5689_v44  ;;  %v2218_v57 = vand.u32 2147483647, %v2210_v9 }
 0x2d9   : > { %v2186_v38 = vpop.permute.xlu1 %2185  ;;  %v2384_v28 = vpop.permute.xlu0 %2383 }
 0x2da   : > { %v2227_v39 = vmul.f32 %v5719_v53, %v2218_v57  ;;  %v2211_v11 = vsub.f32 %v2186_v38, %v5701_v40  ;;  %v6562_v57 = vld [vmem:[#allocation100_spill] sm:$0xff] }
 0x2db   : > { %v5811_v38 = vrot.slane %v5596_v36, %v6562_v57 }
 0x2dc   : > { %v2235_v50 = vadd.f32 %v2227_v39, %v2165_v32  ;;  %v2219_v8 = vand.u32 2147483647, %v2211_v11  ;;  %v6563_v11 = vld [vmem:[#allocation101_spill] sm:$0xff] }
 0x2dd   : > { %v2194_v5 = vpop.permute.xlu1 %2193  ;;  %v5782_v21 = vpop.permute.xlu0 %2395 }
 0x2de   : > { %v2228_v17 = vmul.f32 %v5719_v53, %v2219_v8  ;;  %v2213_v46 = vsub.f32 %v2194_v5, %v5701_v40  ;;  %v2281_v5 = vsub.f32 %v5732_v59, %v2277_v37 }
 0x2e0   : > { %v5758_v44 = vadd.f32 %v2228_v17, %v5706_v35  ;;  %v2221_v61 = vand.u32 2147483647, %v2213_v46  ;;  %v2283_v17 = vsub.f32 %v5741_v18, %v2277_v37 }
 0x2e1   : > { %v2202_v3 = vpop.permute.xlu1 %2201  ;;  %v5788_v56 = vpop.permute.xlu0 %2403 }
 0x2e2   : > { %v2230_v54 = vmul.f32 %v5719_v53, %v2221_v61  ;;  %v2215_v22 = vsub.f32 %v2202_v3, %v5701_v40  ;;  %v2285_v3 = vsub.f32 %v5749_v12, %v2277_v37  ;;  %v5837_v12 = vstv %s3276_s15 }
 0x2e4   : > { %v5765_v63 = vadd.f32 %v2230_v54, %v5713_v33  ;;  %v2223_v42 = vand.u32 2147483647, %v2215_v22 }
 0x2e5   : > { %v5794_v15 = vpop.permute.xlu0 %2411 }
 0x2e6   : > { %v2232_v34 = vmul.f32 %v5719_v53, %v2223_v42  ;;  %v2248_v35 = vpop.permute.xlu1 %2247  ;;  %v6564_v42 = vld [vmem:[#allocation106_spill] sm:$0xff] }
 0x2e7   : > { %v2279_v45 = vsub.f32 %v2248_v35, %v2277_v37  ;;  %v5828_v13 = vrot.slane %v5596_v36, %v6564_v42  ;;  %v2291_v35 = vand.u32 2147483647, %v2283_v17 }
 0x2e8   : > { %v5770_v16 = vadd.f32 %v2232_v34, %v2170_v0  ;;  %v2289_v34 = vand.u32 2147483647, %v2281_v5 }
 0x2e9   : > { %v2287_v58 = vand.u32 2147483647, %v2279_v45  ;;  %v5798_v43 = vpop.permute.xlu0 %2457 }
 0x2ea   : > { %v2252_v40 = vpop.permute.xlu1 %2251 }
 0x2eb   : > { %v2296_v24 = vmul.f32 %v5774_v19, %v2287_v58  ;;  %v2280_v33 = vsub.f32 %v2252_v40, %v2277_v37  ;;  %v2293_v58 = vand.u32 2147483647, %v2285_v3 }
 0x2ed   : > { %v5777_v31 = vadd.f32 %v2296_v24, %v2234_v20  ;;  %v2288_v27 = vand.u32 2147483647, %v2280_v33  ;;  %v5841_v33 = vstv %s3277_s20 }
 0x2ee   : > { %v2260_v25 = vpop.permute.xlu1 %2259 }
 0x2ef   : > { %v2297_v53 = vmul.f32 %v5774_v19, %v2288_v27  ;;  %v2282_v14 = vsub.f32 %v2260_v25, %v2277_v37  ;;  %v2298_v25 = vmul.f32 %v5774_v19, %v2289_v34 }
 0x2f1   : > { %v5780_v32 = vadd.f32 %v2297_v53, %v2235_v50  ;;  %v2290_v0 = vand.u32 2147483647, %v2282_v14  ;;  %v5817_v50 = vrot.slane %v5596_v36, %v6563_v11  ;;  %v2349_v53 = vsub.f32 %v5755_v49, %v5811_v38 }
 0x2f2   : > { %v2268_v48 = vpop.permute.xlu1 %2267  ;;  %v2352_v14 = vsub.f32 %v5762_v55, %v5811_v38 }
 0x2f3   : > { %v2299_v6 = vmul.f32 %v5774_v19, %v2290_v0  ;;  %v2284_v60 = vsub.f32 %v2268_v48, %v2277_v37  ;;  %v2418_v54 = vsub.f32 %v2384_v28, %v5817_v50  ;;  %v2300_v28 = vmul.f32 %v5774_v19, %v2291_v35 }
 0x2f4   : > { %v2354_v48 = vsub.f32 %v5772_v1, %v5811_v38  ;;  %v2360_v11 = vand.u32 2147483647, %v2352_v14 }
 0x2f5   : > { %v5785_v51 = vadd.f32 %v2299_v6, %v2237_v47  ;;  %v2292_v30 = vand.u32 2147483647, %v2284_v60  ;;  %v5802_v47 = vpop.permute.xlu0 %2469  ;;  %v2421_v6 = vsub.f32 %v5782_v21, %v5817_v50  ;;  %v6565_v60 = vld [vmem:[#allocation102_spill] sm:$0xff] }
 0x2f6   : > { %v2362_v5 = vand.u32 2147483647, %v2354_v48 }
 0x2f7   : > { %v2301_v20 = vmul.f32 %v5774_v19, %v2292_v30  ;;  %v2314_v52 = vpop.permute.xlu1 %2313  ;;  %v5857_v30 = vrot.slane %v5596_v36, %v6565_v60  ;;  %v2357_v36 = vand.u32 2147483647, %v2349_v53  ;;  %v2429_v17 = vand.u32 2147483647, %v2421_v6 }
 0x2f8   : > { %v2348_v8 = vsub.f32 %v2314_v52, %v5811_v38 }
 0x2f9   : > { %v5790_v23 = vadd.f32 %v2301_v20, %v2239_v62  ;;  %v5806_v9 = vpop.permute.xlu0 %2477  ;;  %v2278_v62 = vsub.f32 %v5727_v41, %v2277_v37  ;;  %v2426_v37 = vand.u32 2147483647, %v2418_v54  ;;  %v2302_v20 = vmul.f32 %v5774_v19, %v2293_v58 }
 0x2fa   : > { %v2356_v22 = vand.u32 2147483647, %v2348_v8  ;;  %v5869_v8 = vstv %s5830_s3  ;;  %v2366_v58 = vmul.f32 %v5837_v12, %v2357_v36 }
 0x2fb   : > { %v5792_v7 = vpop.permute.xlu1 %2321  ;;  %v2286_v46 = vand.u32 2147483647, %v2278_v62  ;;  %v2435_v49 = vmul.f32 %v5841_v33, %v2426_v37 }
 0x2fc   : > { %v2365_v24 = vmul.f32 %v5837_v12, %v2356_v22  ;;  %v2350_v36 = vsub.f32 %v5792_v7, %v5811_v38 }
 0x2fd   : > { %v2524_v61 = vpop.permute.xlu0 %2523  ;;  %v2295_v59 = vmul.f32 %v5774_v19, %v2286_v46  ;;  %v2425_v19 = vsub.f32 %v5794_v15, %v5817_v50  ;;  %v5872_v46 = vstv %s5833_s22 }
 0x2fe   : > { %v2558_v27 = vsub.f32 %v2524_v61, %v5828_v13 }
 0x2ff   : > { %v2326_v26 = vpop.permute.xlu1 %2325  ;;  %v2303_v0 = vadd.f32 %v2295_v59, %v5747_v4  ;;  %v2423_v4 = vsub.f32 %v5788_v56, %v5817_v50  ;;  %v2306_v59 = vadd.f32 %v2298_v25, %v5758_v44  ;;  %v2433_v37 = vand.u32 2147483647, %v2425_v19 }
 0x300   : > { %v2351_v40 = vsub.f32 %v2326_v26, %v5811_v38  ;;  %v2566_v62 = vand.u32 2147483647, %v2558_v27 }
 0x301   : > { %v2536_v45 = vpop.permute.xlu0 %2535  ;;  %v2373_v26 = vadd.f32 %v2365_v24, %v2303_v0  ;;  %v2431_v3 = vand.u32 2147483647, %v2423_v4  ;;  %v5890_v24 = vmul.f32 %v5837_v12, %v2362_v5  ;;  %v2438_v0 = vmul.f32 %v5841_v33, %v2429_v17 }
 0x302   : > { %v2359_v52 = vand.u32 2147483647, %v2351_v40  ;;  %v2561_v22 = vsub.f32 %v2536_v45, %v5828_v13  ;;  %v2575_v35 = vmul.f32 %v5869_v8, %v2566_v62  ;;  %v2489_v40 = vsub.f32 %v5798_v43, %v5857_v30 }
 0x303   : > { %v5796_v29 = vpop.permute.xlu1 %2333  ;;  %v2443_v42 = vadd.f32 %v2435_v49, %v2373_v26  ;;  %v2440_v43 = vmul.f32 %v5841_v33, %v2431_v3 }
 0x304   : > { %v2353_v1 = vsub.f32 %v5796_v29, %v5811_v38  ;;  %v2368_v61 = vmul.f32 %v5837_v12, %v2359_v52  ;;  %v2569_v48 = vand.u32 2147483647, %v2561_v22  ;;  %v2442_v52 = vmul.f32 %v5841_v33, %v2433_v37 }
 0x305   : > { %v2544_v57 = vpop.permute.xlu0 %2543 }
 0x306   : > { %v2361_v34 = vand.u32 2147483647, %v2353_v1  ;;  %v2563_v27 = vsub.f32 %v2544_v57, %v5828_v13  ;;  %v2376_v14 = vadd.f32 %v2368_v61, %v2306_v59  ;;  %v2308_v1 = vadd.f32 %v2300_v28, %v5765_v63 }
 0x307   : > { %v5800_v10 = vpop.permute.xlu1 %2341  ;;  %v2578_v5 = vmul.f32 %v5869_v8, %v2569_v48  ;;  %v2310_v63 = vadd.f32 %v2302_v20, %v5770_v16 }
 0x308   : > { %v2355_v29 = vsub.f32 %v5800_v10, %v5811_v38  ;;  %v5887_v10 = vmul.f32 %v5837_v12, %v2360_v11  ;;  %v2370_v6 = vmul.f32 %v5837_v12, %v2361_v34  ;;  %v2571_v57 = vand.u32 2147483647, %v2563_v27 }
 0x309   : > { %v2552_v53 = vpop.permute.xlu0 %2551  ;;  %v2446_v11 = vadd.f32 %v2438_v0, %v2376_v14  ;;  %v2358_v34 = vand.u32 2147483647, %v2350_v36 }
 0x30a   : > { %v2363_v44 = vand.u32 2147483647, %v2355_v29  ;;  %v2565_v26 = vsub.f32 %v2552_v53, %v5828_v13  ;;  %v2492_v29 = vsub.f32 %v5802_v47, %v5857_v30 }
 0x30c   : > { %v5804_v2 = vpop.permute.xlu1 %2387  ;;  %v2372_v19 = vmul.f32 %v5837_v12, %v2363_v44  ;;  %v2573_v22 = vand.u32 2147483647, %v2565_v26  ;;  %v2500_v27 = vand.u32 2147483647, %v2492_v29 }
 0x30d   : > { %v2419_v4 = vsub.f32 %v5804_v2, %v5817_v50 }
 0x30e   : > { %v2582_v14 = vmul.f32 %v5869_v8, %v2573_v22 }
 0x30f   : > { %v2427_v28 = vand.u32 2147483647, %v2419_v4 }
 0x310   : > { %v5813_v39 = vpop.permute.xlu1 %2391 }
 0x314   : > { %v5822_v41 = vpop.permute.xlu1 %2399 }
 0x315   : > { %v2422_v59 = vsub.f32 %v5822_v41, %v5817_v50 }
 0x318   : > { %v5835_v18 = vpop.permute.xlu1 %2407 }
 0x31d   : > { %v2454_v55 = vpop.permute.xlu1 %2453 }
 0x31e   : > { %v2488_v21 = vsub.f32 %v2454_v55, %v5857_v30  ;;  %v2497_v55 = vand.u32 2147483647, %v2489_v40 }
 0x320   : > { %v2496_v56 = vand.u32 2147483647, %v2488_v21 }
 0x321   : > { %v5877_v54 = vpop.permute.xlu1 %2461 }
 0x322   : > { %v2505_v15 = vmul.f32 %v5872_v46, %v2496_v56  ;;  %v2378_v56 = vadd.f32 %v2370_v6, %v2308_v1  ;;  %v2490_v53 = vsub.f32 %v5877_v54, %v5857_v30 }
 0x324   : > { %v2513_v45 = vadd.f32 %v2505_v15, %v2443_v42  ;;  %v2580_v42 = vmul.f32 %v5869_v8, %v2571_v57  ;;  %v2380_v15 = vadd.f32 %v2372_v19, %v2310_v63  ;;  %v2448_v16 = vadd.f32 %v2440_v43, %v2378_v56  ;;  %v2631_v56 = vld [vmem:[%s3989_s10] sm:$0xff] }
 0x325   : > { %v2466_v25 = vpop.permute.xlu1 %2465  ;;  %v2430_v43 = vand.u32 2147483647, %v2422_v59  ;;  %v2509_v57 = vmul.f32 %v5872_v46, %v2500_v27  ;;  %vm2633_vm1 = vnez %v2631_v56 }
 0x326   : > { %v2583_v60 = vadd.f32 %v2575_v35, %v2513_v45  ;;  %v2491_v49 = vsub.f32 %v2466_v25, %v5857_v30  ;;  %v2420_v35 = vsub.f32 %v5813_v39, %v5817_v50  ;;  %v2436_v45 = vmul.f32 %v5841_v33, %v2427_v28 }
 0x327   : > { %v2374_v39 = vadd.f32 %v2366_v58, %v5777_v31  ;;  %v2367_v25 = vmul.f32 %v5837_v12, %v2358_v34  ;;  %v2450_v48 = vadd.f32 %v2442_v52, %v2380_v15  ;;  %v2498_v31 = vand.u32 2147483647, %v2490_v53 }
 0x328   : > { %v2591_v21 = vsub.f32 0.0, %v2583_v60  ;;  %v2499_v62 = vand.u32 2147483647, %v2491_v49  ;;  %v2428_v6 = vand.u32 2147483647, %v2420_v35  ;;  %v2424_v60 = vsub.f32 %v5835_v18, %v5817_v50 }
 0x329   : > { %v2474_v17 = vpop.permute.xlu1 %2473  ;;  %v2444_v1 = vadd.f32 %v2436_v45, %v2374_v39  ;;  %v2494_v12 = vsub.f32 %v5806_v9, %v5857_v30  ;;  %v2375_v50 = vadd.f32 %v2367_v25, %v5780_v32  ;;  %v2507_v9 = vmul.f32 %v5872_v46, %v2498_v31 }
 0x32a   : > { %v2599_v61 = vmul.f32 1.442695, %v2591_v21  ;;  %v2508_v2 = vmul.f32 %v5872_v46, %v2499_v62  ;;  %v2493_v3 = vsub.f32 %v2474_v17, %v5857_v30  ;;  %v2506_v21 = vmul.f32 %v5872_v46, %v2497_v55 }
 0x32b   : > { %v2437_v18 = vmul.f32 %v5841_v33, %v2428_v6  ;;  %v2432_v55 = vand.u32 2147483647, %v2424_v60  ;;  %v2377_v32 = vadd.f32 %v5887_v10, %v5785_v51  ;;  %v2379_v10 = vadd.f32 %v5890_v24, %v5790_v23 }
 0x32c   : > { %3550 = vpow2.f32 %v2599_v61  ;;  %v2516_v7 = vadd.f32 %v2508_v2, %v2446_v11  ;;  %v2501_v38 = vand.u32 2147483647, %v2493_v3  ;;  %v2439_v11 = vmul.f32 %v5841_v33, %v2430_v43 }
 0x32d   : > { %v2482_v37 = vpop.permute.xlu1 %2481  ;;  %v2514_v61 = vadd.f32 %v2506_v21, %v2444_v1  ;;  %v2502_v3 = vand.u32 2147483647, %v2494_v12  ;;  %v2445_v29 = vadd.f32 %v2437_v18, %v2375_v50 }
 0x32e   : > { %v2586_v20 = vadd.f32 %v2578_v5, %v2516_v7  ;;  %v2510_v40 = vmul.f32 %v5872_v46, %v2501_v38  ;;  %v2495_v47 = vsub.f32 %v2482_v37, %v5857_v30  ;;  %v2447_v38 = vadd.f32 %v2439_v11, %v2377_v32 }
 0x32f   : > { %v2515_v59 = vadd.f32 %v2507_v9, %v2445_v29 }
 0x330   : > { %v2594_v0 = vsub.f32 0.0, %v2586_v20  ;;  %v2518_v44 = vadd.f32 %v2510_v40, %v2448_v16  ;;  %v2503_v41 = vand.u32 2147483647, %v2495_v47  ;;  %v6566_v20 = vmov 0  }
 0x331   : > { %v5947_v40 = vsel %vm2633_vm1, 16843009, %v6566_v20  ;;  %v2517_v27 = vadd.f32 %v2509_v57, %v2447_v38 }
 0x332   : > { %v2605_v49 = vmul.f32 1.442695, %v2594_v0  ;;  %v2588_v4 = vadd.f32 %v2580_v42, %v2518_v44  ;;  %v2512_v26 = vmul.f32 %v5872_v46, %v2503_v41  ;;  %v2528_v54 = vpop.permute.xlu1 %2527  ;;  %v2441_v42 = vmul.f32 %v5841_v33, %v2432_v55 }
 0x333   : > { %v2559_v58 = vsub.f32 %v2528_v54, %v5828_v13  ;;  %v2653_v24 = vunpack.c.0.s8 %v5947_v40 }
 0x334   : > { %3552 = vpow2.f32 %v2605_v49  ;;  %v2596_v52 = vsub.f32 0.0, %v2588_v4  ;;  %v2520_v62 = vadd.f32 %v2512_v26, %v2450_v48  ;;  %v2449_v53 = vadd.f32 %v2441_v42, %v2379_v10  ;;  %v2632_v26 = vld [vmem:[%s3989_s10 + $0x8] sm:$0xff] }
 0x335   : > { %v2567_v36 = vand.u32 2147483647, %v2559_v58  ;;  %v2661_v4 = vpack.c.b16 %v2653_v24, %v2653_v24  ;;  %vm2634_vm2 = vnez %v2632_v26 }
 0x336   : > { %v2609_v19 = vmul.f32 1.442695, %v2596_v52  ;;  %v2590_v5 = vadd.f32 %v2582_v14, %v2520_v62  ;;  %v2532_v17 = vpop.permute.xlu1 %2531  ;;  %v2511_v14 = vmul.f32 %v5872_v46, %v2502_v3  ;;  %v2656_v62 = vunpack.c.3.s8 %v5947_v40 }
 0x337   : > { %v2576_v30 = vmul.f32 %v5869_v8, %v2567_v36  ;;  %v2560_v2 = vsub.f32 %v2532_v17, %v5828_v13  ;;  %v2662_v58 = vpack.c.b8 %v2661_v4, %v2661_v4 }
 0x338   : > { %3554 = vpow2.f32 %v2609_v19  ;;  %v2598_v63 = vsub.f32 0.0, %v2590_v5  ;;  %v2519_v60 = vadd.f32 %v2511_v14, %v2449_v53  ;;  %v2667_v55 = vpack.c.b16 %v2656_v62, %v2656_v62 }
 0x339   : > { %v3551_v28 = vpop.eup %3550  ;;  %v2584_v22 = vadd.f32 %v2576_v30, %v2514_v61  ;;  %v2568_v7 = vand.u32 2147483647, %v2560_v2  ;;  %vm2677_vm3 = vnez %v2662_v58 }
 0x33a   : > { %v2615_v34 = vadd.f32 1.0, %v3551_v28  ;;  %v2613_v15 = vmul.f32 1.442695, %v2598_v63  ;;  %v2540_v35 = vpop.permute.xlu1 %2539  ;;  %v2685_v17 = vsel %vm2677_vm3, 16843009, %v6566_v20  ;;  %v2668_v9 = vpack.c.b8 %v2667_v55, %v2667_v55 }
 0x33b   : > { %v2592_v37 = vsub.f32 0.0, %v2584_v22  ;;  %v2577_v16 = vmul.f32 %v5869_v8, %v2568_v7  ;;  %v2562_v51 = vsub.f32 %v2540_v35, %v5828_v13  ;;  %v2693_v3 = vunpack.c.0.s8 %v2685_v17 }
 0x33c   : > { %3556 = vrcp.f32 %v2615_v34  ;;  %v2654_v28 = vunpack.c.1.s8 %v5947_v40  ;;  %vm2680_vm4 = vnez %v2668_v9 }
 0x33d   : > { %3558 = vpow2.f32 %v2613_v15  ;;  %v2601_v47 = vmul.f32 1.442695, %v2592_v37  ;;  %v2585_v45 = vadd.f32 %v2577_v16, %v2515_v59  ;;  %v2570_v33 = vand.u32 2147483647, %v2562_v51 }
 0x33e   : > { %v2548_v39 = vpop.permute.xlu1 %2547  ;;  %vm2701_vm5 = vcmp.ne.s32.totalorder %v2693_v3, 0  ;;  %v2688_v15 = vsel %vm2680_vm4, 16843009, %v6566_v20  ;;  %v2663_v35 = vpack.c.b16 %v2654_v28, %v2654_v28  ;;  %v2655_v59 = vunpack.c.2.s8 %v5947_v40 }
 0x33f   : > { %3560 = vpow2.f32 %v2601_v47  ;;  %v2593_v0 = vsub.f32 0.0, %v2585_v45  ;;  %v2579_v44 = vmul.f32 %v5869_v8, %v2570_v33  ;;  %v2564_v23 = vsub.f32 %v2548_v39, %v5828_v13 }
 0x340   : > { %v2696_v33 = vunpack.c.0.s8 %v2688_v15  ;;  %v2664_v14 = vpack.c.b8 %v2663_v35, %v2663_v35  ;;  %v2665_v39 = vpack.c.b16 %v2655_v59, %v2655_v59  ;;  %v2726_v15 = vld [vmem:[#allocation3 + $0x8] sm:$0xff] }
 0x341   : > { %v3553_v41 = vpop.eup %3552  ;;  %v2603_v25 = vmul.f32 1.442695, %v2593_v0  ;;  %v2587_v48 = vadd.f32 %v2579_v44, %v2517_v27  ;;  %v2572_v6 = vand.u32 2147483647, %v2564_v23 }
 0x342   : > { %v2618_v43 = vadd.f32 1.0, %v3553_v41  ;;  %vm2704_vm8 = vcmp.ne.s32.totalorder %v2696_v33, 0  ;;  %vm2678_vm9 = vnez %v2664_v14  ;;  %v2666_v24 = vpack.c.b8 %v2665_v39, %v2665_v39 }
 0x343   : > { %3562 = vpow2.f32 %v2603_v25  ;;  %v2595_v49 = vsub.f32 0.0, %v2587_v48  ;;  %v2581_v46 = vmul.f32 %v5869_v8, %v2572_v6  ;;  %v5957_v8 = vsel %vm2634_vm2, 16843009, %v6566_v20 }
 0x344   : > { %3564 = vrcp.f32 %v2618_v43  ;;  %v2658_v19 = vunpack.c.1.s8 %v5957_v8  ;;  %v2660_v32 = vunpack.c.3.s8 %v5957_v8  ;;  %v2657_v0 = vunpack.c.0.s8 %v5957_v8 }
 0x345   : > { %v3555_v54 = vpop.eup %3554  ;;  %v2607_v1 = vmul.f32 1.442695, %v2595_v49  ;;  %v2589_v21 = vadd.f32 %v2581_v46, %v2519_v60  ;;  %v2659_v25 = vunpack.c.2.s8 %v5957_v8  ;;  %v2686_v49 = vsel %vm2678_vm9, 16843009, %v6566_v20 }
 0x346   : > { %v2620_v31 = vadd.f32 1.0, %v3555_v54  ;;  %v2671_v30 = vpack.c.b16 %v2658_v19, %v2658_v19  ;;  %v2675_v42 = vpack.c.b16 %v2660_v32, %v2660_v32  ;;  %v2669_v41 = vpack.c.b16 %v2657_v0, %v2657_v0  ;;  %v2725_v32 = vld [vmem:[#allocation3] sm:$0xff] }
 0x347   : > { %3566 = vpow2.f32 %v2607_v1  ;;  %v2597_v13 = vsub.f32 0.0, %v2589_v21  ;;  %vm2679_vm11 = vnez %v2666_v24  ;;  %v2673_v54 = vpack.c.b16 %v2659_v25, %v2659_v25 }
 0x348   : > { %3568 = vrcp.f32 %v2620_v31  ;;  %v2672_v7 = vpack.c.b8 %v2671_v30, %v2671_v30  ;;  %v2676_v47 = vpack.c.b8 %v2675_v42, %v2675_v42  ;;  %v2670_v26 = vpack.c.b8 %v2669_v41, %v2669_v41  ;;  %v2732_v42 = vld [vmem:[#allocation3 + $0x38] sm:$0xff] }
 0x349   : > { %v3557_v12 = vpop.eup %3556  ;;  %v2611_v52 = vmul.f32 1.442695, %v2597_v13  ;;  %v2694_v13 = vunpack.c.0.s8 %v2686_v49  ;;  %v2687_v58 = vsel %vm2679_vm11, 16843009, %v6566_v20 }
 0x34a   : > { %v3559_v50 = vpop.eup %3558  ;;  %v2635_v18 = vmul.f32 1.442695, %v3557_v12  ;;  %vm2682_vm6 = vnez %v2672_v7  ;;  %vm2684_vm7 = vnez %v2676_v47  ;;  %vm2681_vm13 = vnez %v2670_v26  ;;  %v2729_v47 = vld [vmem:[#allocation3 + $0x20] sm:$0xff] }
 0x34b   : > { %v2622_v57 = vadd.f32 1.0, %v3559_v50  ;;  %3570 = vpow2.f32 %v2611_v52  ;;  %v2690_v53 = vsel %vm2682_vm6, 16843009, %v6566_v20  ;;  %v2692_v43 = vsel %vm2684_vm7, 16843009, %v6566_v20 }
 0x34c   : > { %v3561_v36 = vpop.eup %3560  ;;  %3572 = vpow2.f32 %v2635_v18  ;;  %v2698_v44 = vunpack.c.0.s8 %v2690_v53  ;;  %v2700_v4 = vunpack.c.0.s8 %v2692_v43  ;;  %v2674_v52 = vpack.c.b8 %v2673_v54, %v2673_v54 }
 0x34d   : > { %3574 = vrcp.f32 %v2622_v57  ;;  %v2616_v11 = vadd.f32 1.0, %v3561_v36  ;;  %vm2702_vm14 = vcmp.ne.s32.totalorder %v2694_v13, 0  ;;  %v2695_v18 = vunpack.c.0.s8 %v2687_v58 }
 0x34e   : > { %vm2706_vm10 = vcmp.ne.s32.totalorder %v2698_v44, 0  ;;  %vm2708_vm12 = vcmp.ne.s32.totalorder %v2700_v4, 0  ;;  %v2689_v57 = vsel %vm2681_vm13, 16843009, %v6566_v20  ;;  %vm2683_vm15 = vnez %v2674_v52 }
 0x34f   : > { %3576 = vrcp.f32 %v2616_v11  ;;  %vm2703_vm1 = vcmp.ne.s32.totalorder %v2695_v18, 0  ;;  %v2697_v55 = vunpack.c.0.s8 %v2689_v57  ;;  %v2691_v19 = vsel %vm2683_vm15, 16843009, %v6566_v20  ;;  %v2728_v20 = vld [vmem:[#allocation3 + $0x18] sm:$0xff] }
 0x350   : > { %v3563_v5 = vpop.eup %3562 }
 0x351   : > { %v3565_v56 = vpop.eup %3564  ;;  %v2617_v61 = vadd.f32 1.0, %v3563_v5  ;;  %vm2705_vm2 = vcmp.ne.s32.totalorder %v2697_v55, 0 }
 0x352   : > { %v2641_v2 = vmul.f32 1.442695, %v3565_v56  ;;  %v2699_v56 = vunpack.c.0.s8 %v2691_v19 }
 0x353   : > { %3578 = vrcp.f32 %v2617_v61 }
 0x354   : > { %v3567_v63 = vpop.eup %3566  ;;  %3580 = vpow2.f32 %v2641_v2  ;;  %vm2707_vm3 = vcmp.ne.s32.totalorder %v2699_v56, 0 }
 0x355   : > { %v3569_v29 = vpop.eup %3568  ;;  %v2619_v22 = vadd.f32 1.0, %v3567_v63 }
 0x356   : > { %v2645_v38 = vmul.f32 1.442695, %v3569_v29 }
 0x357   : > { %3582 = vrcp.f32 %v2619_v22  ;;  %v2730_v22 = vld [vmem:[#allocation3 + $0x28] sm:$0xff] }
 0x358   : > { %v3571_v34 = vpop.eup %3570  ;;  %3584 = vpow2.f32 %v2645_v38 }
 0x359   : > { %v3573_v37 = vpop.eup %3572  ;;  %v2621_v16 = vadd.f32 1.0, %v3571_v34 }
 0x35a   : > { %v3575_v51 = vpop.eup %3574  ;;  %v2709_v10 = vsel %vm2701_vm5, %v3573_v37, 1.0 }
 0x35b   : > { %v2649_v45 = vmul.f32 1.442695, %v3575_v51  ;;  %3586 = vrcp.f32 %v2621_v16  ;;  %2733 = vadd.xlane.f32.xlu1 %v2709_v10  ;;  %2717 = vst [vmem:[#allocation2 + $0x30] sm:$0xff] %v2709_v10  ;;  %v2727_v16 = vld [vmem:[#allocation3 + $0x10] sm:$0xff] }
 0x35c   : > { %v3577_v27 = vpop.eup %3576 }
 0x35d   : > { %3588 = vpow2.f32 %v2649_v45  ;;  %v2637_v40 = vmul.f32 1.442695, %v3577_v27  ;;  %v2731_v27 = vld [vmem:[#allocation3 + $0x30] sm:$0xff] }
 0x35f   : > { %3590 = vpow2.f32 %v2637_v40 }
 0x360   : > { %v3579_v23 = vpop.eup %3578 }
 0x361   : > { %v3581_v48 = vpop.eup %3580  ;;  %v2639_v6 = vmul.f32 1.442695, %v3579_v23 }
 0x362   : > { %v2712_v60 = vsel %vm2704_vm8, %v3581_v48, 1.0 }
 0x363   : > { %3592 = vpow2.f32 %v2639_v6  ;;  %2720 = vst [vmem:[#allocation2 + $0x10] sm:$0xff] %v2712_v60  ;;  %2739 = vadd.xlane.f32.xlu1 %v2712_v60 }
 0x364   : > { %v3583_v46 = vpop.eup %3582 }
 0x365   : > { %v3585_v1 = vpop.eup %3584  ;;  %v2643_v21 = vmul.f32 1.442695, %v3583_v46 }
 0x366   : > { %v2714_v31 = vsel %vm2706_vm10, %v3585_v1, 1.0 }
 0x367   : > { %3594 = vpow2.f32 %v2643_v21  ;;  %2722 = vst [vmem:[#allocation2 + $0x20] sm:$0xff] %v2714_v31  ;;  %2743 = vadd.xlane.f32.xlu1 %v2714_v31 }
 0x368   : > { %v3587_v12 = vpop.eup %3586 }
 0x369   : > { %v2647_v62 = vmul.f32 1.442695, %v3587_v12 }
 0x36a   : > { %v3589_v50 = vpop.eup %3588 }
 0x36b   : > { %3596 = vpow2.f32 %v2647_v62  ;;  %v2716_v8 = vsel %vm2708_vm12, %v3589_v50, 1.0 }
 0x36c   : > { %v3591_v36 = vpop.eup %3590  ;;  %2724 = vst [vmem:[#allocation2 + $0x38] sm:$0xff] %v2716_v8  ;;  %2747 = vadd.xlane.f32.xlu1 %v2716_v8 }
 0x36d   : > { %v2710_v11 = vsel %vm2702_vm14, %v3591_v36, 1.0 }
 0x36e   : > { %2735 = vadd.xlane.f32.xlu0 %v2710_v11  ;;  %2718 = vst [vmem:[#allocation2] sm:$0xff] %v2710_v11 }
 0x370   : > { %v3593_v5 = vpop.eup %3592 }
 0x371   : > { %v2711_v17 = vsel %vm2703_vm1, %v3593_v5, 1.0 }
 0x372   : > { %2719 = vst [vmem:[#allocation2 + $0x18] sm:$0xff] %v2711_v17  ;;  %2737 = vadd.xlane.f32.xlu0 %v2711_v17 }
 0x374   : > { %v3595_v61 = vpop.eup %3594 }
 0x375   : > { %v2713_v9 = vsel %vm2705_vm2, %v3595_v61, 1.0 }
 0x376   : > { %2721 = vst [vmem:[#allocation2 + $0x8] sm:$0xff] %v2713_v9  ;;  %2741 = vadd.xlane.f32.xlu0 %v2713_v9 }
 0x378   : > { %v3597_v30 = vpop.eup %3596 }
 0x379   : > { %v2715_v2 = vsel %vm2707_vm3, %v3597_v30, 1.0 }
 0x37a   : > { %2723 = vst [vmem:[#allocation2 + $0x28] sm:$0xff] %v2715_v2  ;;  %2745 = vadd.xlane.f32.xlu0 %v2715_v2 }
 0x3e4   : > { %v2734_v3 = vpop.xlane.xlu1 %2733 }
 0x3e5   : > { %v2749_v63 = vadd.f32 %v2734_v3, %v2725_v32 }
 0x3e7   : > { %2757 = vst.msk [vmem:[#allocation3] sm:$0xff] %vm325_vm0, %v2749_v63 }
 0x3ec   : > { %v2740_v28 = vpop.xlane.xlu1 %2739 }
 0x3ed   : > { %v2752_v29 = vadd.f32 %v2740_v28, %v2728_v20 }
 0x3ef   : > { %2760 = vst.msk [vmem:[#allocation3 + $0x18] sm:$0xff] %vm325_vm0, %v2752_v29 }
 0x3f0   : > { %v2744_v7 = vpop.xlane.xlu1 %2743 }
 0x3f1   : > { %v2754_v38 = vadd.f32 %v2744_v7, %v2730_v22 }
 0x3f3   : > { %2762 = vst.msk [vmem:[#allocation3 + $0x28] sm:$0xff] %vm325_vm0, %v2754_v38 }
 0x3f5   : > { %v2748_v34 = vpop.xlane.xlu1 %2747 }
 0x3f6   : > { %v2756_v35 = vadd.f32 %v2748_v34, %v2732_v42 }
 0x3f7   : > { %v2736_v59 = vpop.xlane.xlu0 %2735 }
 0x3f8   : > { %2764 = vst.msk [vmem:[#allocation3 + $0x38] sm:$0xff] %vm325_vm0, %v2756_v35  ;;  %v2750_v37 = vadd.f32 %v2736_v59, %v2726_v15 }
 0x3fa   : > { %2758 = vst.msk [vmem:[#allocation3 + $0x8] sm:$0xff] %vm325_vm0, %v2750_v37 }
 0x3fb   : > { %v2738_v51 = vpop.xlane.xlu0 %2737 }
 0x3fc   : > { %v2751_v10 = vadd.f32 %v2738_v51, %v2727_v16 }
 0x3fe   : > { %2759 = vst.msk [vmem:[#allocation3 + $0x10] sm:$0xff] %vm325_vm0, %v2751_v10 }
 0x3ff   : > { %v2742_v45 = vpop.xlane.xlu0 %2741 }
 0x400   : > { %v2753_v33 = vadd.f32 %v2742_v45, %v2729_v47 }
 0x402   : > { %2761 = vst.msk [vmem:[#allocation3 + $0x20] sm:$0xff] %vm325_vm0, %v2753_v33 }
 0x403   : > { %v2746_v53 = vpop.xlane.xlu0 %2745 }
 0x404   : > { %v2755_v14 = vadd.f32 %v2746_v53, %v2731_v27 }
 0x406   : > { %2763 = vst.msk [vmem:[#allocation3 + $0x30] sm:$0xff] %vm325_vm0, %v2755_v14 }
 0x407 PF: > { %p3280_p7 = scmp.ne.s32.totalorder %s4006_s16, 0 }
 0x409   : > { %2768 = sbr.rel (%p3280_p7) target bundleno = 1047 (0x417), region = 60 }
 0x40e   : > { %v2777_v39 = vld [vmem:[#allocation3] sm:$0xff]  ;;  %v2778_v0 = vld [vmem:[#allocation3 + $0x8] sm:$0xff]  ;;  %v2779_v40 = vld [vmem:[#allocation3 + $0x10] sm:$0xff]  ;;  %v3813_v44 = vmov 1.0  }
 0x40f   : > { %2769 = vst [vmem:[#allocation2 + $0x30] sm:$0xff] %v3813_v44  ;;  %2770 = vst [vmem:[#allocation2] sm:$0xff] %v3813_v44  ;;  %v2785_v23 = vadd.f32 128.0, %v2777_v39  ;;  %v2786_v24 = vadd.f32 128.0, %v2778_v0  ;;  %v2787_v41 = vadd.f32 128.0, %v2779_v40  ;;  %v2780_v25 = vld [vmem:[#allocation3 + $0x18] sm:$0xff] }
 0x410   : > { %2771 = vst [vmem:[#allocation2 + $0x18] sm:$0xff] %v3813_v44  ;;  %2772 = vst [vmem:[#allocation2 + $0x10] sm:$0xff] %v3813_v44  ;;  %v2781_v48 = vld [vmem:[#allocation3 + $0x20] sm:$0xff]  ;;  %v2782_v6 = vld [vmem:[#allocation3 + $0x28] sm:$0xff]  ;;  %v2788_v43 = vadd.f32 128.0, %v2780_v25 }
 0x411   : > { %2773 = vst [vmem:[#allocation2 + $0x8] sm:$0xff] %v3813_v44  ;;  %2774 = vst [vmem:[#allocation2 + $0x20] sm:$0xff] %v3813_v44  ;;  %v2789_v60 = vadd.f32 128.0, %v2781_v48  ;;  %v2790_v49 = vadd.f32 128.0, %v2782_v6  ;;  %v2783_v46 = vld [vmem:[#allocation3 + $0x30] sm:$0xff]  ;;  %v2784_v4 = vld [vmem:[#allocation3 + $0x38] sm:$0xff] }
 0x412   : > { %2775 = vst [vmem:[#allocation2 + $0x28] sm:$0xff] %v3813_v44  ;;  %2776 = vst [vmem:[#allocation2 + $0x38] sm:$0xff] %v3813_v44  ;;  %v2791_v26 = vadd.f32 128.0, %v2783_v46  ;;  %v2792_v54 = vadd.f32 128.0, %v2784_v4 }
 0x413   : > { %2793 = vst.msk [vmem:[#allocation3] sm:$0xff] %vm325_vm0, %v2785_v23  ;;  %2794 = vst.msk [vmem:[#allocation3 + $0x8] sm:$0xff] %vm325_vm0, %v2786_v24 }
 0x414   : > { %2795 = vst.msk [vmem:[#allocation3 + $0x10] sm:$0xff] %vm325_vm0, %v2787_v41  ;;  %2796 = vst.msk [vmem:[#allocation3 + $0x18] sm:$0xff] %vm325_vm0, %v2788_v43 }
 0x415   : > { %2797 = vst.msk [vmem:[#allocation3 + $0x20] sm:$0xff] %vm325_vm0, %v2789_v60  ;;  %2798 = vst.msk [vmem:[#allocation3 + $0x28] sm:$0xff] %vm325_vm0, %v2790_v49 }
 0x416   : > { %2799 = vst.msk [vmem:[#allocation3 + $0x30] sm:$0xff] %vm325_vm0, %v2791_v26  ;;  %2800 = vst.msk [vmem:[#allocation3 + $0x38] sm:$0xff] %vm325_vm0, %v2792_v54 }
 0x417 PF: > { %v2824_v1 = vld [vmem:[%s6139_s5 + $0x78] sm:$0xff]  ;;  %v2823_v21 = vld [vmem:[%s6139_s5 + $0x70] sm:$0xff]  ;;  %v2822_v31 = vld [vmem:[%s6139_s5 + $0x68] sm:$0xff]  ;;  %v3814_v15 = vmov 0   ;;  %v3025_v53 = vlaneseq  ;;  %s3288_s13 = sshll.u32 %s3882_s9, 10  ;;  %s3138_s21 = sshll.u32 %s4027_s12, 4  ;;  %s6089_s21 = int_to_ptr.vmem [resolvable:$true] %s3138_s21 }
 0x418   : > { %3313 = vmatprep.subr.mxu0 %v2824_v1  ;;  %3357 = vmatprep.subr.mxu1 %v2824_v1  ;;  %v2821_v13 = vld [vmem:[%s6139_s5 + $0x60] sm:$0xff]  ;;  %v2820_v58 = vld [vmem:[%s6139_s5 + $0x58] sm:$0xff]  ;;  %v2819_v12 = vld [vmem:[%s6139_s5 + $0x50] sm:$0xff]  ;;  %s6087_s15 = scalar_lea.hbm %s6141_s7, %s3288_s13  ;;  %s3125_s20 = scalar_lea.sflag [#allocation8], %s3985_s23 }
 0x419   : > { %3314 = vmatpush3.msra.mxu0 %v2824_v1  ;;  %3373 = vmatpush3.msra.mxu1 %v2824_v1  ;;  %v2818_v52 = vld [vmem:[%s6139_s5 + $0x48] sm:$0xff]  ;;  %v2817_v62 = vld [vmem:[%s6139_s5 + $0x40] sm:$0xff]  ;;  %v2816_v50 = vld [vmem:[%s6139_s5 + $0x38] sm:$0xff]  ;;  %v6041_v41 = vand.u32 127, %v3025_v53  ;;  %s3703_s9 = scalar_lea.vmem %s6089_s21, 1024  ;;  %p6567_p13 = scmp.ne.s32.totalorder %s6215_s17, 0 }
 0x41a   : > { %3315 = vmatprep.subr.mxu0 %v2823_v21  ;;  %3358 = vmatprep.subr.mxu1 %v2823_v21  ;;  %v2815_v18 = vld [vmem:[%s6139_s5 + $0x30] sm:$0xff]  ;;  %v2814_v57 = vld [vmem:[%s6139_s5 + $0x28] sm:$0xff]  ;;  %v2930_v36 = vld [vmem:[#allocation3] sm:$0xff]  ;;  %p3704_p12 = scmp.ne.s32.totalorder %s6089_s21, %s3703_s9  ;;  %s3815_s3 = smov [#allocation11]  }
 0x41b   : > { %3316 = vmatpush3.msra.mxu0 %v2823_v21  ;;  %3374 = vmatpush3.msra.mxu1 %v2823_v21  ;;  %v2932_v8 = vld [vmem:[#allocation3 + $0x10] sm:$0xff]  ;;  %v2813_v11 = vld [vmem:[%s6139_s5 + $0x20] sm:$0xff]  ;;  %v2933_v55 = vld [vmem:[#allocation3 + $0x18] sm:$0xff]  ;;  %vm3027_vm0 = vcmp.lt.s32.totalorder %v6041_v41, 8  ;;  %s3707_s22 = sshll.u32 %s3815_s3, 4  ;;  %s3708_s22 = int_to_ptr.vmem [resolvable:$false] %s3707_s22 }
 0x41c   : > { %3317 = vmatprep.subr.mxu0 %v2822_v31  ;;  %3359 = vmatprep.subr.mxu1 %v2822_v31  ;;  %3600 = vrcp.f32 %v2932_v8  ;;  %v2812_v19 = vld [vmem:[%s6139_s5 + $0x18] sm:$0xff]  ;;  %v2931_v5 = vld [vmem:[#allocation3 + $0x8] sm:$0xff]  ;;  %v2811_v17 = vld [vmem:[%s6139_s5 + $0x10] sm:$0xff]  ;;  %p3705_p0 = pnand %p3704_p12, %p6567_p13  ;;  %s3709_s10 = scalar_lea.vmem %s3708_s22, 2048 }
 0x41d   : > { %3318 = vmatpush3.msra.mxu0 %v2822_v31  ;;  %3375 = vmatpush3.msra.mxu1 %v2822_v31  ;;  %3602 = vrcp.f32 %v2930_v36  ;;  %v2935_v56 = vld [vmem:[#allocation3 + $0x28] sm:$0xff]  ;;  %v2934_v9 = vld [vmem:[#allocation3 + $0x20] sm:$0xff]  ;;  %v2937_v2 = vld [vmem:[#allocation3 + $0x38] sm:$0xff]  ;;  %p3710_p6 = scmp.lt.s32.totalorder %s6089_s21, %s3708_s22  ;;  %p3711_p9 = scmp.lt.s32.totalorder %s3709_s10, %s3703_s9 }
 0x41e   : > { %3319 = vmatprep.subr.mxu0 %v2821_v13  ;;  %3360 = vmatprep.subr.mxu1 %v2821_v13  ;;  %3604 = vrcp.f32 %v2933_v55  ;;  %v2810_v61 = vld [vmem:[%s6139_s5 + $0x8] sm:$0xff]  ;;  %v2809_v30 = vld [vmem:[%s6139_s5] sm:$0xff]  ;;  %v2801_v32 = vld [vmem:[#allocation2 + $0x30] sm:$0xff]  ;;  %p3706_p1 = pneg %p3705_p0 }
 0x41f   : > { %3320 = vmatpush3.msra.mxu0 %v2821_v13  ;;  %3376 = vmatpush3.msra.mxu1 %v2821_v13  ;;  %3606 = vrcp.f32 %v2931_v5  ;;  %v2805_v3 = vld [vmem:[#allocation2 + $0x8] sm:$0xff]  ;;  %v2936_v63 = vld [vmem:[#allocation3 + $0x30] sm:$0xff]  ;;  %v2802_v20 = vld [vmem:[#allocation2] sm:$0xff]  ;;  %p3712_p2 = por %p3711_p9, %p3710_p6 }
 0x420   : > { %3321 = vmatprep.subr.mxu0 %v2820_v58  ;;  %3361 = vmatprep.subr.mxu1 %v2820_v58  ;;  %3608 = vrcp.f32 %v2935_v56  ;;  %v2806_v28 = vld [vmem:[#allocation2 + $0x20] sm:$0xff]  ;;  %v2803_v29 = vld [vmem:[#allocation2 + $0x18] sm:$0xff]  ;;  %v2807_v22 = vld [vmem:[#allocation2 + $0x28] sm:$0xff] }
 0x421   : > { %3322 = vmatpush3.msra.mxu0 %v2820_v58  ;;  %3377 = vmatpush3.msra.mxu1 %v2820_v58  ;;  %3610 = vrcp.f32 %v2934_v9  ;;  %v2804_v42 = vld [vmem:[#allocation2 + $0x10] sm:$0xff]  ;;  %v2808_v34 = vld [vmem:[#allocation2 + $0x38] sm:$0xff]  ;;  %v3281_v40 = vld [vmem:[%s6140_s6] ss:$0 sm:$0xff]  ;;  %p3713_p10 = pnand %p3712_p2, %p3706_p1 }
 0x422   : > { %3323 = vmatprep.subr.mxu0 %v2819_v12  ;;  %3362 = vmatprep.subr.mxu1 %v2819_v12  ;;  %3612 = vrcp.f32 %v2937_v2 }
 0x423   : > { %3324 = vmatpush3.msra.mxu0 %v2819_v12  ;;  %3378 = vmatpush3.msra.mxu1 %v2819_v12  ;;  %3614 = vrcp.f32 %v2936_v63 }
 0x424   : > { %3325 = vmatprep.subr.mxu0 %v2818_v52  ;;  %3363 = vmatprep.subr.mxu1 %v2818_v52 }
 0x425   : > { %3326 = vmatpush3.msra.mxu0 %v2818_v52  ;;  %3379 = vmatpush3.msra.mxu1 %v2818_v52 }
 0x426   : > { %3327 = vmatprep.subr.mxu0 %v2817_v62  ;;  %3364 = vmatprep.subr.mxu1 %v2817_v62 }
 0x427   : > { %3328 = vmatpush3.msra.mxu0 %v2817_v62  ;;  %3380 = vmatpush3.msra.mxu1 %v2817_v62 }
 0x428   : > { %3329 = vmatprep.subr.mxu0 %v2816_v50  ;;  %3365 = vmatprep.subr.mxu1 %v2816_v50 }
 0x429   : > { %3330 = vmatpush3.msra.mxu0 %v2816_v50  ;;  %3381 = vmatpush3.msra.mxu1 %v2816_v50  ;;  %v3601_v7 = vpop.eup %3600 }
 0x42a   : > { %3331 = vmatprep.subr.mxu0 %v2815_v18  ;;  %3366 = vmatprep.subr.mxu1 %v2815_v18  ;;  %v3603_v38 = vpop.eup %3602 }
 0x42b   : > { %3332 = vmatpush3.msra.mxu0 %v2815_v18  ;;  %3382 = vmatpush3.msra.mxu1 %v2815_v18  ;;  %v3605_v35 = vpop.eup %3604 }
 0x42c   : > { %3333 = vmatprep.subr.mxu0 %v2814_v57  ;;  %3367 = vmatprep.subr.mxu1 %v2814_v57  ;;  %v3607_v59 = vpop.eup %3606 }
 0x42d   : > { %3334 = vmatpush3.msra.mxu0 %v2814_v57  ;;  %3383 = vmatpush3.msra.mxu1 %v2814_v57  ;;  %v3609_v37 = vpop.eup %3608 }
 0x42e   : > { %3335 = vmatprep.subr.mxu0 %v2813_v11  ;;  %3368 = vmatprep.subr.mxu1 %v2813_v11  ;;  %v3611_v16 = vpop.eup %3610 }
 0x42f   : > { %3336 = vmatpush3.msra.mxu0 %v2813_v11  ;;  %3384 = vmatpush3.msra.mxu1 %v2813_v11  ;;  %v3613_v51 = vpop.eup %3612 }
 0x430   : > { %3337 = vmatprep.subr.mxu0 %v2812_v19  ;;  %3369 = vmatprep.subr.mxu1 %v2812_v19  ;;  %v3615_v10 = vpop.eup %3614 }
 0x431   : > { %3338 = vmatpush3.msra.mxu0 %v2812_v19  ;;  %3385 = vmatpush3.msra.mxu1 %v2812_v19 }
 0x432   : > { %3339 = vmatprep.subr.mxu0 %v2811_v17  ;;  %3370 = vmatprep.subr.mxu1 %v2811_v17 }
 0x433   : > { %3340 = vmatpush3.msra.mxu0 %v2811_v17  ;;  %3386 = vmatpush3.msra.mxu1 %v2811_v17 }
 0x434   : > { %3341 = vmatprep.subr.mxu0 %v2810_v61  ;;  %3371 = vmatprep.subr.mxu1 %v2810_v61 }
 0x435   : > { %3342 = vmatpush3.msra.mxu0 %v2810_v61  ;;  %3387 = vmatpush3.msra.mxu1 %v2810_v61 }
 0x436   : > { %3343 = vmatprep.subr.mxu0 %v2809_v30  ;;  %3372 = vmatprep.subr.mxu1 %v2809_v30 }
 0x437   : > { %3344 = vmatpush3.msra.mxu0 %v2809_v30  ;;  %3388 = vmatpush3.msra.mxu1 %v2809_v30 }
 0x438   : > { %3345 = vmatprep.mubr.f32.mxu0 %v2801_v32  ;;  %3351 = vmatprep.mubr.f32.mxu1 %v2805_v3 }
 0x439   : > { %3346 = vmatmul.mubr.f32.vlgmr.msra.gmra.mxu0 %v2802_v20  ;;  %3352 = vmatmul.mubr.f32.vlgmr.msra.gmra.mxu1 %v2806_v28 }
 0x43a   : > { %3348 = vmatprep.mubr.f32.mxu0 %v2803_v29  ;;  %3354 = vmatprep.mubr.f32.mxu1 %v2807_v22 }
 0x43b   : > { %3599 = vset.pattern.permute.xlu1 %v3814_v15  ;;  %3598 = vset.pattern.permute.xlu0 %v3814_v15 }
 0x43c   : > { %2966 = vperm.xlu1 %3599, %v3601_v7   ;;  %2956 = vperm.xlu0 %3598, %v3603_v38  }
 0x43d   : > { %3349 = vmatmul.mubr.f32.gmra.mxu0 %v2804_v42  ;;  %3355 = vmatmul.mubr.f32.gmra.mxu1 %v2808_v34 }
 0x440   : > { %2971 = vperm.xlu1 %3599, %v3605_v35   ;;  %2961 = vperm.xlu0 %3598, %v3607_v59  }
 0x444   : > { %2981 = vperm.xlu1 %3599, %v3609_v37   ;;  %2976 = vperm.xlu0 %3598, %v3611_v16  }
 0x448   : > { %2991 = vperm.xlu1 %3599, %v3613_v51   ;;  %2986 = vperm.xlu0 %3598, %v3615_v10  }
 0x4b7   : > { %v2967_v47 = vpop.permute.xlu1 %2966  ;;  %v2957_v45 = vpop.permute.xlu0 %2956 }
 0x4bb   : > { %v2972_v33 = vpop.permute.xlu1 %2971  ;;  %v2962_v27 = vpop.permute.xlu0 %2961 }
 0x4bf   : > { %v2982_v14 = vpop.permute.xlu1 %2981  ;;  %v2977_v39 = vpop.permute.xlu0 %2976 }
 0x4c3   : > { %v2987_v26 = vpop.permute.xlu0 %2986  ;;  %v2992_v55 = vpop.permute.xlu1 %2991 }
 0x4f9   : > { %v3347_v0 = vpop.f32.mrf.mxu0  ;;  %v3353_v44 = vpop.f32.mrf.mxu1 }
 0x4fa   : > { %v2995_v23 = vmul.f32 %v3347_v0, %v2962_v27  ;;  %v2999_v24 = vmul.f32 %v3353_v44, %v2982_v14 }
 0x4fb   : > { %v2891_v25 = vpop.f32.mrf.mxu0  ;;  %v2911_v48 = vpop.f32.mrf.mxu1 }
 0x4fc   : > { %v3010_v6 = vadd.f32 %v3281_v40, %v2995_v23  ;;  %v3014_v43 = vadd.f32 %v3281_v40, %v2999_v24  ;;  %v2994_v60 = vmul.f32 %v2957_v45, %v2891_v25  ;;  %v2998_v49 = vmul.f32 %v2977_v39, %v2911_v48 }
 0x4fd   : > { %v3350_v46 = vpop.f32.mrf.mxu0  ;;  %v3356_v4 = vpop.f32.mrf.mxu1 }
 0x4fe   : > { %v3009_v54 = vadd.f32 %v3281_v40, %v2994_v60  ;;  %v3013_v1 = vadd.f32 %v3281_v40, %v2998_v49  ;;  %v2997_v21 = vmul.f32 %v3350_v46, %v2972_v33  ;;  %v3022_v58 = vmax.f32 %v3014_v43, 0.0 }
 0x4ff   : > { %v2901_v31 = vpop.f32.mrf.mxu0  ;;  %v2921_v13 = vpop.f32.mrf.mxu1  ;;  %v3018_v12 = vmax.f32 %v3010_v6, 0.0  ;;  %v3001_v19 = vmul.f32 %v3356_v4, %v2992_v55 }
 0x500   : > { %v3012_v52 = vadd.f32 %v3281_v40, %v2997_v21  ;;  %v2996_v62 = vmul.f32 %v2967_v47, %v2901_v31  ;;  %v3000_v50 = vmul.f32 %v2987_v26, %v2921_v13  ;;  %v3033_v18 = vsel %vm3027_vm0, %v3022_v58, -1e+30 }
 0x501   : > { %v3029_v8 = vsel %vm3027_vm0, %v3018_v12, -1e+30  ;;  %v3021_v57 = vmax.f32 %v3013_v1, 0.0  ;;  %v3017_v36 = vmax.f32 %v3009_v54, 0.0  ;;  %3046 = vmax.xlane.f32.xlu0 %v3033_v18  ;;  %v3016_v30 = vadd.f32 %v3281_v40, %v3001_v19 }
 0x502   : > { %v3015_v11 = vadd.f32 %v3281_v40, %v3000_v50  ;;  %3038 = vmax.xlane.f32.xlu1 %v3029_v8  ;;  %v3011_v5 = vadd.f32 %v3281_v40, %v2996_v62  ;;  %v3020_v9 = vmax.f32 %v3012_v52, 0.0 }
 0x503   : > { %v3032_v17 = vsel %vm3027_vm0, %v3021_v57, -1e+30  ;;  %v3028_v56 = vsel %vm3027_vm0, %v3017_v36, -1e+30  ;;  %v3024_v20 = vmax.f32 %v3016_v30, 0.0 }
 0x504   : > { %v3023_v61 = vmax.f32 %v3015_v11, 0.0  ;;  %v3031_v32 = vsel %vm3027_vm0, %v3020_v9, -1e+30  ;;  %v3019_v3 = vmax.f32 %v3011_v5, 0.0 }
 0x505   : > { %3036 = vmax.xlane.f32.xlu0 %v3028_v56  ;;  %v3035_v28 = vsel %vm3027_vm0, %v3024_v20, -1e+30 }
 0x506   : > { %3044 = vmax.xlane.f32.xlu1 %v3032_v17  ;;  %v3034_v2 = vsel %vm3027_vm0, %v3023_v61, -1e+30  ;;  %v3030_v63 = vsel %vm3027_vm0, %v3019_v3, -1e+30 }
 0x509   : > { %3042 = vmax.xlane.f32.xlu0 %v3031_v32 }
 0x50a   : > { %3048 = vmax.xlane.f32.xlu1 %v3034_v2 }
 0x50d   : > { %3040 = vmax.xlane.f32.xlu0 %v3030_v63 }
 0x511   : > { %3050 = vmax.xlane.f32.xlu0 %v3035_v28 }
 0x58a   : > { %v3047_v29 = vpop.xlane.xlu0 %3046 }
 0x58b   : > { %v3039_v22 = vpop.xlane.xlu1 %3038  ;;  %v3057_v7 = vsub.f32 %v3033_v18, %v3047_v29 }
 0x58c   : > { %v3053_v38 = vsub.f32 %v3029_v8, %v3039_v22 }
 0x58d   : > { %v3070_v34 = vmul.f32 1.442695, %v3057_v7 }
 0x58e   : > { %v3062_v42 = vmul.f32 1.442695, %v3053_v38  ;;  %v3037_v35 = vpop.xlane.xlu0 %3036 }
 0x58f   : > { %v3045_v15 = vpop.xlane.xlu1 %3044  ;;  %v3052_v37 = vsub.f32 %v3028_v56, %v3037_v35 }
 0x590   : > { %v3056_v59 = vsub.f32 %v3032_v17, %v3045_v15  ;;  %3616 = vpow2.f32 %v3062_v42 }
 0x591   : > { %v3060_v16 = vmul.f32 1.442695, %v3052_v37  ;;  %3618 = vpow2.f32 %v3070_v34 }
 0x592   : > { %v3068_v51 = vmul.f32 1.442695, %v3056_v59  ;;  %v3043_v10 = vpop.xlane.xlu0 %3042 }
 0x593   : > { %v3049_v47 = vpop.xlane.xlu1 %3048  ;;  %v3055_v45 = vsub.f32 %v3031_v32, %v3043_v10  ;;  %3620 = vpow2.f32 %v3060_v16 }
 0x594   : > { %3622 = vpow2.f32 %v3068_v51  ;;  %v3058_v27 = vsub.f32 %v3034_v2, %v3049_v47 }
 0x595   : > { %v3066_v33 = vmul.f32 1.442695, %v3055_v45 }
 0x596   : > { %v3041_v53 = vpop.xlane.xlu0 %3040  ;;  %v3072_v0 = vmul.f32 1.442695, %v3058_v27 }
 0x597   : > { %v3054_v14 = vsub.f32 %v3030_v63, %v3041_v53  ;;  %3624 = vpow2.f32 %v3066_v33 }
 0x599   : > { %v3064_v39 = vmul.f32 1.442695, %v3054_v14 }
 0x59a   : > { %v3051_v40 = vpop.xlane.xlu0 %3050 }
 0x59b   : > { %3626 = vpow2.f32 %v3064_v39  ;;  %v3059_v44 = vsub.f32 %v3035_v28, %v3051_v40 }
 0x59c   : > { %3628 = vpow2.f32 %v3072_v0 }
 0x59d   : > { %v3617_v23 = vpop.eup %3616  ;;  %v3074_v24 = vmul.f32 1.442695, %v3059_v44 }
 0x59e   : > { %v3077_v25 = vsel %vm3027_vm0, %v3617_v23, 0.0  ;;  %v3619_v48 = vpop.eup %3618 }
 0x59f   : > { %3630 = vpow2.f32 %v3074_v24  ;;  %3086 = vadd.xlane.f32.xlu0 %v3077_v25  ;;  %v3081_v60 = vsel %vm3027_vm0, %v3619_v48, 0.0 }
 0x5a0   : > { %v3621_v6 = vpop.eup %3620 }
 0x5a1   : > { %v3076_v43 = vsel %vm3027_vm0, %v3621_v6, 0.0  ;;  %v3623_v49 = vpop.eup %3622 }
 0x5a2   : > { %3084 = vadd.xlane.f32.xlu1 %v3076_v43  ;;  %v3080_v4 = vsel %vm3027_vm0, %v3623_v49, 0.0 }
 0x5a3   : > { %3094 = vadd.xlane.f32.xlu0 %v3081_v60 }
 0x5a4   : > { %v3625_v46 = vpop.eup %3624 }
 0x5a5   : > { %v3079_v26 = vsel %vm3027_vm0, %v3625_v46, 0.0 }
 0x5a6   : > { %3092 = vadd.xlane.f32.xlu1 %v3080_v4 }
 0x5a7   : > { %3090 = vadd.xlane.f32.xlu0 %v3079_v26 }
 0x5a8   : > { %v3627_v54 = vpop.eup %3626 }
 0x5a9   : > { %v3078_v1 = vsel %vm3027_vm0, %v3627_v54, 0.0  ;;  %v3629_v21 = vpop.eup %3628 }
 0x5aa   : > { %3088 = vadd.xlane.f32.xlu1 %v3078_v1  ;;  %v3082_v58 = vsel %vm3027_vm0, %v3629_v21, 0.0 }
 0x5ac   : > { %v3631_v31 = vpop.eup %3630 }
 0x5ad   : > { %v3083_v13 = vsel %vm3027_vm0, %v3631_v31, 0.0 }
 0x5ae   : > { %3098 = vadd.xlane.f32.xlu0 %v3083_v13  ;;  %3096 = vadd.xlane.f32.xlu1 %v3082_v58 }
 0x628   : > { %v3087_v12 = vpop.xlane.xlu0 %3086 }
 0x629   : > { %3632 = vrcp.f32 %v3087_v12 }
 0x62b   : > { %v3085_v52 = vpop.xlane.xlu1 %3084 }
 0x62c   : > { %v3095_v62 = vpop.xlane.xlu0 %3094  ;;  %3634 = vrcp.f32 %v3085_v52 }
 0x62d   : > { %3636 = vrcp.f32 %v3095_v62 }
 0x62f   : > { %v3093_v50 = vpop.xlane.xlu1 %3092 }
 0x630   : > { %v3091_v18 = vpop.xlane.xlu0 %3090  ;;  %3638 = vrcp.f32 %v3093_v50 }
 0x631   : > { %3640 = vrcp.f32 %v3091_v18 }
 0x633   : > { %v3089_v8 = vpop.xlane.xlu1 %3088 }
 0x634   : > { %3642 = vrcp.f32 %v3089_v8 }
 0x636   : > { %v3633_v57 = vpop.eup %3632 }
 0x637   : > { %v3103_v41 = vmul.f32 %v3633_v57, %v3077_v25  ;;  %v3099_v36 = vpop.xlane.xlu0 %3098  ;;  %v3097_v11 = vpop.xlane.xlu1 %3096 }
 0x638   : > { %3644 = vrcp.f32 %v3099_v36 }
 0x639   : > { %3117 = vst [vmem:[%s4027_s12 + $0x8] sm:$0xff] %v3103_v41  ;;  %3646 = vrcp.f32 %v3097_v11  ;;  %v3635_v55 = vpop.eup %3634 }
 0x63a   : > { %v3637_v19 = vpop.eup %3636  ;;  %v3101_v5 = vmul.f32 %v3635_v55, %v3076_v43 }
 0x63b   : > { %v3111_v17 = vmul.f32 %v3637_v19, %v3081_v60 }
 0x63c   : > { %3116 = vst [vmem:[%s4027_s12] sm:$0xff] %v3101_v5 }
 0x63d   : > { %v3639_v56 = vpop.eup %3638  ;;  %3121 = vst [vmem:[%s4027_s12 + $0x28] sm:$0xff] %v3111_v17 }
 0x63e   : > { %v3641_v61 = vpop.eup %3640  ;;  %v3109_v9 = vmul.f32 %v3639_v56, %v3080_v4 }
 0x63f   : > { %v3107_v30 = vmul.f32 %v3641_v61, %v3079_v26 }
 0x640   : > { %3120 = vst [vmem:[%s4027_s12 + $0x20] sm:$0xff] %v3109_v9 }
 0x641   : > { %v3643_v2 = vpop.eup %3642  ;;  %3119 = vst [vmem:[%s4027_s12 + $0x18] sm:$0xff] %v3107_v30 }
 0x642   : > { %v3105_v32 = vmul.f32 %v3643_v2, %v3078_v1 }
 0x644   : > { %3118 = vst [vmem:[%s4027_s12 + $0x10] sm:$0xff] %v3105_v32 }
 0x645   : > { %v3645_v3 = vpop.eup %3644 }
 0x646   : > { %v3647_v63 = vpop.eup %3646  ;;  %v3115_v20 = vmul.f32 %v3645_v3, %v3083_v13 }
 0x647   : > { %v3113_v28 = vmul.f32 %v3647_v63, %v3082_v58 }
 0x648   : > { %3123 = vst [vmem:[%s4027_s12 + $0x38] sm:$0xff] %v3115_v20 }
 0x649   : > { %3122 = vst [vmem:[%s4027_s12 + $0x30] sm:$0xff] %v3113_v28 }
 0x64a   : > { %3716 = shalt.err (!%p3713_p10)
}
 0x64b   : > { %s3717_s12 = scalar_lea.hbm %s6087_s15, 1024  ;;  %s3721_s28 = scalar_lea.hbm %s6141_s7, 2048 }
 0x64c   : > { %p3718_p3 = scmp.ne.s32.totalorder %s6087_s15, %s3717_s12  ;;  %p3722_p4 = scmp.lt.s32.totalorder %s6087_s15, %s6141_s7 }
 0x64d   : > { %p3723_p8 = scmp.lt.s32.totalorder %s3721_s28, %s3717_s12 }
 0x64e   : > { %p3719_p5 = pnand %p3718_p3, %p6567_p13 }
 0x64f   : > { %p3724_p7 = por %p3723_p8, %p3722_p4 }
 0x650   : > { %p3720_p11 = pneg %p3719_p5 }
 0x652   : > { %p3725_p12 = pnand %p3724_p7, %p3720_p11 }
 0x654   : > { %3728 = shalt.err (!%p3725_p12)
}
 0x655   : > { %s3816_s13 = smov 128   ;;  %s3817_s27 = smov 8  }
 0x656   : > { %3395 = dma.vmem_to_hbm [thread:$0]  (%p6567_p13), %s6089_s21, 1024, %s6087_s15, %s3125_s20, %s3816_s13, %s3816_s13, %s3817_s27  }
 0x657 PF: > { %s3153_s24 = sand.u32 1, %s3761_s29   ;;  %p6568_p0 = scmp.ne.s32.totalorder %s6216_s18, 0 }
 0x658   : > { %p6569_p1 = scmp.ge.s32.totalorder %s3773_s8, 2  ;;  %s3154_s9 = scalar_lea.sflag [#allocation8], %s3153_s24 }
 0x65a   : > { %p3406_p6 = pnand %p6569_p1, %p6568_p0 }
 0x65c   : > { %p3407_p9 = pneg %p3406_p6 }
 0x65e   : > { %3756 = dma.done.wait (%p3407_p9), %s3154_s9, 1024  }
 0x65f   : > { %3758 = vsyncadd (%p3407_p9), %s3154_s9, 4294966272  ;;  %p27_p2 = scmp.ge.s32.totalorder %s3886_s11, 4   ;;  %s6570_s29 = smov %s3765_s0 }
 0x660   : > { %s6571_s0 = smov %s3769_s30  ;;  %s6572_s30 = smov %s3898_s14 }
 0x661   : > { %s6573_s8 = smov %s3886_s11  ;;  %29 = sbr.rel (!%p27_p2) target bundleno = 21 (0x15), region = 105 }
 0x666   :  { %3159 = vsyncpa [#allocation7], 1 }
 0x667   :  { %3161 = vsyncpa [#allocation7 + $0x1], 1 }
 0x668   :  { %3162 = vsyncpa [#allocation8], 1 }
 0x669   :  { %3164 = vsyncpa [#allocation8 + $0x1], 1 }
 0x66a   :  { %3165 = vsyncpa [#allocation9], 1 }
 0x66b   :  { %3167 = vsyncpa [#allocation9 + $0x1], 1 }

</bundles_post_ra>
